<compile_context>
chip_gen: v6e
topology: v6e:2x2x1
jax: 0.10.0
libtpu: 0.0.40
codegen_flags: <defaults>
</compile_context>

<pallas_src>
import functools

import jax
import jax.numpy as jnp
from jax.experimental import pallas as pl
from jax.experimental.pallas import tpu as pltpu


def seq2seq_loss_kernel(x2_ref, ye2_ref, yoh_ref,
                        ewf_i_ref, ewf_h_ref, ebf_ref, ebf_hn_ref,   # enc fwd (packed)
                        ewb_i_ref, ewb_h_ref, ebb_ref, ebb_hn_ref,   # enc bwd (packed)
                        wbr_ref, bbr_ref,                            # bridge [2H,H],[1,H]
                        dwi_ref, dwh_ref, db_ref, dbhn_ref,          # decoder (packed)
                        wem_ref, bem_ref,                            # emitter
                        loss_ref,                                    # out [1,1]
                        gif_ref, gib_ref, gj_ref, hdec_ref,          # VMEM scratch
                        *, B, H):
    f32 = jnp.float32
    S = x2_ref.shape[0] // B
    T = ye2_ref.shape[0] // B
    H2 = 2 * H
    H3 = 3 * H
    del H3  # (shapes are carried by the refs)

    # ---- hoisted, lane-packed input projections: ONE matmul per stream ----
    # gate order (r, z, n); b_hh pre-folded into the r/z lanes of the bias.
    x2 = x2_ref[...]                                            # [S*B, D]
    ye2 = ye2_ref[...]                                          # [T*B, D]
    gif_ref[...] = jnp.dot(x2, ewf_i_ref[...],
                           preferred_element_type=f32) + ebf_ref[...]
    gib_ref[...] = jnp.dot(x2, ewb_i_ref[...],
                           preferred_element_type=f32) + ebb_ref[...]
    gj_ref[...] = jnp.dot(ye2, dwi_ref[...],
                          preferred_element_type=f32) + db_ref[...]

    # ---- fused, fully-unrolled bidirectional encoder (final states only) ----
    whf = ewf_h_ref[...]                                        # [H, 3H]
    whb = ewb_h_ref[...]
    bhnf = ebf_hn_ref[...]                                      # [1, H]
    bhnb = ebb_hn_ref[...]
    hf = jnp.zeros((B, H), f32)
    hb = jnp.zeros((B, H), f32)
    for t in range(S):
        lof = t * B
        lob = (S - 1 - t) * B
        # one packed h @ W_hh push per direction; independent fwd/bwd interleave
        ghf = jnp.dot(hf, whf, preferred_element_type=f32)      # [B, 3H]
        ghb = jnp.dot(hb, whb, preferred_element_type=f32)
        gif = gif_ref[lof:lof + B, :]                           # [B, 3H] single load
        gib = gib_ref[lob:lob + B, :]
        rzf = jax.nn.sigmoid(gif[:, :H2] + ghf[:, :H2])         # r|z in one sigmoid
        nf = jnp.tanh(gif[:, H2:] + rzf[:, :H] * (ghf[:, H2:] + bhnf))
        hf = (1.0 - rzf[:, H:]) * nf + rzf[:, H:] * hf
        rzb = jax.nn.sigmoid(gib[:, :H2] + ghb[:, :H2])
        nb = jnp.tanh(gib[:, H2:] + rzb[:, :H] * (ghb[:, H2:] + bhnb))
        hb = (1.0 - rzb[:, H:]) * nb + rzb[:, H:] * hb

    # ---- bridge: single matmul on the lane-concatenated [B, 2H] state ----
    hcat = jnp.concatenate([hf, hb], axis=-1)                   # [B, 2H]
    s = jnp.tanh(jnp.dot(hcat, wbr_ref[...],
                         preferred_element_type=f32) + bbr_ref[...])   # [B, H]

    # ---- teacher-forced decoder (states to scratch; no per-step emitter) ----
    dwh = dwh_ref[...]                                          # [H, 3H]
    dbhn = dbhn_ref[...]                                        # [1, H]
    h = s
    for t in range(T):
        lo = t * B
        gh = jnp.dot(h, dwh, preferred_element_type=f32)        # [B, 3H]
        gi = gj_ref[lo:lo + B, :]
        rz = jax.nn.sigmoid(gi[:, :H2] + gh[:, :H2])
        n = jnp.tanh(gi[:, H2:] + rz[:, :H] * (gh[:, H2:] + dbhn))
        h = (1.0 - rz[:, H:]) * n + rz[:, H:] * h
        hdec_ref[lo:lo + B, :] = h

    # ---- batched emitter + summed CE epilogue (PAD rows pre-masked) ----
    logits = jnp.dot(hdec_ref[...], wem_ref[...],
                     preferred_element_type=f32) + bem_ref[...]  # [T*B, Vp]
    m = jnp.max(logits, axis=-1, keepdims=True)
    lse = m + jnp.log(jnp.sum(jnp.exp(logits - m), axis=-1, keepdims=True))
    # padded vocab lanes: yoh == 0 and (logits - lse) is finite (-1e30 pad) -> 0
    acc = yoh_ref[...] * (logits - lse)                          # [T*B, Vp]
    # PyTorch: return loss / len(x_sent)  (len == batch size)
    loss_ref[...] = -jnp.sum(acc, keepdims=True) / jnp.float32(B)


def _pack_gru(wi, wh, bi, bh):
    """Per-gate [3,D,H]/[3,H,H]/[3,1,H] -> lane-packed [D,3H]/[H,3H]/[1,3H]/[1,H]."""
    wi_p = jnp.concatenate([wi[0], wi[1], wi[2]], axis=-1)       # [D, 3H]
    wh_p = jnp.concatenate([wh[0], wh[1], wh[2]], axis=-1)       # [H, 3H]
    # fold b_hh into the hoisted bias for r/z; keep the n-gate b_hh separate
    b_p = jnp.concatenate([bi[0] + bh[0], bi[1] + bh[1], bi[2]], axis=-1)  # [1, 3H]
    return wi_p, wh_p, b_p, bh[2]                                # bh_n: [1, H]


def seq2seq_loss(x_embeds, y_embeds, y_onehot, y_valid, params):
    """x_embeds [S,B,D], y_embeds [T,B,D], y_onehot [T,B,V], y_valid [T,B,1]."""
    S, B, D = x_embeds.shape
    T, _, V = y_onehot.shape
    H = params["bridge_b"].shape[-1]
    VP = max(128, ((V + 127) // 128) * 128)        # lane-dense padded vocab

    # layout glue (plain JAX): time-major flatten, fold validity mask, pad vocab
    x2 = x_embeds.reshape(S * B, D)
    ye2 = y_embeds.reshape(T * B, D)
    yoh = (y_onehot * y_valid).reshape(T * B, V)
    yoh = jnp.pad(yoh, ((0, 0), (0, VP - V)))
    emit_w = jnp.pad(params["emit_w"], ((0, 0), (0, VP - V)))
    emit_b = jnp.pad(params["emit_b"], ((0, 0), (0, VP - V)),
                     constant_values=-1e30)        # FINITE pad: 0 * (-1e30) == 0

    ewf_i, ewf_h, ebf, ebf_hn = _pack_gru(params["enc_f_wi"], params["enc_f_wh"],
                                          params["enc_f_bi"], params["enc_f_bh"])
    ewb_i, ewb_h, ebb, ebb_hn = _pack_gru(params["enc_b_wi"], params["enc_b_wh"],
                                          params["enc_b_bi"], params["enc_b_bh"])
    dwi, dwh, db, dbhn = _pack_gru(params["dec_wi"], params["dec_wh"],
                                   params["dec_bi"], params["dec_bh"])
    # bridge: cat([hf, hb]) @ W  ->  single [2H, H] weight
    wbr = jnp.concatenate([params["bridge_w"][0], params["bridge_w"][1]], axis=0)

    args = (x2, ye2, yoh,
            ewf_i, ewf_h, ebf, ebf_hn,
            ewb_i, ewb_h, ebb, ebb_hn,
            wbr, params["bridge_b"],
            dwi, dwh, db, dbhn,
            emit_w, emit_b)

    kernel = functools.partial(seq2seq_loss_kernel, B=B, H=H)
    vmem = pl.BlockSpec(memory_space=pltpu.MemorySpace.VMEM)
    # Grid-less call: at these toy sizes a parallel batch grid (v7x 2-TC) is
    # not worth the per-step overhead; total VMEM footprint is < 1 MiB.
    out = pl.pallas_call(
        kernel,
        out_shape=jax.ShapeDtypeStruct((1, 1), jnp.float32),
        in_specs=[vmem] * len(args),
        out_specs=pl.BlockSpec(memory_space=pltpu.MemorySpace.VMEM),
        scratch_shapes=[
            pltpu.VMEM((S * B, 3 * H), jnp.float32),   # enc fwd gate inputs (lane-dense)
            pltpu.VMEM((S * B, 3 * H), jnp.float32),   # enc bwd gate inputs (lane-dense)
            pltpu.VMEM((T * B, 3 * H), jnp.float32),   # dec gate inputs (lane-dense)
            pltpu.VMEM((T * B, H), jnp.float32),       # decoder hidden states
        ],
    )(*args)
    return out[0, 0]


def init_params(key, D, H, V):
    """Per-gate weight layout (gate order r, z, n), pre-transposed for x @ W."""
    bound = 1.0 / float(H) ** 0.5
    names_shapes = [
        ("enc_f_wi", (3, D, H)), ("enc_f_wh", (3, H, H)),
        ("enc_f_bi", (3, 1, H)), ("enc_f_bh", (3, 1, H)),
        ("enc_b_wi", (3, D, H)), ("enc_b_wh", (3, H, H)),
        ("enc_b_bi", (3, 1, H)), ("enc_b_bh", (3, 1, H)),
        ("bridge_w", (2, H, H)), ("bridge_b", (1, H)),
        ("dec_wi", (3, D, H)), ("dec_wh", (3, H, H)),
        ("dec_bi", (3, 1, H)), ("dec_bh", (3, 1, H)),
        ("emit_w", (H, V)), ("emit_b", (1, V)),
    ]
    keys = jax.random.split(key, len(names_shapes))
    return {name: jax.random.uniform(k, shape, jnp.float32, -bound, bound)
            for k, (name, shape) in zip(keys, names_shapes)}


def reference_loss(x_embeds, y_embeds, y_onehot, y_valid, params):
    """Pure-JAX mirror of the PyTorch forward, for correctness checking."""
    S, B, _ = x_embeds.shape
    T = y_embeds.shape[0]
    H = params["bridge_b"].shape[-1]

    def gru(x_t, h, wi, wh, bi, bh):
        r = jax.nn.sigmoid(x_t @ wi[0] + bi[0] + h @ wh[0] + bh[0])
        z = jax.nn.sigmoid(x_t @ wi[1] + bi[1] + h @ wh[1] + bh[1])
        n = jnp.tanh(x_t @ wi[2] + bi[2] + r * (h @ wh[2] + bh[2]))
        return (1.0 - z) * n + z * h

    hf = jnp.zeros((B, H), jnp.float32)
    hb = jnp.zeros((B, H), jnp.float32)
    for t in range(S):
        hf = gru(x_embeds[t], hf, params["enc_f_wi"], params["enc_f_wh"],
                 params["enc_f_bi"], params["enc_f_bh"])
        hb = gru(x_embeds[S - 1 - t], hb, params["enc_b_wi"], params["enc_b_wh"],
                 params["enc_b_bi"], params["enc_b_bh"])
    s = jnp.tanh(hf @ params["bridge_w"][0] + hb @ params["bridge_w"][1]
                 + params["bridge_b"])
    loss = 0.0
    for t in range(T):
        s = gru(y_embeds[t], s, params["dec_wi"], params["dec_wh"],
                params["dec_bi"], params["dec_bh"])
        logits = s @ params["emit_w"] + params["emit_b"]
        logp = jax.nn.log_softmax(logits, axis=-1)
        ce = -jnp.sum(y_onehot[t] * logp, axis=-1, keepdims=True) * y_valid[t]
        loss = loss + jnp.sum(ce)
    return loss / B


if __name__ == "__main__":
    # small shapes consistent with the module's forward (B multiple of 8)
    B, S, T = 8, 8, 8            # batch, src len, tgt len (T_max)
    D, H = 32, 32                # input_dim, hidden_dim
    SRC_V, TGT_V = 24, 16        # vocab sizes
    PAD = 0                      # <PAD> index in target vocab (ignore_index)

    root = jax.random.PRNGKey(0)
    k_ex, k_ey, k_xt, k_yt, k_par = jax.random.split(root, 5)

    # deterministic "word embedding" tables (stand-in for BatchWordEmbeddings)
    src_table = jax.random.normal(k_ex, (SRC_V, D), jnp.float32) * 0.1
    tgt_table = jax.random.normal(k_ey, (TGT_V, D), jnp.float32) * 0.1

    x_tokens = jax.random.randint(k_xt, (B, S), 1, SRC_V)           # [B, S]
    y_raw = jax.random.randint(k_yt, (B, T), 1, TGT_V)
    y_lens = jnp.array([T, 5, 3, T, 6, 2, 7, 4], dtype=jnp.int32)   # ragged targets
    tpos = jnp.arange(T)[None, :]
    y_labels = jnp.where(tpos < y_lens[:, None], y_raw, PAD)        # [B, T] padded

    # glue: embedding lookup / one-hot / mask done in plain JAX, time-major layout
    x_embeds = src_table[x_tokens].transpose(1, 0, 2)               # [S, B, D]
    y_embeds = tgt_table[y_labels].transpose(1, 0, 2)               # [T, B, D]
    y_onehot = jax.nn.one_hot(y_labels, TGT_V,
                              dtype=jnp.float32).transpose(1, 0, 2)  # [T, B, V]
    y_valid = (y_labels != PAD).astype(jnp.float32).T[:, :, None]   # [T, B, 1]

    params = init_params(k_par, D, H, TGT_V)

    loss = jax.jit(seq2seq_loss)(x_embeds, y_embeds, y_onehot, y_valid, params)
    loss = jax.block_until_ready(loss)

    ref = reference_loss(x_embeds, y_embeds, y_onehot, y_valid, params)
    assert jnp.isfinite(loss), loss
    assert jnp.allclose(loss, ref, rtol=1e-3, atol=1e-3), (loss, ref)
    print("KERNEL_OK")
</pallas_src>

<mosaic_0001>
module attributes {stable_mosaic.version = 11 : i64} {
  func.func @seq2seq_loss_kernel(%arg0: memref<64x32xf32, #tpu.memory_space<vmem>>, %arg1: memref<64x32xf32, #tpu.memory_space<vmem>>, %arg2: memref<64x128xf32, #tpu.memory_space<vmem>>, %arg3: memref<32x96xf32, #tpu.memory_space<vmem>>, %arg4: memref<32x96xf32, #tpu.memory_space<vmem>>, %arg5: memref<1x96xf32, #tpu.memory_space<vmem>>, %arg6: memref<1x32xf32, #tpu.memory_space<vmem>>, %arg7: memref<32x96xf32, #tpu.memory_space<vmem>>, %arg8: memref<32x96xf32, #tpu.memory_space<vmem>>, %arg9: memref<1x96xf32, #tpu.memory_space<vmem>>, %arg10: memref<1x32xf32, #tpu.memory_space<vmem>>, %arg11: memref<64x32xf32, #tpu.memory_space<vmem>>, %arg12: memref<1x32xf32, #tpu.memory_space<vmem>>, %arg13: memref<32x96xf32, #tpu.memory_space<vmem>>, %arg14: memref<32x96xf32, #tpu.memory_space<vmem>>, %arg15: memref<1x96xf32, #tpu.memory_space<vmem>>, %arg16: memref<1x32xf32, #tpu.memory_space<vmem>>, %arg17: memref<32x128xf32, #tpu.memory_space<vmem>>, %arg18: memref<1x128xf32, #tpu.memory_space<vmem>>, %arg19: memref<1x1xf32, #tpu.memory_space<vmem>>, %arg20: memref<64x96xf32, #tpu.memory_space<vmem>>, %arg21: memref<64x96xf32, #tpu.memory_space<vmem>>, %arg22: memref<64x96xf32, #tpu.memory_space<vmem>>, %arg23: memref<64x32xf32, #tpu.memory_space<vmem>>) attributes {dimension_semantics = [], scalar_prefetch = 0 : i64, scratch_operands = 4 : i64, tpu.core_type = #tpu.core_type<tc>} {
    %c0 = arith.constant 0 : index
    %c0_0 = arith.constant 0 : index
    %0 = vector.load %arg0[%c0, %c0_0] : memref<64x32xf32, #tpu.memory_space<vmem>>, vector<64x32xf32>
    %c0_1 = arith.constant 0 : index
    %c0_2 = arith.constant 0 : index
    %1 = vector.load %arg1[%c0_1, %c0_2] : memref<64x32xf32, #tpu.memory_space<vmem>>, vector<64x32xf32>
    %c0_3 = arith.constant 0 : index
    %c0_4 = arith.constant 0 : index
    %2 = vector.load %arg3[%c0_3, %c0_4] : memref<32x96xf32, #tpu.memory_space<vmem>>, vector<32x96xf32>
    %cst = arith.constant dense<0.000000e+00> : vector<64x96xf32>
    %3 = tpu.matmul %0, %2, %cst {dimension_numbers = #tpu.dot_dimension_numbers<[1], [0], [0], [1], [0, 0, 1, 1], [], []>} : vector<64x32xf32>, vector<32x96xf32>, vector<64x96xf32> -> vector<64x96xf32>
    %c0_5 = arith.constant 0 : index
    %c0_6 = arith.constant 0 : index
    %4 = vector.load %arg5[%c0_5, %c0_6] : memref<1x96xf32, #tpu.memory_space<vmem>>, vector<1x96xf32>
    %5 = vector.broadcast %4 : vector<1x96xf32> to vector<64x96xf32>
    %6 = arith.addf %3, %5 : vector<64x96xf32>
    %c0_7 = arith.constant 0 : index
    %c0_8 = arith.constant 0 : index
    %7 = vector.load %arg20[%c0_7, %c0_8] : memref<64x96xf32, #tpu.memory_space<vmem>>, vector<64x96xf32>
    tpu.vector_store %arg20[%c0_7, %c0_8], %6 {strides = array<i32>} : memref<64x96xf32, #tpu.memory_space<vmem>>, vector<64x96xf32>,
    %c0_9 = arith.constant 0 : index
    %c0_10 = arith.constant 0 : index
    %8 = vector.load %arg7[%c0_9, %c0_10] : memref<32x96xf32, #tpu.memory_space<vmem>>, vector<32x96xf32>
    %cst_11 = arith.constant dense<0.000000e+00> : vector<64x96xf32>
    %9 = tpu.matmul %0, %8, %cst_11 {dimension_numbers = #tpu.dot_dimension_numbers<[1], [0], [0], [1], [0, 0, 1, 1], [], []>} : vector<64x32xf32>, vector<32x96xf32>, vector<64x96xf32> -> vector<64x96xf32>
    %c0_12 = arith.constant 0 : index
    %c0_13 = arith.constant 0 : index
    %10 = vector.load %arg9[%c0_12, %c0_13] : memref<1x96xf32, #tpu.memory_space<vmem>>, vector<1x96xf32>
    %11 = vector.broadcast %10 : vector<1x96xf32> to vector<64x96xf32>
    %12 = arith.addf %9, %11 : vector<64x96xf32>
    %c0_14 = arith.constant 0 : index
    %c0_15 = arith.constant 0 : index
    %13 = vector.load %arg21[%c0_14, %c0_15] : memref<64x96xf32, #tpu.memory_space<vmem>>, vector<64x96xf32>
    tpu.vector_store %arg21[%c0_14, %c0_15], %12 {strides = array<i32>} : memref<64x96xf32, #tpu.memory_space<vmem>>, vector<64x96xf32>,
    %c0_16 = arith.constant 0 : index
    %c0_17 = arith.constant 0 : index
    %14 = vector.load %arg13[%c0_16, %c0_17] : memref<32x96xf32, #tpu.memory_space<vmem>>, vector<32x96xf32>
    %cst_18 = arith.constant dense<0.000000e+00> : vector<64x96xf32>
    %15 = tpu.matmul %1, %14, %cst_18 {dimension_numbers = #tpu.dot_dimension_numbers<[1], [0], [0], [1], [0, 0, 1, 1], [], []>} : vector<64x32xf32>, vector<32x96xf32>, vector<64x96xf32> -> vector<64x96xf32>
    %c0_19 = arith.constant 0 : index
    %c0_20 = arith.constant 0 : index
    %16 = vector.load %arg15[%c0_19, %c0_20] : memref<1x96xf32, #tpu.memory_space<vmem>>, vector<1x96xf32>
    %17 = vector.broadcast %16 : vector<1x96xf32> to vector<64x96xf32>
    %18 = arith.addf %15, %17 : vector<64x96xf32>
    %c0_21 = arith.constant 0 : index
    %c0_22 = arith.constant 0 : index
    %19 = vector.load %arg22[%c0_21, %c0_22] : memref<64x96xf32, #tpu.memory_space<vmem>>, vector<64x96xf32>
    tpu.vector_store %arg22[%c0_21, %c0_22], %18 {strides = array<i32>} : memref<64x96xf32, #tpu.memory_space<vmem>>, vector<64x96xf32>,
    %c0_23 = arith.constant 0 : index
    %c0_24 = arith.constant 0 : index
    %20 = vector.load %arg4[%c0_23, %c0_24] : memref<32x96xf32, #tpu.memory_space<vmem>>, vector<32x96xf32>
    %c0_25 = arith.constant 0 : index
    %c0_26 = arith.constant 0 : index
    %21 = vector.load %arg8[%c0_25, %c0_26] : memref<32x96xf32, #tpu.memory_space<vmem>>, vector<32x96xf32>
    %c0_27 = arith.constant 0 : index
    %c0_28 = arith.constant 0 : index
    %22 = vector.load %arg6[%c0_27, %c0_28] : memref<1x32xf32, #tpu.memory_space<vmem>>, vector<1x32xf32>
    %c0_29 = arith.constant 0 : index
    %c0_30 = arith.constant 0 : index
    %23 = vector.load %arg10[%c0_29, %c0_30] : memref<1x32xf32, #tpu.memory_space<vmem>>, vector<1x32xf32>
    %cst_31 = arith.constant 0.000000e+00 : f32
    %24 = vector.broadcast %cst_31 : f32 to vector<8x32xf32>
    %cst_32 = arith.constant 0.000000e+00 : f32
    %25 = vector.broadcast %cst_32 : f32 to vector<8x32xf32>
    %cst_33 = arith.constant dense<0.000000e+00> : vector<8x96xf32>
    %26 = tpu.matmul %24, %20, %cst_33 {dimension_numbers = #tpu.dot_dimension_numbers<[1], [0], [0], [1], [0, 0, 1, 1], [], []>} : vector<8x32xf32>, vector<32x96xf32>, vector<8x96xf32> -> vector<8x96xf32>
    %cst_34 = arith.constant dense<0.000000e+00> : vector<8x96xf32>
    %27 = tpu.matmul %25, %21, %cst_34 {dimension_numbers = #tpu.dot_dimension_numbers<[1], [0], [0], [1], [0, 0, 1, 1], [], []>} : vector<8x32xf32>, vector<32x96xf32>, vector<8x96xf32> -> vector<8x96xf32>
    %c0_35 = arith.constant 0 : index
    %c0_36 = arith.constant 0 : index
    %28 = vector.load %arg20[%c0_35, %c0_36] : memref<64x96xf32, #tpu.memory_space<vmem>>, vector<8x96xf32>
    %c56 = arith.constant 56 : index
    %c0_37 = arith.constant 0 : index
    %29 = vector.load %arg21[%c56, %c0_37] : memref<64x96xf32, #tpu.memory_space<vmem>>, vector<8x96xf32>
    %30 = vector.extract_strided_slice %28 {offsets = [0, 0], sizes = [8, 64], strides = [1, 1]} : vector<8x96xf32> to vector<8x64xf32>
    %31 = vector.extract_strided_slice %26 {offsets = [0, 0], sizes = [8, 64], strides = [1, 1]} : vector<8x96xf32> to vector<8x64xf32>
    %32 = arith.addf %30, %31 : vector<8x64xf32>
    %33 = arith.negf %32 : vector<8x64xf32>
    %34 = math.exp %33 : vector<8x64xf32>
    %cst_38 = arith.constant 1.000000e+00 : f32
    %35 = vector.broadcast %cst_38 : f32 to vector<8x64xf32>
    %36 = arith.addf %35, %34 : vector<8x64xf32>
    %37 = arith.divf %35, %36 : vector<8x64xf32>
    %38 = vector.extract_strided_slice %28 {offsets = [0, 64], sizes = [8, 32], strides = [1, 1]} : vector<8x96xf32> to vector<8x32xf32>
    %39 = vector.extract_strided_slice %37 {offsets = [0, 0], sizes = [8, 32], strides = [1, 1]} : vector<8x64xf32> to vector<8x32xf32>
    %40 = vector.extract_strided_slice %26 {offsets = [0, 64], sizes = [8, 32], strides = [1, 1]} : vector<8x96xf32> to vector<8x32xf32>
    %41 = vector.broadcast %22 : vector<1x32xf32> to vector<8x32xf32>
    %42 = arith.addf %40, %41 : vector<8x32xf32>
    %43 = arith.mulf %39, %42 : vector<8x32xf32>
    %44 = arith.addf %38, %43 : vector<8x32xf32>
    %45 = math.tanh %44 : vector<8x32xf32>
    %46 = vector.extract_strided_slice %37 {offsets = [0, 32], sizes = [8, 32], strides = [1, 1]} : vector<8x64xf32> to vector<8x32xf32>
    %cst_39 = arith.constant 1.000000e+00 : f32
    %47 = vector.broadcast %cst_39 : f32 to vector<8x32xf32>
    %48 = arith.subf %47, %46 : vector<8x32xf32>
    %49 = arith.mulf %48, %45 : vector<8x32xf32>
    %50 = vector.extract_strided_slice %37 {offsets = [0, 32], sizes = [8, 32], strides = [1, 1]} : vector<8x64xf32> to vector<8x32xf32>
    %51 = arith.mulf %50, %24 : vector<8x32xf32>
    %52 = arith.addf %49, %51 : vector<8x32xf32>
    %53 = vector.extract_strided_slice %29 {offsets = [0, 0], sizes = [8, 64], strides = [1, 1]} : vector<8x96xf32> to vector<8x64xf32>
    %54 = vector.extract_strided_slice %27 {offsets = [0, 0], sizes = [8, 64], strides = [1, 1]} : vector<8x96xf32> to vector<8x64xf32>
    %55 = arith.addf %53, %54 : vector<8x64xf32>
    %56 = arith.negf %55 : vector<8x64xf32>
    %57 = math.exp %56 : vector<8x64xf32>
    %cst_40 = arith.constant 1.000000e+00 : f32
    %58 = vector.broadcast %cst_40 : f32 to vector<8x64xf32>
    %59 = arith.addf %58, %57 : vector<8x64xf32>
    %60 = arith.divf %58, %59 : vector<8x64xf32>
    %61 = vector.extract_strided_slice %29 {offsets = [0, 64], sizes = [8, 32], strides = [1, 1]} : vector<8x96xf32> to vector<8x32xf32>
    %62 = vector.extract_strided_slice %60 {offsets = [0, 0], sizes = [8, 32], strides = [1, 1]} : vector<8x64xf32> to vector<8x32xf32>
    %63 = vector.extract_strided_slice %27 {offsets = [0, 64], sizes = [8, 32], strides = [1, 1]} : vector<8x96xf32> to vector<8x32xf32>
    %64 = vector.broadcast %23 : vector<1x32xf32> to vector<8x32xf32>
    %65 = arith.addf %63, %64 : vector<8x32xf32>
    %66 = arith.mulf %62, %65 : vector<8x32xf32>
    %67 = arith.addf %61, %66 : vector<8x32xf32>
    %68 = math.tanh %67 : vector<8x32xf32>
    %69 = vector.extract_strided_slice %60 {offsets = [0, 32], sizes = [8, 32], strides = [1, 1]} : vector<8x64xf32> to vector<8x32xf32>
    %cst_41 = arith.constant 1.000000e+00 : f32
    %70 = vector.broadcast %cst_41 : f32 to vector<8x32xf32>
    %71 = arith.subf %70, %69 : vector<8x32xf32>
    %72 = arith.mulf %71, %68 : vector<8x32xf32>
    %73 = vector.extract_strided_slice %60 {offsets = [0, 32], sizes = [8, 32], strides = [1, 1]} : vector<8x64xf32> to vector<8x32xf32>
    %74 = arith.mulf %73, %25 : vector<8x32xf32>
    %75 = arith.addf %72, %74 : vector<8x32xf32>
    %cst_42 = arith.constant dense<0.000000e+00> : vector<8x96xf32>
    %76 = tpu.matmul %52, %20, %cst_42 {dimension_numbers = #tpu.dot_dimension_numbers<[1], [0], [0], [1], [0, 0, 1, 1], [], []>} : vector<8x32xf32>, vector<32x96xf32>, vector<8x96xf32> -> vector<8x96xf32>
    %cst_43 = arith.constant dense<0.000000e+00> : vector<8x96xf32>
    %77 = tpu.matmul %75, %21, %cst_43 {dimension_numbers = #tpu.dot_dimension_numbers<[1], [0], [0], [1], [0, 0, 1, 1], [], []>} : vector<8x32xf32>, vector<32x96xf32>, vector<8x96xf32> -> vector<8x96xf32>
    %c8 = arith.constant 8 : index
    %c0_44 = arith.constant 0 : index
    %78 = vector.load %arg20[%c8, %c0_44] : memref<64x96xf32, #tpu.memory_space<vmem>>, vector<8x96xf32>
    %c48 = arith.constant 48 : index
    %c0_45 = arith.constant 0 : index
    %79 = vector.load %arg21[%c48, %c0_45] : memref<64x96xf32, #tpu.memory_space<vmem>>, vector<8x96xf32>
    %80 = vector.extract_strided_slice %78 {offsets = [0, 0], sizes = [8, 64], strides = [1, 1]} : vector<8x96xf32> to vector<8x64xf32>
    %81 = vector.extract_strided_slice %76 {offsets = [0, 0], sizes = [8, 64], strides = [1, 1]} : vector<8x96xf32> to vector<8x64xf32>
    %82 = arith.addf %80, %81 : vector<8x64xf32>
    %83 = arith.negf %82 : vector<8x64xf32>
    %84 = math.exp %83 : vector<8x64xf32>
    %cst_46 = arith.constant 1.000000e+00 : f32
    %85 = vector.broadcast %cst_46 : f32 to vector<8x64xf32>
    %86 = arith.addf %85, %84 : vector<8x64xf32>
    %87 = arith.divf %85, %86 : vector<8x64xf32>
    %88 = vector.extract_strided_slice %78 {offsets = [0, 64], sizes = [8, 32], strides = [1, 1]} : vector<8x96xf32> to vector<8x32xf32>
    %89 = vector.extract_strided_slice %87 {offsets = [0, 0], sizes = [8, 32], strides = [1, 1]} : vector<8x64xf32> to vector<8x32xf32>
    %90 = vector.extract_strided_slice %76 {offsets = [0, 64], sizes = [8, 32], strides = [1, 1]} : vector<8x96xf32> to vector<8x32xf32>
    %91 = vector.broadcast %22 : vector<1x32xf32> to vector<8x32xf32>
    %92 = arith.addf %90, %91 : vector<8x32xf32>
    %93 = arith.mulf %89, %92 : vector<8x32xf32>
    %94 = arith.addf %88, %93 : vector<8x32xf32>
    %95 = math.tanh %94 : vector<8x32xf32>
    %96 = vector.extract_strided_slice %87 {offsets = [0, 32], sizes = [8, 32], strides = [1, 1]} : vector<8x64xf32> to vector<8x32xf32>
    %cst_47 = arith.constant 1.000000e+00 : f32
    %97 = vector.broadcast %cst_47 : f32 to vector<8x32xf32>
    %98 = arith.subf %97, %96 : vector<8x32xf32>
    %99 = arith.mulf %98, %95 : vector<8x32xf32>
    %100 = vector.extract_strided_slice %87 {offsets = [0, 32], sizes = [8, 32], strides = [1, 1]} : vector<8x64xf32> to vector<8x32xf32>
    %101 = arith.mulf %100, %52 : vector<8x32xf32>
    %102 = arith.addf %99, %101 : vector<8x32xf32>
    %103 = vector.extract_strided_slice %79 {offsets = [0, 0], sizes = [8, 64], strides = [1, 1]} : vector<8x96xf32> to vector<8x64xf32>
    %104 = vector.extract_strided_slice %77 {offsets = [0, 0], sizes = [8, 64], strides = [1, 1]} : vector<8x96xf32> to vector<8x64xf32>
    %105 = arith.addf %103, %104 : vector<8x64xf32>
    %106 = arith.negf %105 : vector<8x64xf32>
    %107 = math.exp %106 : vector<8x64xf32>
    %cst_48 = arith.constant 1.000000e+00 : f32
    %108 = vector.broadcast %cst_48 : f32 to vector<8x64xf32>
    %109 = arith.addf %108, %107 : vector<8x64xf32>
    %110 = arith.divf %108, %109 : vector<8x64xf32>
    %111 = vector.extract_strided_slice %79 {offsets = [0, 64], sizes = [8, 32], strides = [1, 1]} : vector<8x96xf32> to vector<8x32xf32>
    %112 = vector.extract_strided_slice %110 {offsets = [0, 0], sizes = [8, 32], strides = [1, 1]} : vector<8x64xf32> to vector<8x32xf32>
    %113 = vector.extract_strided_slice %77 {offsets = [0, 64], sizes = [8, 32], strides = [1, 1]} : vector<8x96xf32> to vector<8x32xf32>
    %114 = vector.broadcast %23 : vector<1x32xf32> to vector<8x32xf32>
    %115 = arith.addf %113, %114 : vector<8x32xf32>
    %116 = arith.mulf %112, %115 : vector<8x32xf32>
    %117 = arith.addf %111, %116 : vector<8x32xf32>
    %118 = math.tanh %117 : vector<8x32xf32>
    %119 = vector.extract_strided_slice %110 {offsets = [0, 32], sizes = [8, 32], strides = [1, 1]} : vector<8x64xf32> to vector<8x32xf32>
    %cst_49 = arith.constant 1.000000e+00 : f32
    %120 = vector.broadcast %cst_49 : f32 to vector<8x32xf32>
    %121 = arith.subf %120, %119 : vector<8x32xf32>
    %122 = arith.mulf %121, %118 : vector<8x32xf32>
    %123 = vector.extract_strided_slice %110 {offsets = [0, 32], sizes = [8, 32], strides = [1, 1]} : vector<8x64xf32> to vector<8x32xf32>
    %124 = arith.mulf %123, %75 : vector<8x32xf32>
    %125 = arith.addf %122, %124 : vector<8x32xf32>
    %cst_50 = arith.constant dense<0.000000e+00> : vector<8x96xf32>
    %126 = tpu.matmul %102, %20, %cst_50 {dimension_numbers = #tpu.dot_dimension_numbers<[1], [0], [0], [1], [0, 0, 1, 1], [], []>} : vector<8x32xf32>, vector<32x96xf32>, vector<8x96xf32> -> vector<8x96xf32>
    %cst_51 = arith.constant dense<0.000000e+00> : vector<8x96xf32>
    %127 = tpu.matmul %125, %21, %cst_51 {dimension_numbers = #tpu.dot_dimension_numbers<[1], [0], [0], [1], [0, 0, 1, 1], [], []>} : vector<8x32xf32>, vector<32x96xf32>, vector<8x96xf32> -> vector<8x96xf32>
    %c16 = arith.constant 16 : index
    %c0_52 = arith.constant 0 : index
    %128 = vector.load %arg20[%c16, %c0_52] : memref<64x96xf32, #tpu.memory_space<vmem>>, vector<8x96xf32>
    %c40 = arith.constant 40 : index
    %c0_53 = arith.constant 0 : index
    %129 = vector.load %arg21[%c40, %c0_53] : memref<64x96xf32, #tpu.memory_space<vmem>>, vector<8x96xf32>
    %130 = vector.extract_strided_slice %128 {offsets = [0, 0], sizes = [8, 64], strides = [1, 1]} : vector<8x96xf32> to vector<8x64xf32>
    %131 = vector.extract_strided_slice %126 {offsets = [0, 0], sizes = [8, 64], strides = [1, 1]} : vector<8x96xf32> to vector<8x64xf32>
    %132 = arith.addf %130, %131 : vector<8x64xf32>
    %133 = arith.negf %132 : vector<8x64xf32>
    %134 = math.exp %133 : vector<8x64xf32>
    %cst_54 = arith.constant 1.000000e+00 : f32
    %135 = vector.broadcast %cst_54 : f32 to vector<8x64xf32>
    %136 = arith.addf %135, %134 : vector<8x64xf32>
    %137 = arith.divf %135, %136 : vector<8x64xf32>
    %138 = vector.extract_strided_slice %128 {offsets = [0, 64], sizes = [8, 32], strides = [1, 1]} : vector<8x96xf32> to vector<8x32xf32>
    %139 = vector.extract_strided_slice %137 {offsets = [0, 0], sizes = [8, 32], strides = [1, 1]} : vector<8x64xf32> to vector<8x32xf32>
    %140 = vector.extract_strided_slice %126 {offsets = [0, 64], sizes = [8, 32], strides = [1, 1]} : vector<8x96xf32> to vector<8x32xf32>
    %141 = vector.broadcast %22 : vector<1x32xf32> to vector<8x32xf32>
    %142 = arith.addf %140, %141 : vector<8x32xf32>
    %143 = arith.mulf %139, %142 : vector<8x32xf32>
    %144 = arith.addf %138, %143 : vector<8x32xf32>
    %145 = math.tanh %144 : vector<8x32xf32>
    %146 = vector.extract_strided_slice %137 {offsets = [0, 32], sizes = [8, 32], strides = [1, 1]} : vector<8x64xf32> to vector<8x32xf32>
    %cst_55 = arith.constant 1.000000e+00 : f32
    %147 = vector.broadcast %cst_55 : f32 to vector<8x32xf32>
    %148 = arith.subf %147, %146 : vector<8x32xf32>
    %149 = arith.mulf %148, %145 : vector<8x32xf32>
    %150 = vector.extract_strided_slice %137 {offsets = [0, 32], sizes = [8, 32], strides = [1, 1]} : vector<8x64xf32> to vector<8x32xf32>
    %151 = arith.mulf %150, %102 : vector<8x32xf32>
    %152 = arith.addf %149, %151 : vector<8x32xf32>
    %153 = vector.extract_strided_slice %129 {offsets = [0, 0], sizes = [8, 64], strides = [1, 1]} : vector<8x96xf32> to vector<8x64xf32>
    %154 = vector.extract_strided_slice %127 {offsets = [0, 0], sizes = [8, 64], strides = [1, 1]} : vector<8x96xf32> to vector<8x64xf32>
    %155 = arith.addf %153, %154 : vector<8x64xf32>
    %156 = arith.negf %155 : vector<8x64xf32>
    %157 = math.exp %156 : vector<8x64xf32>
    %cst_56 = arith.constant 1.000000e+00 : f32
    %158 = vector.broadcast %cst_56 : f32 to vector<8x64xf32>
    %159 = arith.addf %158, %157 : vector<8x64xf32>
    %160 = arith.divf %158, %159 : vector<8x64xf32>
    %161 = vector.extract_strided_slice %129 {offsets = [0, 64], sizes = [8, 32], strides = [1, 1]} : vector<8x96xf32> to vector<8x32xf32>
    %162 = vector.extract_strided_slice %160 {offsets = [0, 0], sizes = [8, 32], strides = [1, 1]} : vector<8x64xf32> to vector<8x32xf32>
    %163 = vector.extract_strided_slice %127 {offsets = [0, 64], sizes = [8, 32], strides = [1, 1]} : vector<8x96xf32> to vector<8x32xf32>
    %164 = vector.broadcast %23 : vector<1x32xf32> to vector<8x32xf32>
    %165 = arith.addf %163, %164 : vector<8x32xf32>
    %166 = arith.mulf %162, %165 : vector<8x32xf32>
    %167 = arith.addf %161, %166 : vector<8x32xf32>
    %168 = math.tanh %167 : vector<8x32xf32>
    %169 = vector.extract_strided_slice %160 {offsets = [0, 32], sizes = [8, 32], strides = [1, 1]} : vector<8x64xf32> to vector<8x32xf32>
    %cst_57 = arith.constant 1.000000e+00 : f32
    %170 = vector.broadcast %cst_57 : f32 to vector<8x32xf32>
    %171 = arith.subf %170, %169 : vector<8x32xf32>
    %172 = arith.mulf %171, %168 : vector<8x32xf32>
    %173 = vector.extract_strided_slice %160 {offsets = [0, 32], sizes = [8, 32], strides = [1, 1]} : vector<8x64xf32> to vector<8x32xf32>
    %174 = arith.mulf %173, %125 : vector<8x32xf32>
    %175 = arith.addf %172, %174 : vector<8x32xf32>
    %cst_58 = arith.constant dense<0.000000e+00> : vector<8x96xf32>
    %176 = tpu.matmul %152, %20, %cst_58 {dimension_numbers = #tpu.dot_dimension_numbers<[1], [0], [0], [1], [0, 0, 1, 1], [], []>} : vector<8x32xf32>, vector<32x96xf32>, vector<8x96xf32> -> vector<8x96xf32>
    %cst_59 = arith.constant dense<0.000000e+00> : vector<8x96xf32>
    %177 = tpu.matmul %175, %21, %cst_59 {dimension_numbers = #tpu.dot_dimension_numbers<[1], [0], [0], [1], [0, 0, 1, 1], [], []>} : vector<8x32xf32>, vector<32x96xf32>, vector<8x96xf32> -> vector<8x96xf32>
    %c24 = arith.constant 24 : index
    %c0_60 = arith.constant 0 : index
    %178 = vector.load %arg20[%c24, %c0_60] : memref<64x96xf32, #tpu.memory_space<vmem>>, vector<8x96xf32>
    %c32 = arith.constant 32 : index
    %c0_61 = arith.constant 0 : index
    %179 = vector.load %arg21[%c32, %c0_61] : memref<64x96xf32, #tpu.memory_space<vmem>>, vector<8x96xf32>
    %180 = vector.extract_strided_slice %178 {offsets = [0, 0], sizes = [8, 64], strides = [1, 1]} : vector<8x96xf32> to vector<8x64xf32>
    %181 = vector.extract_strided_slice %176 {offsets = [0, 0], sizes = [8, 64], strides = [1, 1]} : vector<8x96xf32> to vector<8x64xf32>
    %182 = arith.addf %180, %181 : vector<8x64xf32>
    %183 = arith.negf %182 : vector<8x64xf32>
    %184 = math.exp %183 : vector<8x64xf32>
    %cst_62 = arith.constant 1.000000e+00 : f32
    %185 = vector.broadcast %cst_62 : f32 to vector<8x64xf32>
    %186 = arith.addf %185, %184 : vector<8x64xf32>
    %187 = arith.divf %185, %186 : vector<8x64xf32>
    %188 = vector.extract_strided_slice %178 {offsets = [0, 64], sizes = [8, 32], strides = [1, 1]} : vector<8x96xf32> to vector<8x32xf32>
    %189 = vector.extract_strided_slice %187 {offsets = [0, 0], sizes = [8, 32], strides = [1, 1]} : vector<8x64xf32> to vector<8x32xf32>
    %190 = vector.extract_strided_slice %176 {offsets = [0, 64], sizes = [8, 32], strides = [1, 1]} : vector<8x96xf32> to vector<8x32xf32>
    %191 = vector.broadcast %22 : vector<1x32xf32> to vector<8x32xf32>
    %192 = arith.addf %190, %191 : vector<8x32xf32>
    %193 = arith.mulf %189, %192 : vector<8x32xf32>
    %194 = arith.addf %188, %193 : vector<8x32xf32>
    %195 = math.tanh %194 : vector<8x32xf32>
    %196 = vector.extract_strided_slice %187 {offsets = [0, 32], sizes = [8, 32], strides = [1, 1]} : vector<8x64xf32> to vector<8x32xf32>
    %cst_63 = arith.constant 1.000000e+00 : f32
    %197 = vector.broadcast %cst_63 : f32 to vector<8x32xf32>
    %198 = arith.subf %197, %196 : vector<8x32xf32>
    %199 = arith.mulf %198, %195 : vector<8x32xf32>
    %200 = vector.extract_strided_slice %187 {offsets = [0, 32], sizes = [8, 32], strides = [1, 1]} : vector<8x64xf32> to vector<8x32xf32>
    %201 = arith.mulf %200, %152 : vector<8x32xf32>
    %202 = arith.addf %199, %201 : vector<8x32xf32>
    %203 = vector.extract_strided_slice %179 {offsets = [0, 0], sizes = [8, 64], strides = [1, 1]} : vector<8x96xf32> to vector<8x64xf32>
    %204 = vector.extract_strided_slice %177 {offsets = [0, 0], sizes = [8, 64], strides = [1, 1]} : vector<8x96xf32> to vector<8x64xf32>
    %205 = arith.addf %203, %204 : vector<8x64xf32>
    %206 = arith.negf %205 : vector<8x64xf32>
    %207 = math.exp %206 : vector<8x64xf32>
    %cst_64 = arith.constant 1.000000e+00 : f32
    %208 = vector.broadcast %cst_64 : f32 to vector<8x64xf32>
    %209 = arith.addf %208, %207 : vector<8x64xf32>
    %210 = arith.divf %208, %209 : vector<8x64xf32>
    %211 = vector.extract_strided_slice %179 {offsets = [0, 64], sizes = [8, 32], strides = [1, 1]} : vector<8x96xf32> to vector<8x32xf32>
    %212 = vector.extract_strided_slice %210 {offsets = [0, 0], sizes = [8, 32], strides = [1, 1]} : vector<8x64xf32> to vector<8x32xf32>
    %213 = vector.extract_strided_slice %177 {offsets = [0, 64], sizes = [8, 32], strides = [1, 1]} : vector<8x96xf32> to vector<8x32xf32>
    %214 = vector.broadcast %23 : vector<1x32xf32> to vector<8x32xf32>
    %215 = arith.addf %213, %214 : vector<8x32xf32>
    %216 = arith.mulf %212, %215 : vector<8x32xf32>
    %217 = arith.addf %211, %216 : vector<8x32xf32>
    %218 = math.tanh %217 : vector<8x32xf32>
    %219 = vector.extract_strided_slice %210 {offsets = [0, 32], sizes = [8, 32], strides = [1, 1]} : vector<8x64xf32> to vector<8x32xf32>
    %cst_65 = arith.constant 1.000000e+00 : f32
    %220 = vector.broadcast %cst_65 : f32 to vector<8x32xf32>
    %221 = arith.subf %220, %219 : vector<8x32xf32>
    %222 = arith.mulf %221, %218 : vector<8x32xf32>
    %223 = vector.extract_strided_slice %210 {offsets = [0, 32], sizes = [8, 32], strides = [1, 1]} : vector<8x64xf32> to vector<8x32xf32>
    %224 = arith.mulf %223, %175 : vector<8x32xf32>
    %225 = arith.addf %222, %224 : vector<8x32xf32>
    %cst_66 = arith.constant dense<0.000000e+00> : vector<8x96xf32>
    %226 = tpu.matmul %202, %20, %cst_66 {dimension_numbers = #tpu.dot_dimension_numbers<[1], [0], [0], [1], [0, 0, 1, 1], [], []>} : vector<8x32xf32>, vector<32x96xf32>, vector<8x96xf32> -> vector<8x96xf32>
    %cst_67 = arith.constant dense<0.000000e+00> : vector<8x96xf32>
    %227 = tpu.matmul %225, %21, %cst_67 {dimension_numbers = #tpu.dot_dimension_numbers<[1], [0], [0], [1], [0, 0, 1, 1], [], []>} : vector<8x32xf32>, vector<32x96xf32>, vector<8x96xf32> -> vector<8x96xf32>
    %c32_68 = arith.constant 32 : index
    %c0_69 = arith.constant 0 : index
    %228 = vector.load %arg20[%c32_68, %c0_69] : memref<64x96xf32, #tpu.memory_space<vmem>>, vector<8x96xf32>
    %c24_70 = arith.constant 24 : index
    %c0_71 = arith.constant 0 : index
    %229 = vector.load %arg21[%c24_70, %c0_71] : memref<64x96xf32, #tpu.memory_space<vmem>>, vector<8x96xf32>
    %230 = vector.extract_strided_slice %228 {offsets = [0, 0], sizes = [8, 64], strides = [1, 1]} : vector<8x96xf32> to vector<8x64xf32>
    %231 = vector.extract_strided_slice %226 {offsets = [0, 0], sizes = [8, 64], strides = [1, 1]} : vector<8x96xf32> to vector<8x64xf32>
    %232 = arith.addf %230, %231 : vector<8x64xf32>
    %233 = arith.negf %232 : vector<8x64xf32>
    %234 = math.exp %233 : vector<8x64xf32>
    %cst_72 = arith.constant 1.000000e+00 : f32
    %235 = vector.broadcast %cst_72 : f32 to vector<8x64xf32>
    %236 = arith.addf %235, %234 : vector<8x64xf32>
    %237 = arith.divf %235, %236 : vector<8x64xf32>
    %238 = vector.extract_strided_slice %228 {offsets = [0, 64], sizes = [8, 32], strides = [1, 1]} : vector<8x96xf32> to vector<8x32xf32>
    %239 = vector.extract_strided_slice %237 {offsets = [0, 0], sizes = [8, 32], strides = [1, 1]} : vector<8x64xf32> to vector<8x32xf32>
    %240 = vector.extract_strided_slice %226 {offsets = [0, 64], sizes = [8, 32], strides = [1, 1]} : vector<8x96xf32> to vector<8x32xf32>
    %241 = vector.broadcast %22 : vector<1x32xf32> to vector<8x32xf32>
    %242 = arith.addf %240, %241 : vector<8x32xf32>
    %243 = arith.mulf %239, %242 : vector<8x32xf32>
    %244 = arith.addf %238, %243 : vector<8x32xf32>
    %245 = math.tanh %244 : vector<8x32xf32>
    %246 = vector.extract_strided_slice %237 {offsets = [0, 32], sizes = [8, 32], strides = [1, 1]} : vector<8x64xf32> to vector<8x32xf32>
    %cst_73 = arith.constant 1.000000e+00 : f32
    %247 = vector.broadcast %cst_73 : f32 to vector<8x32xf32>
    %248 = arith.subf %247, %246 : vector<8x32xf32>
    %249 = arith.mulf %248, %245 : vector<8x32xf32>
    %250 = vector.extract_strided_slice %237 {offsets = [0, 32], sizes = [8, 32], strides = [1, 1]} : vector<8x64xf32> to vector<8x32xf32>
    %251 = arith.mulf %250, %202 : vector<8x32xf32>
    %252 = arith.addf %249, %251 : vector<8x32xf32>
    %253 = vector.extract_strided_slice %229 {offsets = [0, 0], sizes = [8, 64], strides = [1, 1]} : vector<8x96xf32> to vector<8x64xf32>
    %254 = vector.extract_strided_slice %227 {offsets = [0, 0], sizes = [8, 64], strides = [1, 1]} : vector<8x96xf32> to vector<8x64xf32>
    %255 = arith.addf %253, %254 : vector<8x64xf32>
    %256 = arith.negf %255 : vector<8x64xf32>
    %257 = math.exp %256 : vector<8x64xf32>
    %cst_74 = arith.constant 1.000000e+00 : f32
    %258 = vector.broadcast %cst_74 : f32 to vector<8x64xf32>
    %259 = arith.addf %258, %257 : vector<8x64xf32>
    %260 = arith.divf %258, %259 : vector<8x64xf32>
    %261 = vector.extract_strided_slice %229 {offsets = [0, 64], sizes = [8, 32], strides = [1, 1]} : vector<8x96xf32> to vector<8x32xf32>
    %262 = vector.extract_strided_slice %260 {offsets = [0, 0], sizes = [8, 32], strides = [1, 1]} : vector<8x64xf32> to vector<8x32xf32>
    %263 = vector.extract_strided_slice %227 {offsets = [0, 64], sizes = [8, 32], strides = [1, 1]} : vector<8x96xf32> to vector<8x32xf32>
    %264 = vector.broadcast %23 : vector<1x32xf32> to vector<8x32xf32>
    %265 = arith.addf %263, %264 : vector<8x32xf32>
    %266 = arith.mulf %262, %265 : vector<8x32xf32>
    %267 = arith.addf %261, %266 : vector<8x32xf32>
    %268 = math.tanh %267 : vector<8x32xf32>
    %269 = vector.extract_strided_slice %260 {offsets = [0, 32], sizes = [8, 32], strides = [1, 1]} : vector<8x64xf32> to vector<8x32xf32>
    %cst_75 = arith.constant 1.000000e+00 : f32
    %270 = vector.broadcast %cst_75 : f32 to vector<8x32xf32>
    %271 = arith.subf %270, %269 : vector<8x32xf32>
    %272 = arith.mulf %271, %268 : vector<8x32xf32>
    %273 = vector.extract_strided_slice %260 {offsets = [0, 32], sizes = [8, 32], strides = [1, 1]} : vector<8x64xf32> to vector<8x32xf32>
    %274 = arith.mulf %273, %225 : vector<8x32xf32>
    %275 = arith.addf %272, %274 : vector<8x32xf32>
    %cst_76 = arith.constant dense<0.000000e+00> : vector<8x96xf32>
    %276 = tpu.matmul %252, %20, %cst_76 {dimension_numbers = #tpu.dot_dimension_numbers<[1], [0], [0], [1], [0, 0, 1, 1], [], []>} : vector<8x32xf32>, vector<32x96xf32>, vector<8x96xf32> -> vector<8x96xf32>
    %cst_77 = arith.constant dense<0.000000e+00> : vector<8x96xf32>
    %277 = tpu.matmul %275, %21, %cst_77 {dimension_numbers = #tpu.dot_dimension_numbers<[1], [0], [0], [1], [0, 0, 1, 1], [], []>} : vector<8x32xf32>, vector<32x96xf32>, vector<8x96xf32> -> vector<8x96xf32>
    %c40_78 = arith.constant 40 : index
    %c0_79 = arith.constant 0 : index
    %278 = vector.load %arg20[%c40_78, %c0_79] : memref<64x96xf32, #tpu.memory_space<vmem>>, vector<8x96xf32>
    %c16_80 = arith.constant 16 : index
    %c0_81 = arith.constant 0 : index
    %279 = vector.load %arg21[%c16_80, %c0_81] : memref<64x96xf32, #tpu.memory_space<vmem>>, vector<8x96xf32>
    %280 = vector.extract_strided_slice %278 {offsets = [0, 0], sizes = [8, 64], strides = [1, 1]} : vector<8x96xf32> to vector<8x64xf32>
    %281 = vector.extract_strided_slice %276 {offsets = [0, 0], sizes = [8, 64], strides = [1, 1]} : vector<8x96xf32> to vector<8x64xf32>
    %282 = arith.addf %280, %281 : vector<8x64xf32>
    %283 = arith.negf %282 : vector<8x64xf32>
    %284 = math.exp %283 : vector<8x64xf32>
    %cst_82 = arith.constant 1.000000e+00 : f32
    %285 = vector.broadcast %cst_82 : f32 to vector<8x64xf32>
    %286 = arith.addf %285, %284 : vector<8x64xf32>
    %287 = arith.divf %285, %286 : vector<8x64xf32>
    %288 = vector.extract_strided_slice %278 {offsets = [0, 64], sizes = [8, 32], strides = [1, 1]} : vector<8x96xf32> to vector<8x32xf32>
    %289 = vector.extract_strided_slice %287 {offsets = [0, 0], sizes = [8, 32], strides = [1, 1]} : vector<8x64xf32> to vector<8x32xf32>
    %290 = vector.extract_strided_slice %276 {offsets = [0, 64], sizes = [8, 32], strides = [1, 1]} : vector<8x96xf32> to vector<8x32xf32>
    %291 = vector.broadcast %22 : vector<1x32xf32> to vector<8x32xf32>
    %292 = arith.addf %290, %291 : vector<8x32xf32>
    %293 = arith.mulf %289, %292 : vector<8x32xf32>
    %294 = arith.addf %288, %293 : vector<8x32xf32>
    %295 = math.tanh %294 : vector<8x32xf32>
    %296 = vector.extract_strided_slice %287 {offsets = [0, 32], sizes = [8, 32], strides = [1, 1]} : vector<8x64xf32> to vector<8x32xf32>
    %cst_83 = arith.constant 1.000000e+00 : f32
    %297 = vector.broadcast %cst_83 : f32 to vector<8x32xf32>
    %298 = arith.subf %297, %296 : vector<8x32xf32>
    %299 = arith.mulf %298, %295 : vector<8x32xf32>
    %300 = vector.extract_strided_slice %287 {offsets = [0, 32], sizes = [8, 32], strides = [1, 1]} : vector<8x64xf32> to vector<8x32xf32>
    %301 = arith.mulf %300, %252 : vector<8x32xf32>
    %302 = arith.addf %299, %301 : vector<8x32xf32>
    %303 = vector.extract_strided_slice %279 {offsets = [0, 0], sizes = [8, 64], strides = [1, 1]} : vector<8x96xf32> to vector<8x64xf32>
    %304 = vector.extract_strided_slice %277 {offsets = [0, 0], sizes = [8, 64], strides = [1, 1]} : vector<8x96xf32> to vector<8x64xf32>
    %305 = arith.addf %303, %304 : vector<8x64xf32>
    %306 = arith.negf %305 : vector<8x64xf32>
    %307 = math.exp %306 : vector<8x64xf32>
    %cst_84 = arith.constant 1.000000e+00 : f32
    %308 = vector.broadcast %cst_84 : f32 to vector<8x64xf32>
    %309 = arith.addf %308, %307 : vector<8x64xf32>
    %310 = arith.divf %308, %309 : vector<8x64xf32>
    %311 = vector.extract_strided_slice %279 {offsets = [0, 64], sizes = [8, 32], strides = [1, 1]} : vector<8x96xf32> to vector<8x32xf32>
    %312 = vector.extract_strided_slice %310 {offsets = [0, 0], sizes = [8, 32], strides = [1, 1]} : vector<8x64xf32> to vector<8x32xf32>
    %313 = vector.extract_strided_slice %277 {offsets = [0, 64], sizes = [8, 32], strides = [1, 1]} : vector<8x96xf32> to vector<8x32xf32>
    %314 = vector.broadcast %23 : vector<1x32xf32> to vector<8x32xf32>
    %315 = arith.addf %313, %314 : vector<8x32xf32>
    %316 = arith.mulf %312, %315 : vector<8x32xf32>
    %317 = arith.addf %311, %316 : vector<8x32xf32>
    %318 = math.tanh %317 : vector<8x32xf32>
    %319 = vector.extract_strided_slice %310 {offsets = [0, 32], sizes = [8, 32], strides = [1, 1]} : vector<8x64xf32> to vector<8x32xf32>
    %cst_85 = arith.constant 1.000000e+00 : f32
    %320 = vector.broadcast %cst_85 : f32 to vector<8x32xf32>
    %321 = arith.subf %320, %319 : vector<8x32xf32>
    %322 = arith.mulf %321, %318 : vector<8x32xf32>
    %323 = vector.extract_strided_slice %310 {offsets = [0, 32], sizes = [8, 32], strides = [1, 1]} : vector<8x64xf32> to vector<8x32xf32>
    %324 = arith.mulf %323, %275 : vector<8x32xf32>
    %325 = arith.addf %322, %324 : vector<8x32xf32>
    %cst_86 = arith.constant dense<0.000000e+00> : vector<8x96xf32>
    %326 = tpu.matmul %302, %20, %cst_86 {dimension_numbers = #tpu.dot_dimension_numbers<[1], [0], [0], [1], [0, 0, 1, 1], [], []>} : vector<8x32xf32>, vector<32x96xf32>, vector<8x96xf32> -> vector<8x96xf32>
    %cst_87 = arith.constant dense<0.000000e+00> : vector<8x96xf32>
    %327 = tpu.matmul %325, %21, %cst_87 {dimension_numbers = #tpu.dot_dimension_numbers<[1], [0], [0], [1], [0, 0, 1, 1], [], []>} : vector<8x32xf32>, vector<32x96xf32>, vector<8x96xf32> -> vector<8x96xf32>
    %c48_88 = arith.constant 48 : index
    %c0_89 = arith.constant 0 : index
    %328 = vector.load %arg20[%c48_88, %c0_89] : memref<64x96xf32, #tpu.memory_space<vmem>>, vector<8x96xf32>
    %c8_90 = arith.constant 8 : index
    %c0_91 = arith.constant 0 : index
    %329 = vector.load %arg21[%c8_90, %c0_91] : memref<64x96xf32, #tpu.memory_space<vmem>>, vector<8x96xf32>
    %330 = vector.extract_strided_slice %328 {offsets = [0, 0], sizes = [8, 64], strides = [1, 1]} : vector<8x96xf32> to vector<8x64xf32>
    %331 = vector.extract_strided_slice %326 {offsets = [0, 0], sizes = [8, 64], strides = [1, 1]} : vector<8x96xf32> to vector<8x64xf32>
    %332 = arith.addf %330, %331 : vector<8x64xf32>
    %333 = arith.negf %332 : vector<8x64xf32>
    %334 = math.exp %333 : vector<8x64xf32>
    %cst_92 = arith.constant 1.000000e+00 : f32
    %335 = vector.broadcast %cst_92 : f32 to vector<8x64xf32>
    %336 = arith.addf %335, %334 : vector<8x64xf32>
    %337 = arith.divf %335, %336 : vector<8x64xf32>
    %338 = vector.extract_strided_slice %328 {offsets = [0, 64], sizes = [8, 32], strides = [1, 1]} : vector<8x96xf32> to vector<8x32xf32>
    %339 = vector.extract_strided_slice %337 {offsets = [0, 0], sizes = [8, 32], strides = [1, 1]} : vector<8x64xf32> to vector<8x32xf32>
    %340 = vector.extract_strided_slice %326 {offsets = [0, 64], sizes = [8, 32], strides = [1, 1]} : vector<8x96xf32> to vector<8x32xf32>
    %341 = vector.broadcast %22 : vector<1x32xf32> to vector<8x32xf32>
    %342 = arith.addf %340, %341 : vector<8x32xf32>
    %343 = arith.mulf %339, %342 : vector<8x32xf32>
    %344 = arith.addf %338, %343 : vector<8x32xf32>
    %345 = math.tanh %344 : vector<8x32xf32>
    %346 = vector.extract_strided_slice %337 {offsets = [0, 32], sizes = [8, 32], strides = [1, 1]} : vector<8x64xf32> to vector<8x32xf32>
    %cst_93 = arith.constant 1.000000e+00 : f32
    %347 = vector.broadcast %cst_93 : f32 to vector<8x32xf32>
    %348 = arith.subf %347, %346 : vector<8x32xf32>
    %349 = arith.mulf %348, %345 : vector<8x32xf32>
    %350 = vector.extract_strided_slice %337 {offsets = [0, 32], sizes = [8, 32], strides = [1, 1]} : vector<8x64xf32> to vector<8x32xf32>
    %351 = arith.mulf %350, %302 : vector<8x32xf32>
    %352 = arith.addf %349, %351 : vector<8x32xf32>
    %353 = vector.extract_strided_slice %329 {offsets = [0, 0], sizes = [8, 64], strides = [1, 1]} : vector<8x96xf32> to vector<8x64xf32>
    %354 = vector.extract_strided_slice %327 {offsets = [0, 0], sizes = [8, 64], strides = [1, 1]} : vector<8x96xf32> to vector<8x64xf32>
    %355 = arith.addf %353, %354 : vector<8x64xf32>
    %356 = arith.negf %355 : vector<8x64xf32>
    %357 = math.exp %356 : vector<8x64xf32>
    %cst_94 = arith.constant 1.000000e+00 : f32
    %358 = vector.broadcast %cst_94 : f32 to vector<8x64xf32>
    %359 = arith.addf %358, %357 : vector<8x64xf32>
    %360 = arith.divf %358, %359 : vector<8x64xf32>
    %361 = vector.extract_strided_slice %329 {offsets = [0, 64], sizes = [8, 32], strides = [1, 1]} : vector<8x96xf32> to vector<8x32xf32>
    %362 = vector.extract_strided_slice %360 {offsets = [0, 0], sizes = [8, 32], strides = [1, 1]} : vector<8x64xf32> to vector<8x32xf32>
    %363 = vector.extract_strided_slice %327 {offsets = [0, 64], sizes = [8, 32], strides = [1, 1]} : vector<8x96xf32> to vector<8x32xf32>
    %364 = vector.broadcast %23 : vector<1x32xf32> to vector<8x32xf32>
    %365 = arith.addf %363, %364 : vector<8x32xf32>
    %366 = arith.mulf %362, %365 : vector<8x32xf32>
    %367 = arith.addf %361, %366 : vector<8x32xf32>
    %368 = math.tanh %367 : vector<8x32xf32>
    %369 = vector.extract_strided_slice %360 {offsets = [0, 32], sizes = [8, 32], strides = [1, 1]} : vector<8x64xf32> to vector<8x32xf32>
    %cst_95 = arith.constant 1.000000e+00 : f32
    %370 = vector.broadcast %cst_95 : f32 to vector<8x32xf32>
    %371 = arith.subf %370, %369 : vector<8x32xf32>
    %372 = arith.mulf %371, %368 : vector<8x32xf32>
    %373 = vector.extract_strided_slice %360 {offsets = [0, 32], sizes = [8, 32], strides = [1, 1]} : vector<8x64xf32> to vector<8x32xf32>
    %374 = arith.mulf %373, %325 : vector<8x32xf32>
    %375 = arith.addf %372, %374 : vector<8x32xf32>
    %cst_96 = arith.constant dense<0.000000e+00> : vector<8x96xf32>
    %376 = tpu.matmul %352, %20, %cst_96 {dimension_numbers = #tpu.dot_dimension_numbers<[1], [0], [0], [1], [0, 0, 1, 1], [], []>} : vector<8x32xf32>, vector<32x96xf32>, vector<8x96xf32> -> vector<8x96xf32>
    %cst_97 = arith.constant dense<0.000000e+00> : vector<8x96xf32>
    %377 = tpu.matmul %375, %21, %cst_97 {dimension_numbers = #tpu.dot_dimension_numbers<[1], [0], [0], [1], [0, 0, 1, 1], [], []>} : vector<8x32xf32>, vector<32x96xf32>, vector<8x96xf32> -> vector<8x96xf32>
    %c56_98 = arith.constant 56 : index
    %c0_99 = arith.constant 0 : index
    %378 = vector.load %arg20[%c56_98, %c0_99] : memref<64x96xf32, #tpu.memory_space<vmem>>, vector<8x96xf32>
    %c0_100 = arith.constant 0 : index
    %c0_101 = arith.constant 0 : index
    %379 = vector.load %arg21[%c0_100, %c0_101] : memref<64x96xf32, #tpu.memory_space<vmem>>, vector<8x96xf32>
    %380 = vector.extract_strided_slice %378 {offsets = [0, 0], sizes = [8, 64], strides = [1, 1]} : vector<8x96xf32> to vector<8x64xf32>
    %381 = vector.extract_strided_slice %376 {offsets = [0, 0], sizes = [8, 64], strides = [1, 1]} : vector<8x96xf32> to vector<8x64xf32>
    %382 = arith.addf %380, %381 : vector<8x64xf32>
    %383 = arith.negf %382 : vector<8x64xf32>
    %384 = math.exp %383 : vector<8x64xf32>
    %cst_102 = arith.constant 1.000000e+00 : f32
    %385 = vector.broadcast %cst_102 : f32 to vector<8x64xf32>
    %386 = arith.addf %385, %384 : vector<8x64xf32>
    %387 = arith.divf %385, %386 : vector<8x64xf32>
    %388 = vector.extract_strided_slice %378 {offsets = [0, 64], sizes = [8, 32], strides = [1, 1]} : vector<8x96xf32> to vector<8x32xf32>
    %389 = vector.extract_strided_slice %387 {offsets = [0, 0], sizes = [8, 32], strides = [1, 1]} : vector<8x64xf32> to vector<8x32xf32>
    %390 = vector.extract_strided_slice %376 {offsets = [0, 64], sizes = [8, 32], strides = [1, 1]} : vector<8x96xf32> to vector<8x32xf32>
    %391 = vector.broadcast %22 : vector<1x32xf32> to vector<8x32xf32>
    %392 = arith.addf %390, %391 : vector<8x32xf32>
    %393 = arith.mulf %389, %392 : vector<8x32xf32>
    %394 = arith.addf %388, %393 : vector<8x32xf32>
    %395 = math.tanh %394 : vector<8x32xf32>
    %396 = vector.extract_strided_slice %387 {offsets = [0, 32], sizes = [8, 32], strides = [1, 1]} : vector<8x64xf32> to vector<8x32xf32>
    %cst_103 = arith.constant 1.000000e+00 : f32
    %397 = vector.broadcast %cst_103 : f32 to vector<8x32xf32>
    %398 = arith.subf %397, %396 : vector<8x32xf32>
    %399 = arith.mulf %398, %395 : vector<8x32xf32>
    %400 = vector.extract_strided_slice %387 {offsets = [0, 32], sizes = [8, 32], strides = [1, 1]} : vector<8x64xf32> to vector<8x32xf32>
    %401 = arith.mulf %400, %352 : vector<8x32xf32>
    %402 = arith.addf %399, %401 : vector<8x32xf32>
    %403 = vector.extract_strided_slice %379 {offsets = [0, 0], sizes = [8, 64], strides = [1, 1]} : vector<8x96xf32> to vector<8x64xf32>
    %404 = vector.extract_strided_slice %377 {offsets = [0, 0], sizes = [8, 64], strides = [1, 1]} : vector<8x96xf32> to vector<8x64xf32>
    %405 = arith.addf %403, %404 : vector<8x64xf32>
    %406 = arith.negf %405 : vector<8x64xf32>
    %407 = math.exp %406 : vector<8x64xf32>
    %cst_104 = arith.constant 1.000000e+00 : f32
    %408 = vector.broadcast %cst_104 : f32 to vector<8x64xf32>
    %409 = arith.addf %408, %407 : vector<8x64xf32>
    %410 = arith.divf %408, %409 : vector<8x64xf32>
    %411 = vector.extract_strided_slice %379 {offsets = [0, 64], sizes = [8, 32], strides = [1, 1]} : vector<8x96xf32> to vector<8x32xf32>
    %412 = vector.extract_strided_slice %410 {offsets = [0, 0], sizes = [8, 32], strides = [1, 1]} : vector<8x64xf32> to vector<8x32xf32>
    %413 = vector.extract_strided_slice %377 {offsets = [0, 64], sizes = [8, 32], strides = [1, 1]} : vector<8x96xf32> to vector<8x32xf32>
    %414 = vector.broadcast %23 : vector<1x32xf32> to vector<8x32xf32>
    %415 = arith.addf %413, %414 : vector<8x32xf32>
    %416 = arith.mulf %412, %415 : vector<8x32xf32>
    %417 = arith.addf %411, %416 : vector<8x32xf32>
    %418 = math.tanh %417 : vector<8x32xf32>
    %419 = vector.extract_strided_slice %410 {offsets = [0, 32], sizes = [8, 32], strides = [1, 1]} : vector<8x64xf32> to vector<8x32xf32>
    %cst_105 = arith.constant 1.000000e+00 : f32
    %420 = vector.broadcast %cst_105 : f32 to vector<8x32xf32>
    %421 = arith.subf %420, %419 : vector<8x32xf32>
    %422 = arith.mulf %421, %418 : vector<8x32xf32>
    %423 = vector.extract_strided_slice %410 {offsets = [0, 32], sizes = [8, 32], strides = [1, 1]} : vector<8x64xf32> to vector<8x32xf32>
    %424 = arith.mulf %423, %375 : vector<8x32xf32>
    %425 = arith.addf %422, %424 : vector<8x32xf32>
    %426 = tpu.concatenate %402, %425 in 1 : vector<8x32xf32>, vector<8x32xf32> -> vector<8x64xf32>
    %c0_106 = arith.constant 0 : index
    %c0_107 = arith.constant 0 : index
    %427 = vector.load %arg11[%c0_106, %c0_107] : memref<64x32xf32, #tpu.memory_space<vmem>>, vector<64x32xf32>
    %cst_108 = arith.constant dense<0.000000e+00> : vector<8x32xf32>
    %428 = tpu.matmul %426, %427, %cst_108 {dimension_numbers = #tpu.dot_dimension_numbers<[1], [0], [0], [1], [0, 0, 1, 1], [], []>} : vector<8x64xf32>, vector<64x32xf32>, vector<8x32xf32> -> vector<8x32xf32>
    %c0_109 = arith.constant 0 : index
    %c0_110 = arith.constant 0 : index
    %429 = vector.load %arg12[%c0_109, %c0_110] : memref<1x32xf32, #tpu.memory_space<vmem>>, vector<1x32xf32>
    %430 = vector.broadcast %429 : vector<1x32xf32> to vector<8x32xf32>
    %431 = arith.addf %428, %430 : vector<8x32xf32>
    %432 = math.tanh %431 : vector<8x32xf32>
    %c0_111 = arith.constant 0 : index
    %c0_112 = arith.constant 0 : index
    %433 = vector.load %arg14[%c0_111, %c0_112] : memref<32x96xf32, #tpu.memory_space<vmem>>, vector<32x96xf32>
    %c0_113 = arith.constant 0 : index
    %c0_114 = arith.constant 0 : index
    %434 = vector.load %arg16[%c0_113, %c0_114] : memref<1x32xf32, #tpu.memory_space<vmem>>, vector<1x32xf32>
    %cst_115 = arith.constant dense<0.000000e+00> : vector<8x96xf32>
    %435 = tpu.matmul %432, %433, %cst_115 {dimension_numbers = #tpu.dot_dimension_numbers<[1], [0], [0], [1], [0, 0, 1, 1], [], []>} : vector<8x32xf32>, vector<32x96xf32>, vector<8x96xf32> -> vector<8x96xf32>
    %c0_116 = arith.constant 0 : index
    %c0_117 = arith.constant 0 : index
    %436 = vector.load %arg22[%c0_116, %c0_117] : memref<64x96xf32, #tpu.memory_space<vmem>>, vector<8x96xf32>
    %437 = vector.extract_strided_slice %436 {offsets = [0, 0], sizes = [8, 64], strides = [1, 1]} : vector<8x96xf32> to vector<8x64xf32>
    %438 = vector.extract_strided_slice %435 {offsets = [0, 0], sizes = [8, 64], strides = [1, 1]} : vector<8x96xf32> to vector<8x64xf32>
    %439 = arith.addf %437, %438 : vector<8x64xf32>
    %440 = arith.negf %439 : vector<8x64xf32>
    %441 = math.exp %440 : vector<8x64xf32>
    %cst_118 = arith.constant 1.000000e+00 : f32
    %442 = vector.broadcast %cst_118 : f32 to vector<8x64xf32>
    %443 = arith.addf %442, %441 : vector<8x64xf32>
    %444 = arith.divf %442, %443 : vector<8x64xf32>
    %445 = vector.extract_strided_slice %436 {offsets = [0, 64], sizes = [8, 32], strides = [1, 1]} : vector<8x96xf32> to vector<8x32xf32>
    %446 = vector.extract_strided_slice %444 {offsets = [0, 0], sizes = [8, 32], strides = [1, 1]} : vector<8x64xf32> to vector<8x32xf32>
    %447 = vector.extract_strided_slice %435 {offsets = [0, 64], sizes = [8, 32], strides = [1, 1]} : vector<8x96xf32> to vector<8x32xf32>
    %448 = vector.broadcast %434 : vector<1x32xf32> to vector<8x32xf32>
    %449 = arith.addf %447, %448 : vector<8x32xf32>
    %450 = arith.mulf %446, %449 : vector<8x32xf32>
    %451 = arith.addf %445, %450 : vector<8x32xf32>
    %452 = math.tanh %451 : vector<8x32xf32>
    %453 = vector.extract_strided_slice %444 {offsets = [0, 32], sizes = [8, 32], strides = [1, 1]} : vector<8x64xf32> to vector<8x32xf32>
    %cst_119 = arith.constant 1.000000e+00 : f32
    %454 = vector.broadcast %cst_119 : f32 to vector<8x32xf32>
    %455 = arith.subf %454, %453 : vector<8x32xf32>
    %456 = arith.mulf %455, %452 : vector<8x32xf32>
    %457 = vector.extract_strided_slice %444 {offsets = [0, 32], sizes = [8, 32], strides = [1, 1]} : vector<8x64xf32> to vector<8x32xf32>
    %458 = arith.mulf %457, %432 : vector<8x32xf32>
    %459 = arith.addf %456, %458 : vector<8x32xf32>
    %c0_120 = arith.constant 0 : index
    %c0_121 = arith.constant 0 : index
    %460 = vector.load %arg23[%c0_120, %c0_121] : memref<64x32xf32, #tpu.memory_space<vmem>>, vector<8x32xf32>
    tpu.vector_store %arg23[%c0_120, %c0_121], %459 {strides = array<i32>} : memref<64x32xf32, #tpu.memory_space<vmem>>, vector<8x32xf32>,
    %cst_122 = arith.constant dense<0.000000e+00> : vector<8x96xf32>
    %461 = tpu.matmul %459, %433, %cst_122 {dimension_numbers = #tpu.dot_dimension_numbers<[1], [0], [0], [1], [0, 0, 1, 1], [], []>} : vector<8x32xf32>, vector<32x96xf32>, vector<8x96xf32> -> vector<8x96xf32>
    %c8_123 = arith.constant 8 : index
    %c0_124 = arith.constant 0 : index
    %462 = vector.load %arg22[%c8_123, %c0_124] : memref<64x96xf32, #tpu.memory_space<vmem>>, vector<8x96xf32>
    %463 = vector.extract_strided_slice %462 {offsets = [0, 0], sizes = [8, 64], strides = [1, 1]} : vector<8x96xf32> to vector<8x64xf32>
    %464 = vector.extract_strided_slice %461 {offsets = [0, 0], sizes = [8, 64], strides = [1, 1]} : vector<8x96xf32> to vector<8x64xf32>
    %465 = arith.addf %463, %464 : vector<8x64xf32>
    %466 = arith.negf %465 : vector<8x64xf32>
    %467 = math.exp %466 : vector<8x64xf32>
    %cst_125 = arith.constant 1.000000e+00 : f32
    %468 = vector.broadcast %cst_125 : f32 to vector<8x64xf32>
    %469 = arith.addf %468, %467 : vector<8x64xf32>
    %470 = arith.divf %468, %469 : vector<8x64xf32>
    %471 = vector.extract_strided_slice %462 {offsets = [0, 64], sizes = [8, 32], strides = [1, 1]} : vector<8x96xf32> to vector<8x32xf32>
    %472 = vector.extract_strided_slice %470 {offsets = [0, 0], sizes = [8, 32], strides = [1, 1]} : vector<8x64xf32> to vector<8x32xf32>
    %473 = vector.extract_strided_slice %461 {offsets = [0, 64], sizes = [8, 32], strides = [1, 1]} : vector<8x96xf32> to vector<8x32xf32>
    %474 = vector.broadcast %434 : vector<1x32xf32> to vector<8x32xf32>
    %475 = arith.addf %473, %474 : vector<8x32xf32>
    %476 = arith.mulf %472, %475 : vector<8x32xf32>
    %477 = arith.addf %471, %476 : vector<8x32xf32>
    %478 = math.tanh %477 : vector<8x32xf32>
    %479 = vector.extract_strided_slice %470 {offsets = [0, 32], sizes = [8, 32], strides = [1, 1]} : vector<8x64xf32> to vector<8x32xf32>
    %cst_126 = arith.constant 1.000000e+00 : f32
    %480 = vector.broadcast %cst_126 : f32 to vector<8x32xf32>
    %481 = arith.subf %480, %479 : vector<8x32xf32>
    %482 = arith.mulf %481, %478 : vector<8x32xf32>
    %483 = vector.extract_strided_slice %470 {offsets = [0, 32], sizes = [8, 32], strides = [1, 1]} : vector<8x64xf32> to vector<8x32xf32>
    %484 = arith.mulf %483, %459 : vector<8x32xf32>
    %485 = arith.addf %482, %484 : vector<8x32xf32>
    %c8_127 = arith.constant 8 : index
    %c0_128 = arith.constant 0 : index
    %486 = vector.load %arg23[%c8_127, %c0_128] : memref<64x32xf32, #tpu.memory_space<vmem>>, vector<8x32xf32>
    tpu.vector_store %arg23[%c8_127, %c0_128], %485 {strides = array<i32>} : memref<64x32xf32, #tpu.memory_space<vmem>>, vector<8x32xf32>,
    %cst_129 = arith.constant dense<0.000000e+00> : vector<8x96xf32>
    %487 = tpu.matmul %485, %433, %cst_129 {dimension_numbers = #tpu.dot_dimension_numbers<[1], [0], [0], [1], [0, 0, 1, 1], [], []>} : vector<8x32xf32>, vector<32x96xf32>, vector<8x96xf32> -> vector<8x96xf32>
    %c16_130 = arith.constant 16 : index
    %c0_131 = arith.constant 0 : index
    %488 = vector.load %arg22[%c16_130, %c0_131] : memref<64x96xf32, #tpu.memory_space<vmem>>, vector<8x96xf32>
    %489 = vector.extract_strided_slice %488 {offsets = [0, 0], sizes = [8, 64], strides = [1, 1]} : vector<8x96xf32> to vector<8x64xf32>
    %490 = vector.extract_strided_slice %487 {offsets = [0, 0], sizes = [8, 64], strides = [1, 1]} : vector<8x96xf32> to vector<8x64xf32>
    %491 = arith.addf %489, %490 : vector<8x64xf32>
    %492 = arith.negf %491 : vector<8x64xf32>
    %493 = math.exp %492 : vector<8x64xf32>
    %cst_132 = arith.constant 1.000000e+00 : f32
    %494 = vector.broadcast %cst_132 : f32 to vector<8x64xf32>
    %495 = arith.addf %494, %493 : vector<8x64xf32>
    %496 = arith.divf %494, %495 : vector<8x64xf32>
    %497 = vector.extract_strided_slice %488 {offsets = [0, 64], sizes = [8, 32], strides = [1, 1]} : vector<8x96xf32> to vector<8x32xf32>
    %498 = vector.extract_strided_slice %496 {offsets = [0, 0], sizes = [8, 32], strides = [1, 1]} : vector<8x64xf32> to vector<8x32xf32>
    %499 = vector.extract_strided_slice %487 {offsets = [0, 64], sizes = [8, 32], strides = [1, 1]} : vector<8x96xf32> to vector<8x32xf32>
    %500 = vector.broadcast %434 : vector<1x32xf32> to vector<8x32xf32>
    %501 = arith.addf %499, %500 : vector<8x32xf32>
    %502 = arith.mulf %498, %501 : vector<8x32xf32>
    %503 = arith.addf %497, %502 : vector<8x32xf32>
    %504 = math.tanh %503 : vector<8x32xf32>
    %505 = vector.extract_strided_slice %496 {offsets = [0, 32], sizes = [8, 32], strides = [1, 1]} : vector<8x64xf32> to vector<8x32xf32>
    %cst_133 = arith.constant 1.000000e+00 : f32
    %506 = vector.broadcast %cst_133 : f32 to vector<8x32xf32>
    %507 = arith.subf %506, %505 : vector<8x32xf32>
    %508 = arith.mulf %507, %504 : vector<8x32xf32>
    %509 = vector.extract_strided_slice %496 {offsets = [0, 32], sizes = [8, 32], strides = [1, 1]} : vector<8x64xf32> to vector<8x32xf32>
    %510 = arith.mulf %509, %485 : vector<8x32xf32>
    %511 = arith.addf %508, %510 : vector<8x32xf32>
    %c16_134 = arith.constant 16 : index
    %c0_135 = arith.constant 0 : index
    %512 = vector.load %arg23[%c16_134, %c0_135] : memref<64x32xf32, #tpu.memory_space<vmem>>, vector<8x32xf32>
    tpu.vector_store %arg23[%c16_134, %c0_135], %511 {strides = array<i32>} : memref<64x32xf32, #tpu.memory_space<vmem>>, vector<8x32xf32>,
    %cst_136 = arith.constant dense<0.000000e+00> : vector<8x96xf32>
    %513 = tpu.matmul %511, %433, %cst_136 {dimension_numbers = #tpu.dot_dimension_numbers<[1], [0], [0], [1], [0, 0, 1, 1], [], []>} : vector<8x32xf32>, vector<32x96xf32>, vector<8x96xf32> -> vector<8x96xf32>
    %c24_137 = arith.constant 24 : index
    %c0_138 = arith.constant 0 : index
    %514 = vector.load %arg22[%c24_137, %c0_138] : memref<64x96xf32, #tpu.memory_space<vmem>>, vector<8x96xf32>
    %515 = vector.extract_strided_slice %514 {offsets = [0, 0], sizes = [8, 64], strides = [1, 1]} : vector<8x96xf32> to vector<8x64xf32>
    %516 = vector.extract_strided_slice %513 {offsets = [0, 0], sizes = [8, 64], strides = [1, 1]} : vector<8x96xf32> to vector<8x64xf32>
    %517 = arith.addf %515, %516 : vector<8x64xf32>
    %518 = arith.negf %517 : vector<8x64xf32>
    %519 = math.exp %518 : vector<8x64xf32>
    %cst_139 = arith.constant 1.000000e+00 : f32
    %520 = vector.broadcast %cst_139 : f32 to vector<8x64xf32>
    %521 = arith.addf %520, %519 : vector<8x64xf32>
    %522 = arith.divf %520, %521 : vector<8x64xf32>
    %523 = vector.extract_strided_slice %514 {offsets = [0, 64], sizes = [8, 32], strides = [1, 1]} : vector<8x96xf32> to vector<8x32xf32>
    %524 = vector.extract_strided_slice %522 {offsets = [0, 0], sizes = [8, 32], strides = [1, 1]} : vector<8x64xf32> to vector<8x32xf32>
    %525 = vector.extract_strided_slice %513 {offsets = [0, 64], sizes = [8, 32], strides = [1, 1]} : vector<8x96xf32> to vector<8x32xf32>
    %526 = vector.broadcast %434 : vector<1x32xf32> to vector<8x32xf32>
    %527 = arith.addf %525, %526 : vector<8x32xf32>
    %528 = arith.mulf %524, %527 : vector<8x32xf32>
    %529 = arith.addf %523, %528 : vector<8x32xf32>
    %530 = math.tanh %529 : vector<8x32xf32>
    %531 = vector.extract_strided_slice %522 {offsets = [0, 32], sizes = [8, 32], strides = [1, 1]} : vector<8x64xf32> to vector<8x32xf32>
    %cst_140 = arith.constant 1.000000e+00 : f32
    %532 = vector.broadcast %cst_140 : f32 to vector<8x32xf32>
    %533 = arith.subf %532, %531 : vector<8x32xf32>
    %534 = arith.mulf %533, %530 : vector<8x32xf32>
    %535 = vector.extract_strided_slice %522 {offsets = [0, 32], sizes = [8, 32], strides = [1, 1]} : vector<8x64xf32> to vector<8x32xf32>
    %536 = arith.mulf %535, %511 : vector<8x32xf32>
    %537 = arith.addf %534, %536 : vector<8x32xf32>
    %c24_141 = arith.constant 24 : index
    %c0_142 = arith.constant 0 : index
    %538 = vector.load %arg23[%c24_141, %c0_142] : memref<64x32xf32, #tpu.memory_space<vmem>>, vector<8x32xf32>
    tpu.vector_store %arg23[%c24_141, %c0_142], %537 {strides = array<i32>} : memref<64x32xf32, #tpu.memory_space<vmem>>, vector<8x32xf32>,
    %cst_143 = arith.constant dense<0.000000e+00> : vector<8x96xf32>
    %539 = tpu.matmul %537, %433, %cst_143 {dimension_numbers = #tpu.dot_dimension_numbers<[1], [0], [0], [1], [0, 0, 1, 1], [], []>} : vector<8x32xf32>, vector<32x96xf32>, vector<8x96xf32> -> vector<8x96xf32>
    %c32_144 = arith.constant 32 : index
    %c0_145 = arith.constant 0 : index
    %540 = vector.load %arg22[%c32_144, %c0_145] : memref<64x96xf32, #tpu.memory_space<vmem>>, vector<8x96xf32>
    %541 = vector.extract_strided_slice %540 {offsets = [0, 0], sizes = [8, 64], strides = [1, 1]} : vector<8x96xf32> to vector<8x64xf32>
    %542 = vector.extract_strided_slice %539 {offsets = [0, 0], sizes = [8, 64], strides = [1, 1]} : vector<8x96xf32> to vector<8x64xf32>
    %543 = arith.addf %541, %542 : vector<8x64xf32>
    %544 = arith.negf %543 : vector<8x64xf32>
    %545 = math.exp %544 : vector<8x64xf32>
    %cst_146 = arith.constant 1.000000e+00 : f32
    %546 = vector.broadcast %cst_146 : f32 to vector<8x64xf32>
    %547 = arith.addf %546, %545 : vector<8x64xf32>
    %548 = arith.divf %546, %547 : vector<8x64xf32>
    %549 = vector.extract_strided_slice %540 {offsets = [0, 64], sizes = [8, 32], strides = [1, 1]} : vector<8x96xf32> to vector<8x32xf32>
    %550 = vector.extract_strided_slice %548 {offsets = [0, 0], sizes = [8, 32], strides = [1, 1]} : vector<8x64xf32> to vector<8x32xf32>
    %551 = vector.extract_strided_slice %539 {offsets = [0, 64], sizes = [8, 32], strides = [1, 1]} : vector<8x96xf32> to vector<8x32xf32>
    %552 = vector.broadcast %434 : vector<1x32xf32> to vector<8x32xf32>
    %553 = arith.addf %551, %552 : vector<8x32xf32>
    %554 = arith.mulf %550, %553 : vector<8x32xf32>
    %555 = arith.addf %549, %554 : vector<8x32xf32>
    %556 = math.tanh %555 : vector<8x32xf32>
    %557 = vector.extract_strided_slice %548 {offsets = [0, 32], sizes = [8, 32], strides = [1, 1]} : vector<8x64xf32> to vector<8x32xf32>
    %cst_147 = arith.constant 1.000000e+00 : f32
    %558 = vector.broadcast %cst_147 : f32 to vector<8x32xf32>
    %559 = arith.subf %558, %557 : vector<8x32xf32>
    %560 = arith.mulf %559, %556 : vector<8x32xf32>
    %561 = vector.extract_strided_slice %548 {offsets = [0, 32], sizes = [8, 32], strides = [1, 1]} : vector<8x64xf32> to vector<8x32xf32>
    %562 = arith.mulf %561, %537 : vector<8x32xf32>
    %563 = arith.addf %560, %562 : vector<8x32xf32>
    %c32_148 = arith.constant 32 : index
    %c0_149 = arith.constant 0 : index
    %564 = vector.load %arg23[%c32_148, %c0_149] : memref<64x32xf32, #tpu.memory_space<vmem>>, vector<8x32xf32>
    tpu.vector_store %arg23[%c32_148, %c0_149], %563 {strides = array<i32>} : memref<64x32xf32, #tpu.memory_space<vmem>>, vector<8x32xf32>,
    %cst_150 = arith.constant dense<0.000000e+00> : vector<8x96xf32>
    %565 = tpu.matmul %563, %433, %cst_150 {dimension_numbers = #tpu.dot_dimension_numbers<[1], [0], [0], [1], [0, 0, 1, 1], [], []>} : vector<8x32xf32>, vector<32x96xf32>, vector<8x96xf32> -> vector<8x96xf32>
    %c40_151 = arith.constant 40 : index
    %c0_152 = arith.constant 0 : index
    %566 = vector.load %arg22[%c40_151, %c0_152] : memref<64x96xf32, #tpu.memory_space<vmem>>, vector<8x96xf32>
    %567 = vector.extract_strided_slice %566 {offsets = [0, 0], sizes = [8, 64], strides = [1, 1]} : vector<8x96xf32> to vector<8x64xf32>
    %568 = vector.extract_strided_slice %565 {offsets = [0, 0], sizes = [8, 64], strides = [1, 1]} : vector<8x96xf32> to vector<8x64xf32>
    %569 = arith.addf %567, %568 : vector<8x64xf32>
    %570 = arith.negf %569 : vector<8x64xf32>
    %571 = math.exp %570 : vector<8x64xf32>
    %cst_153 = arith.constant 1.000000e+00 : f32
    %572 = vector.broadcast %cst_153 : f32 to vector<8x64xf32>
    %573 = arith.addf %572, %571 : vector<8x64xf32>
    %574 = arith.divf %572, %573 : vector<8x64xf32>
    %575 = vector.extract_strided_slice %566 {offsets = [0, 64], sizes = [8, 32], strides = [1, 1]} : vector<8x96xf32> to vector<8x32xf32>
    %576 = vector.extract_strided_slice %574 {offsets = [0, 0], sizes = [8, 32], strides = [1, 1]} : vector<8x64xf32> to vector<8x32xf32>
    %577 = vector.extract_strided_slice %565 {offsets = [0, 64], sizes = [8, 32], strides = [1, 1]} : vector<8x96xf32> to vector<8x32xf32>
    %578 = vector.broadcast %434 : vector<1x32xf32> to vector<8x32xf32>
    %579 = arith.addf %577, %578 : vector<8x32xf32>
    %580 = arith.mulf %576, %579 : vector<8x32xf32>
    %581 = arith.addf %575, %580 : vector<8x32xf32>
    %582 = math.tanh %581 : vector<8x32xf32>
    %583 = vector.extract_strided_slice %574 {offsets = [0, 32], sizes = [8, 32], strides = [1, 1]} : vector<8x64xf32> to vector<8x32xf32>
    %cst_154 = arith.constant 1.000000e+00 : f32
    %584 = vector.broadcast %cst_154 : f32 to vector<8x32xf32>
    %585 = arith.subf %584, %583 : vector<8x32xf32>
    %586 = arith.mulf %585, %582 : vector<8x32xf32>
    %587 = vector.extract_strided_slice %574 {offsets = [0, 32], sizes = [8, 32], strides = [1, 1]} : vector<8x64xf32> to vector<8x32xf32>
    %588 = arith.mulf %587, %563 : vector<8x32xf32>
    %589 = arith.addf %586, %588 : vector<8x32xf32>
    %c40_155 = arith.constant 40 : index
    %c0_156 = arith.constant 0 : index
    %590 = vector.load %arg23[%c40_155, %c0_156] : memref<64x32xf32, #tpu.memory_space<vmem>>, vector<8x32xf32>
    tpu.vector_store %arg23[%c40_155, %c0_156], %589 {strides = array<i32>} : memref<64x32xf32, #tpu.memory_space<vmem>>, vector<8x32xf32>,
    %cst_157 = arith.constant dense<0.000000e+00> : vector<8x96xf32>
    %591 = tpu.matmul %589, %433, %cst_157 {dimension_numbers = #tpu.dot_dimension_numbers<[1], [0], [0], [1], [0, 0, 1, 1], [], []>} : vector<8x32xf32>, vector<32x96xf32>, vector<8x96xf32> -> vector<8x96xf32>
    %c48_158 = arith.constant 48 : index
    %c0_159 = arith.constant 0 : index
    %592 = vector.load %arg22[%c48_158, %c0_159] : memref<64x96xf32, #tpu.memory_space<vmem>>, vector<8x96xf32>
    %593 = vector.extract_strided_slice %592 {offsets = [0, 0], sizes = [8, 64], strides = [1, 1]} : vector<8x96xf32> to vector<8x64xf32>
    %594 = vector.extract_strided_slice %591 {offsets = [0, 0], sizes = [8, 64], strides = [1, 1]} : vector<8x96xf32> to vector<8x64xf32>
    %595 = arith.addf %593, %594 : vector<8x64xf32>
    %596 = arith.negf %595 : vector<8x64xf32>
    %597 = math.exp %596 : vector<8x64xf32>
    %cst_160 = arith.constant 1.000000e+00 : f32
    %598 = vector.broadcast %cst_160 : f32 to vector<8x64xf32>
    %599 = arith.addf %598, %597 : vector<8x64xf32>
    %600 = arith.divf %598, %599 : vector<8x64xf32>
    %601 = vector.extract_strided_slice %592 {offsets = [0, 64], sizes = [8, 32], strides = [1, 1]} : vector<8x96xf32> to vector<8x32xf32>
    %602 = vector.extract_strided_slice %600 {offsets = [0, 0], sizes = [8, 32], strides = [1, 1]} : vector<8x64xf32> to vector<8x32xf32>
    %603 = vector.extract_strided_slice %591 {offsets = [0, 64], sizes = [8, 32], strides = [1, 1]} : vector<8x96xf32> to vector<8x32xf32>
    %604 = vector.broadcast %434 : vector<1x32xf32> to vector<8x32xf32>
    %605 = arith.addf %603, %604 : vector<8x32xf32>
    %606 = arith.mulf %602, %605 : vector<8x32xf32>
    %607 = arith.addf %601, %606 : vector<8x32xf32>
    %608 = math.tanh %607 : vector<8x32xf32>
    %609 = vector.extract_strided_slice %600 {offsets = [0, 32], sizes = [8, 32], strides = [1, 1]} : vector<8x64xf32> to vector<8x32xf32>
    %cst_161 = arith.constant 1.000000e+00 : f32
    %610 = vector.broadcast %cst_161 : f32 to vector<8x32xf32>
    %611 = arith.subf %610, %609 : vector<8x32xf32>
    %612 = arith.mulf %611, %608 : vector<8x32xf32>
    %613 = vector.extract_strided_slice %600 {offsets = [0, 32], sizes = [8, 32], strides = [1, 1]} : vector<8x64xf32> to vector<8x32xf32>
    %614 = arith.mulf %613, %589 : vector<8x32xf32>
    %615 = arith.addf %612, %614 : vector<8x32xf32>
    %c48_162 = arith.constant 48 : index
    %c0_163 = arith.constant 0 : index
    %616 = vector.load %arg23[%c48_162, %c0_163] : memref<64x32xf32, #tpu.memory_space<vmem>>, vector<8x32xf32>
    tpu.vector_store %arg23[%c48_162, %c0_163], %615 {strides = array<i32>} : memref<64x32xf32, #tpu.memory_space<vmem>>, vector<8x32xf32>,
    %cst_164 = arith.constant dense<0.000000e+00> : vector<8x96xf32>
    %617 = tpu.matmul %615, %433, %cst_164 {dimension_numbers = #tpu.dot_dimension_numbers<[1], [0], [0], [1], [0, 0, 1, 1], [], []>} : vector<8x32xf32>, vector<32x96xf32>, vector<8x96xf32> -> vector<8x96xf32>
    %c56_165 = arith.constant 56 : index
    %c0_166 = arith.constant 0 : index
    %618 = vector.load %arg22[%c56_165, %c0_166] : memref<64x96xf32, #tpu.memory_space<vmem>>, vector<8x96xf32>
    %619 = vector.extract_strided_slice %618 {offsets = [0, 0], sizes = [8, 64], strides = [1, 1]} : vector<8x96xf32> to vector<8x64xf32>
    %620 = vector.extract_strided_slice %617 {offsets = [0, 0], sizes = [8, 64], strides = [1, 1]} : vector<8x96xf32> to vector<8x64xf32>
    %621 = arith.addf %619, %620 : vector<8x64xf32>
    %622 = arith.negf %621 : vector<8x64xf32>
    %623 = math.exp %622 : vector<8x64xf32>
    %cst_167 = arith.constant 1.000000e+00 : f32
    %624 = vector.broadcast %cst_167 : f32 to vector<8x64xf32>
    %625 = arith.addf %624, %623 : vector<8x64xf32>
    %626 = arith.divf %624, %625 : vector<8x64xf32>
    %627 = vector.extract_strided_slice %618 {offsets = [0, 64], sizes = [8, 32], strides = [1, 1]} : vector<8x96xf32> to vector<8x32xf32>
    %628 = vector.extract_strided_slice %626 {offsets = [0, 0], sizes = [8, 32], strides = [1, 1]} : vector<8x64xf32> to vector<8x32xf32>
    %629 = vector.extract_strided_slice %617 {offsets = [0, 64], sizes = [8, 32], strides = [1, 1]} : vector<8x96xf32> to vector<8x32xf32>
    %630 = vector.broadcast %434 : vector<1x32xf32> to vector<8x32xf32>
    %631 = arith.addf %629, %630 : vector<8x32xf32>
    %632 = arith.mulf %628, %631 : vector<8x32xf32>
    %633 = arith.addf %627, %632 : vector<8x32xf32>
    %634 = math.tanh %633 : vector<8x32xf32>
    %635 = vector.extract_strided_slice %626 {offsets = [0, 32], sizes = [8, 32], strides = [1, 1]} : vector<8x64xf32> to vector<8x32xf32>
    %cst_168 = arith.constant 1.000000e+00 : f32
    %636 = vector.broadcast %cst_168 : f32 to vector<8x32xf32>
    %637 = arith.subf %636, %635 : vector<8x32xf32>
    %638 = arith.mulf %637, %634 : vector<8x32xf32>
    %639 = vector.extract_strided_slice %626 {offsets = [0, 32], sizes = [8, 32], strides = [1, 1]} : vector<8x64xf32> to vector<8x32xf32>
    %640 = arith.mulf %639, %615 : vector<8x32xf32>
    %641 = arith.addf %638, %640 : vector<8x32xf32>
    %c56_169 = arith.constant 56 : index
    %c0_170 = arith.constant 0 : index
    %642 = vector.load %arg23[%c56_169, %c0_170] : memref<64x32xf32, #tpu.memory_space<vmem>>, vector<8x32xf32>
    tpu.vector_store %arg23[%c56_169, %c0_170], %641 {strides = array<i32>} : memref<64x32xf32, #tpu.memory_space<vmem>>, vector<8x32xf32>,
    %c0_171 = arith.constant 0 : index
    %c0_172 = arith.constant 0 : index
    %643 = vector.load %arg23[%c0_171, %c0_172] : memref<64x32xf32, #tpu.memory_space<vmem>>, vector<64x32xf32>
    %c0_173 = arith.constant 0 : index
    %c0_174 = arith.constant 0 : index
    %644 = vector.load %arg17[%c0_173, %c0_174] : memref<32x128xf32, #tpu.memory_space<vmem>>, vector<32x128xf32>
    %cst_175 = arith.constant dense<0.000000e+00> : vector<64x128xf32>
    %645 = tpu.matmul %643, %644, %cst_175 {dimension_numbers = #tpu.dot_dimension_numbers<[1], [0], [0], [1], [0, 0, 1, 1], [], []>} : vector<64x32xf32>, vector<32x128xf32>, vector<64x128xf32> -> vector<64x128xf32>
    %c0_176 = arith.constant 0 : index
    %c0_177 = arith.constant 0 : index
    %646 = vector.load %arg18[%c0_176, %c0_177] : memref<1x128xf32, #tpu.memory_space<vmem>>, vector<1x128xf32>
    %647 = vector.broadcast %646 : vector<1x128xf32> to vector<64x128xf32>
    %648 = arith.addf %645, %647 : vector<64x128xf32>
    %cst_178 = arith.constant dense<0xFF800000> : vector<64xf32>
    %649 = vector.multi_reduction <maximumf>, %648, %cst_178 [1] : vector<64x128xf32> to vector<64xf32>
    %650 = vector.shape_cast %649 : vector<64xf32> to vector<64x1xf32>
    %651 = vector.broadcast %650 : vector<64x1xf32> to vector<64x128xf32>
    %652 = arith.subf %648, %651 : vector<64x128xf32>
    %653 = math.exp %652 : vector<64x128xf32>
    %cst_179 = arith.constant dense<0.000000e+00> : vector<64xf32>
    %654 = vector.multi_reduction <add>, %653, %cst_179 [1] : vector<64x128xf32> to vector<64xf32>
    %655 = vector.shape_cast %654 : vector<64xf32> to vector<64x1xf32>
    %656 = math.log %655 : vector<64x1xf32>
    %657 = arith.addf %650, %656 : vector<64x1xf32>
    %c0_180 = arith.constant 0 : index
    %c0_181 = arith.constant 0 : index
    %658 = vector.load %arg2[%c0_180, %c0_181] : memref<64x128xf32, #tpu.memory_space<vmem>>, vector<64x128xf32>
    %659 = vector.broadcast %657 : vector<64x1xf32> to vector<64x128xf32>
    %660 = arith.subf %648, %659 : vector<64x128xf32>
    %661 = arith.mulf %658, %660 : vector<64x128xf32>
    %662 = vector.shape_cast %661 : vector<64x128xf32> to vector<1x64x128xf32>
    %cst_182 = arith.constant dense<0.000000e+00> : vector<1xf32>
    %663 = vector.multi_reduction <add>, %662, %cst_182 [1, 2] : vector<1x64x128xf32> to vector<1xf32>
    %664 = vector.shape_cast %663 : vector<1xf32> to vector<1x1x1xf32>
    %665 = vector.extract %664[0, 0, 0] : f32 from vector<1x1x1xf32>
    %666 = vector.broadcast %665 : f32 to vector<1x1xf32>
    %cst_183 = arith.constant 0.000000e+00 : f32
    %667 = vector.broadcast %cst_183 : f32 to vector<1x1xf32>
    %668 = arith.subf %667, %666 : vector<1x1xf32>
    %cst_184 = arith.constant 8.000000e+00 : f32
    %669 = vector.broadcast %cst_184 : f32 to vector<1x1xf32>
    %670 = arith.divf %668, %669 : vector<1x1xf32>
    %c0_185 = arith.constant 0 : index
    %c0_186 = arith.constant 0 : index
    %671 = vector.load %arg19[%c0_185, %c0_186] : memref<1x1xf32, #tpu.memory_space<vmem>>, vector<1x1xf32>
    tpu.vector_store %arg19[%c0_185, %c0_186], %670 {strides = array<i32>} : memref<1x1xf32, #tpu.memory_space<vmem>>, vector<1x1xf32>,
    return
  }
}

</mosaic_0001>

<bundles_post_ra>
// kernel: seq2seq_loss.1
= control target key start
LH: loop header
LB: loop body
LE: loop exit
PB: predicated region body
PF: predicated region fallthrough
CT: control target
= control target key end

     0   :  { %s5235_s0 = inlined_call_operand.vmem [shape: f32[64,32], index: 0, kind: input, shape index: {}]   ;;  %s5236_s1 = inlined_call_operand.vmem [shape: f32[64,32], index: 1, kind: input, shape index: {}]   ;;  %s5237_s2 = inlined_call_operand.vmem [shape: f32[64,128], index: 2, kind: input, shape index: {}]   ;;  %s5238_s3 = inlined_call_operand.vmem [shape: f32[32,96], index: 3, kind: input, shape index: {}]   ;;  %s5239_s4 = inlined_call_operand.vmem [shape: f32[32,96], index: 4, kind: input, shape index: {}]   ;;  %s5240_s5 = inlined_call_operand.vmem [shape: f32[1,96], index: 5, kind: input, shape index: {}]   ;;  %s5241_s6 = inlined_call_operand.vmem [shape: f32[1,32], index: 6, kind: input, shape index: {}]   ;;  %s5242_s7 = inlined_call_operand.vmem [shape: f32[32,96], index: 7, kind: input, shape index: {}]   ;;  %s5243_s8 = inlined_call_operand.vmem [shape: f32[32,96], index: 8, kind: input, shape index: {}]   ;;  %s5244_s9 = inlined_call_operand.vmem [shape: f32[1,96], index: 9, kind: input, shape index: {}]   ;;  %s5245_s10 = inlined_call_operand.vmem [shape: f32[1,32], index: 10, kind: input, shape index: {}]   ;;  %s5246_s11 = inlined_call_operand.vmem [shape: f32[64,32], index: 11, kind: input, shape index: {}]   ;;  %s5247_s12 = inlined_call_operand.vmem [shape: f32[1,32], index: 12, kind: input, shape index: {}]   ;;  %s5248_s13 = inlined_call_operand.vmem [shape: f32[32,96], index: 13, kind: input, shape index: {}]   ;;  %s5249_s14 = inlined_call_operand.vmem [shape: f32[32,96], index: 14, kind: input, shape index: {}]   ;;  %s5250_s15 = inlined_call_operand.vmem [shape: f32[1,96], index: 15, kind: input, shape index: {}]   ;;  %s5251_s16 = inlined_call_operand.vmem [shape: f32[1,32], index: 16, kind: input, shape index: {}]   ;;  %s5252_s17 = inlined_call_operand.vmem [shape: f32[32,128], index: 17, kind: input, shape index: {}]   ;;  %s5253_s18 = inlined_call_operand.vmem [shape: f32[1,128], index: 18, kind: input, shape index: {}]   ;;  %s5254_s19 = inlined_call_operand.hbm [shape: f32[1,1], index: 19, kind: output, shape index: {}]  }
   0x1   :  { %5259 = sst [smem:[#allocation9_spill]] %s5235_s0 }
   0x2   :  { %5260 = sst [smem:[#allocation10_spill]] %s5236_s1 }
   0x3   :  { %5261 = sst [smem:[#allocation11_spill]] %s5237_s2 }
   0x4   :  { %5262 = sst [smem:[#allocation12_spill]] %s5238_s3 }
   0x5   :  { %s5263_s20 = sld [smem:[#allocation12_spill]]  ;;  %vm90_vm0 = vcmask 261120   ;;  %v232_v6 = vld [vmem:[%s5242_s7 + $0x18] sm:$0xff]  ;;  %v231_v8 = vld [vmem:[%s5242_s7 + $0x10] sm:$0xff] }
   0x6   :  { %s5264_s23 = sld [smem:[#allocation9_spill]] }
   0xb   :  { %v82_v0 = vld [vmem:[%s5263_s20 + $0x18] sm:$0xff]  ;;  %v81_v1 = vld [vmem:[%s5263_s20 + $0x10] sm:$0xff]  ;;  %v80_v3 = vld [vmem:[%s5263_s20 + $0x8] sm:$0xff] }
   0xc   :  { %4035 = vmatprep.subr.mxu1 %v82_v0  ;;  %v4374_v2 = vld [vmem:[%s5264_s23 + $0x20] sm:$0xff]  ;;  %3672 = vmatprep.subr.mxu0 %v82_v0  ;;  %v68_v5 = vld [vmem:[%s5264_s23 + $0x28] sm:$0xff]  ;;  %v69_v7 = vld [vmem:[%s5264_s23 + $0x30] sm:$0xff] }
   0xd   :  { %4039 = vmatpush3.msra.mxu1 %v82_v0  ;;  %3686 = vmatprep.mubr.msk.f32.mxu1 %vm90_vm0, %v4374_v2  ;;  %v79_v4 = vld [vmem:[%s5263_s20] sm:$0xff] }
   0xe   :  { %4036 = vmatprep.subr.mxu1 %v81_v1  ;;  %3673 = vmatpush3.msra.mxu0 %v82_v0 }
   0xf   :  { %4040 = vmatpush3.msra.mxu1 %v81_v1  ;;  %3674 = vmatprep.subr.mxu0 %v81_v1 }
  0x10   :  { %4037 = vmatprep.subr.mxu1 %v80_v3  ;;  %3675 = vmatpush3.msra.mxu0 %v81_v1 }
  0x11   :  { %4041 = vmatpush3.msra.mxu1 %v80_v3  ;;  %3676 = vmatprep.subr.mxu0 %v80_v3 }
  0x12   :  { %4038 = vmatprep.subr.mxu1 %v79_v4  ;;  %3677 = vmatpush3.msra.mxu0 %v80_v3 }
  0x13   :  { %4042 = vmatpush3.msra.mxu1 %v79_v4  ;;  %3678 = vmatprep.subr.mxu0 %v79_v4 }
  0x14   :  { %3687 = vmatmul.mubr.msk.f32.vlgmr.msra.gmra.mxu1 %vm90_vm0, %v68_v5  ;;  %3692 = vmatprep.subr.mxu1 %v232_v6 }
  0x15   :  { %24 = vsyncpa [#allocation7], 0  ;;  %3693 = vmatpush3.msra.mxu1 %v232_v6  ;;  %3689 = vmatprep.mubr.msk.f32.mxu1 %vm90_vm0, %v69_v7  ;;  %v70_v9 = vld [vmem:[%s5264_s23 + $0x38] sm:$0xff]  ;;  %v230_v10 = vld [vmem:[%s5242_s7 + $0x8] sm:$0xff]  ;;  %v4260_v17 = vmov 0.0   ;;  %vm4261_vm1 = vmmov 0  }
  0x16   :  { %3694 = vmatprep.subr.mxu1 %v231_v8  ;;  %v63_v11 = vld [vmem:[%s5264_s23] sm:$0xff]  ;;  %3679 = vmatpush3.msra.mxu0 %v79_v4  ;;  %v64_v14 = vld [vmem:[%s5264_s23 + $0x8] sm:$0xff]  ;;  %v4422_v15 = vld [vmem:[%s5239_s4 + $0x18] sm:$0xff]  ;;  %vm220_vm2 = vcmask 785408   ;;  %s4262_s29 = smov 96   ;;  %vm2188_vm3 = vcmask 523264  }
  0x17   :  { %3695 = vmatpush3.msra.mxu1 %v231_v8  ;;  %v229_v12 = vld [vmem:[%s5242_s7] sm:$0xff]  ;;  %3680 = vmatprep.mubr.msk.f32.mxu0 %vm90_vm0, %v63_v11  ;;  %v65_v16 = vld [vmem:[%s5264_s23 + $0x10] sm:$0xff]  ;;  %v66_v20 = vld [vmem:[%s5264_s23 + $0x18] sm:$0xff]  ;;  %s5265_s23 = sld [smem:[#allocation10_spill]]  ;;  %s4264_s0 = smov [#allocation6]   ;;  %vm3392_vm4 = vcmask 0  }
  0x18   :  { %3690 = vmatmul.mubr.msk.f32.gmra.mxu1 %vm90_vm0, %v70_v9  ;;  %3696 = vmatprep.subr.mxu1 %v230_v10  ;;  %v3436_v13 = vld [vmem:[%s5241_s6] ss:$0 sm:$0xff]  ;;  %s4259_s6 = smov 64   ;;  %v4434_v18 = vld [vmem:[%s5239_s4 + $0x10] sm:$0xff]  ;;  %v4448_v21 = vld [vmem:[%s5239_s4 + $0x8] sm:$0xff] }
  0x19   :  { %3697 = vmatpush3.msra.mxu1 %v230_v10  ;;  %3700 = vmatprep.mubr.msk.f32.mxu1 %vm90_vm0, %v63_v11  ;;  %v3438_v19 = vld [vmem:[%s5245_s10] ss:$0 sm:$0xff]  ;;  %v4475_v23 = vld [vmem:[%s5243_s8 + $0x18] sm:$0xff]  ;;  %v4481_v24 = vld [vmem:[%s5243_s8 + $0x10] sm:$0xff] }
  0x1a   :  { %3698 = vmatprep.subr.mxu1 %v229_v12  ;;  %3681 = vmatmul.mubr.msk.f32.vlgmr.msra.gmra.mxu0 %vm90_vm0, %v64_v14  ;;  %v4458_v22 = vld [vmem:[%s5239_s4] sm:$0xff]  ;;  %v4490_v25 = vld [vmem:[%s5243_s8 + $0x8] sm:$0xff] }
  0x1b   :  { %3699 = vmatpush3.msra.mxu1 %v229_v12  ;;  %668 = vrot.lane.b32.xlu0 %v3436_v13, %s4259_s6  ;;  %v4497_v26 = vld [vmem:[%s5243_s8] sm:$0xff] }
  0x1c   :  { %3701 = vmatmul.mubr.msk.f32.vlgmr.msra.gmra.mxu1 %vm90_vm0, %v64_v14  ;;  %3732 = vmatprep.subr.mxu1 %v4260_v17  ;;  %v4517_v27 = vld [vmem:[%s5240_s5] ss:$0 sm:$0xff] }
  0x1d   :  { %3733 = vmatpush3.msra.mxu1 %v4422_v15  ;;  %3703 = vmatprep.mubr.msk.f32.mxu1 %vm90_vm0, %v65_v16  ;;  %v3417_v35 = vld [vmem:[%s5244_s9] ss:$0 sm:$0xff] }
  0x1e   :  { %3734 = vmatprep.subr.mxu1 %v4260_v17  ;;  %3683 = vmatprep.mubr.msk.f32.mxu0 %vm90_vm0, %v65_v16 }
  0x1f   :  { %3735 = vmatpush3.msra.mxu1 %v4434_v18  ;;  %703 = vrot.lane.b32.xlu0 %v3438_v19, %s4259_s6 }
  0x20   :  { %3704 = vmatmul.mubr.msk.f32.gmra.mxu1 %vm90_vm0, %v66_v20  ;;  %3736 = vmatprep.subr.mxu1 %v4260_v17 }
  0x21   :  { %3706 = vmatprep.mubr.msk.f32.mxu1 %vm90_vm0, %v4374_v2  ;;  %3737 = vmatpush3.msra.mxu1 %v4448_v21 }
  0x22   :  { %3738 = vmatprep.subr.mxu1 %v4260_v17  ;;  %3684 = vmatmul.mubr.msk.f32.gmra.mxu0 %vm90_vm0, %v66_v20 }
  0x23   :  { %3739 = vmatpush3.msra.mxu1 %v4458_v22 }
  0x24   :  { %3707 = vmatmul.mubr.msk.f32.gmra.mxu1 %vm90_vm0, %v68_v5  ;;  %3743 = vmatprep.subr.mxu1 %v4260_v17 }
  0x25   :  { %3709 = vmatprep.mubr.msk.f32.mxu1 %vm90_vm0, %v69_v7 }
  0x28   :  { %3710 = vmatmul.mubr.msk.f32.gmra.mxu1 %vm90_vm0, %v70_v9 }
  0x29   :  { %3740 = vmatprep.mubr.msk.f32.mxu1 %vm4261_vm1, %v4260_v17 }
  0x2c   :  { %3741 = vmatmul.mubr.f32.vlgmr.msra.gmra.mxu1 %v4260_v17 }
  0x2d   :  { %3744 = vmatpush3.msra.mxu1 %v4475_v23  ;;  %3751 = vmatprep.mubr.msk.f32.mxu1 %vm4261_vm1, %v4260_v17 }
  0x2e   :  { %3745 = vmatprep.subr.mxu1 %v4260_v17 }
  0x2f   :  { %3746 = vmatpush3.msra.mxu1 %v4481_v24 }
  0x30   :  { %3747 = vmatprep.subr.mxu1 %v4260_v17 }
  0x31   :  { %3748 = vmatpush3.msra.mxu1 %v4490_v25 }
  0x32   :  { %3749 = vmatprep.subr.mxu1 %v4260_v17 }
  0x33   :  { %3750 = vmatpush3.msra.mxu1 %v4497_v26 }
  0x34   :  { %3752 = vmatmul.mubr.f32.vlgmr.msra.gmra.mxu1 %v4260_v17  ;;  %3765 = vmatprep.subr.mxu1 %v4260_v17 }
  0x35   :  { %3766 = vmatpush3.msra.mxu1 %v4475_v23  ;;  %3773 = vmatprep.mubr.msk.f32.mxu1 %vm4261_vm1, %v4260_v17 }
  0x36   :  { %3767 = vmatprep.subr.mxu1 %v4260_v17 }
  0x37   :  { %3768 = vmatpush3.msra.mxu1 %v4481_v24 }
  0x38   :  { %3769 = vmatprep.subr.mxu1 %v4260_v17 }
  0x39   :  { %3770 = vmatpush3.msra.mxu1 %v4490_v25 }
  0x3a   :  { %3771 = vmatprep.subr.mxu1 %v4260_v17 }
  0x3b   :  { %3772 = vmatpush3.msra.mxu1 %v4497_v26 }
  0x3c   :  { %3787 = vmatprep.subr.mxu1 %v4260_v17 }
  0x8d   :  { %v4540_v56 = vpop.permute.xlu0 %668 }
  0x91   :  { %v4546_v61 = vpop.permute.xlu0 %703 }
  0xd4   :  { %v3688_v28 = vpop.f32.mrf.mxu1 }
  0xd5   :  { %v207_v29 = vadd.f32 %v3688_v28, %v4517_v27 }
  0xd6   :  { %v201_v30 = vpop.f32.mrf.mxu1 }
  0xd7   :  { %226 = vst.msk [vmem:[#allocation2 + $0x28] sm:$0xff] %vm220_vm2, %v207_v29  ;;  %v202_v31 = vadd.f32 %v4517_v27, %v201_v30 }
  0xd8   :  { %v3691_v32 = vpop.f32.mrf.mxu1 }
  0xd9   :  { %225 = vst.msk [vmem:[#allocation2 + $0x20] sm:$0xff] %vm220_vm2, %v202_v31  ;;  %v217_v33 = vadd.f32 %v3691_v32, %v4517_v27  ;;  %v356_v32 = vld [vmem:[%s5248_s13 + $0x18] sm:$0xff] }
  0xda   :  { %v211_v34 = vpop.f32.mrf.mxu1  ;;  %v3682_v36 = vpop.f32.mrf.mxu0  ;;  %3712 = vmatprep.subr.mxu0 %v356_v32 }
  0xdb   :  { %228 = vst.msk [vmem:[#allocation2 + $0x38] sm:$0xff] %vm220_vm2, %v217_v33  ;;  %v212_v37 = vadd.f32 %v4517_v27, %v211_v34  ;;  %v187_v38 = vadd.f32 %v3682_v36, %v4517_v27  ;;  %v355_v33 = vld [vmem:[%s5248_s13 + $0x10] sm:$0xff]  ;;  %v71_v34 = vld [vmem:[%s5265_s23] sm:$0xff]  ;;  %3713 = vmatpush3.msra.mxu0 %v356_v32 }
  0xdc   :  { %v3702_v39 = vpop.f32.mrf.mxu1  ;;  %v181_v40 = vpop.f32.mrf.mxu0  ;;  %3720 = vmatprep.mubr.msk.f32.mxu0 %vm90_vm0, %v71_v34  ;;  %3714 = vmatprep.subr.mxu0 %v355_v33  ;;  %v353_v36 = vld [vmem:[%s5248_s13] sm:$0xff] }
  0xdd   :  { %227 = vst.msk [vmem:[#allocation2 + $0x30] sm:$0xff] %vm220_vm2, %v212_v37  ;;  %v312_v41 = vadd.f32 %v3702_v39, %v3417_v35  ;;  %222 = vst.msk [vmem:[#allocation2 + $0x8] sm:$0xff] %vm220_vm2, %v187_v38  ;;  %v182_v42 = vadd.f32 %v4517_v27, %v181_v40  ;;  %3715 = vmatpush3.msra.mxu0 %v355_v33  ;;  %v72_v37 = vld [vmem:[%s5265_s23 + $0x8] sm:$0xff]  ;;  %v73_v38 = vld [vmem:[%s5265_s23 + $0x10] sm:$0xff] }
  0xde   :  { %v306_v43 = vpop.f32.mrf.mxu1  ;;  %v74_v40 = vld [vmem:[%s5265_s23 + $0x18] sm:$0xff] }
  0xdf   :  { %346 = vst.msk [vmem:[#allocation3 + $0x8] sm:$0xff] %vm220_vm2, %v312_v41  ;;  %v307_v44 = vadd.f32 %v3417_v35, %v306_v43  ;;  %221 = vst.msk [vmem:[#allocation2] sm:$0xff] %vm220_vm2, %v182_v42  ;;  %v75_v41 = vld [vmem:[%s5265_s23 + $0x20] sm:$0xff]  ;;  %v76_v42 = vld [vmem:[%s5265_s23 + $0x28] sm:$0xff] }
  0xe0   :  { %v3705_v45 = vpop.f32.mrf.mxu1  ;;  %v77_v43 = vld [vmem:[%s5265_s23 + $0x30] sm:$0xff] }
  0xe1   :  { %345 = vst.msk [vmem:[#allocation3] sm:$0xff] %vm220_vm2, %v307_v44  ;;  %v322_v46 = vadd.f32 %v3705_v45, %v3417_v35  ;;  %v78_v44 = vld [vmem:[%s5265_s23 + $0x38] sm:$0xff] }
  0xe2   :  { %v316_v47 = vpop.f32.mrf.mxu1 }
  0xe3   :  { %348 = vst.msk [vmem:[#allocation3 + $0x18] sm:$0xff] %vm220_vm2, %v322_v46  ;;  %v317_v48 = vadd.f32 %v3417_v35, %v316_v47  ;;  %v3685_v47 = vpop.f32.mrf.mxu0 }
  0xe4   :  { %v3708_v49 = vpop.f32.mrf.mxu1 }
  0xe5   :  { %347 = vst.msk [vmem:[#allocation3 + $0x10] sm:$0xff] %vm220_vm2, %v317_v48  ;;  %v332_v50 = vadd.f32 %v3708_v49, %v3417_v35 }
  0xe6   :  { %v326_v51 = vpop.f32.mrf.mxu1  ;;  %v654_v1 = vld [vmem:[#allocation2] sm:$0xff] }
  0xe7   :  { %350 = vst.msk [vmem:[#allocation3 + $0x28] sm:$0xff] %vm220_vm2, %v332_v50  ;;  %v327_v52 = vadd.f32 %v3417_v35, %v326_v51  ;;  %v197_v50 = vadd.f32 %v3685_v47, %v4517_v27  ;;  %v191_v51 = vpop.f32.mrf.mxu0 }
  0xe8   :  { %v3711_v53 = vpop.f32.mrf.mxu1 }
  0xe9   :  { %349 = vst.msk [vmem:[#allocation3 + $0x20] sm:$0xff] %vm220_vm2, %v327_v52  ;;  %v342_v54 = vadd.f32 %v3711_v53, %v3417_v35  ;;  %224 = vst.msk [vmem:[#allocation2 + $0x18] sm:$0xff] %vm220_vm2, %v197_v50  ;;  %v192_v53 = vadd.f32 %v4517_v27, %v191_v51  ;;  %v3426_v27 = vld [vmem:[%s5250_s15] ss:$0 sm:$0xff] }
  0xea   :  { %v336_v55 = vpop.f32.mrf.mxu1 }
  0xeb   :  { %352 = vst.msk [vmem:[#allocation3 + $0x38] sm:$0xff] %vm220_vm2, %v342_v54  ;;  %v337_v57 = vadd.f32 %v3417_v35, %v336_v55  ;;  %v354_v35 = vld [vmem:[%s5248_s13 + $0x8] sm:$0xff]  ;;  %223 = vst.msk [vmem:[#allocation2 + $0x10] sm:$0xff] %vm220_vm2, %v192_v53 }
  0xec   :  { %v580_v58 = vpop.f32.mrf.mxu1  ;;  %3716 = vmatprep.subr.mxu0 %v354_v35 }
  0xed   :  { %351 = vst.msk [vmem:[#allocation3 + $0x30] sm:$0xff] %vm220_vm2, %v337_v57  ;;  %v671_v59 = vadd.f32 %v4540_v56, %v580_v58  ;;  %v656_v2 = vadd.f32 %v654_v1, %v580_v58  ;;  %3717 = vmatpush3.msra.mxu0 %v354_v35 }
  0xee   :  { %v3742_v60 = vpop.f32.mrf.mxu1  ;;  %3718 = vmatprep.subr.mxu0 %v353_v36 }
  0xef   :  { %673 = vrot.lane.b32.xlu1 %v671_v59, %s4259_s6  ;;  %v3435_v3 = vmul.f32 -1.442695, %v656_v2  ;;  %3719 = vmatpush3.msra.mxu0 %v353_v36 }
  0xf0   :  { %3721 = vmatmul.mubr.msk.f32.vlgmr.msra.gmra.mxu0 %vm90_vm0, %v72_v37  ;;  %3754 = vmatprep.subr.mxu0 %v4260_v17 }
  0xf1   :  { %4051 = vpow2.f32 %v3435_v3  ;;  %3723 = vmatprep.mubr.msk.f32.mxu0 %vm90_vm0, %v73_v38  ;;  %3755 = vmatpush3.msra.mxu0 %v4422_v15 }
  0xf2   :  { %v655_v4 = vld [vmem:[#allocation3 + $0x38] sm:$0xff]  ;;  %3756 = vmatprep.subr.mxu0 %v4260_v17 }
  0xf3   :  { %3757 = vmatpush3.msra.mxu0 %v4434_v18 }
  0xf4   :  { %v650_v62 = vpop.f32.mrf.mxu1  ;;  %3724 = vmatmul.mubr.msk.f32.gmra.mxu0 %vm90_vm0, %v74_v40  ;;  %3758 = vmatprep.subr.mxu0 %v4260_v17  ;;  %v877_v34 = vld [vmem:[#allocation3 + $0x30] sm:$0xff] }
  0xf5   :  { %v706_v63 = vadd.f32 %v4546_v61, %v650_v62  ;;  %v691_v5 = vadd.f32 %v655_v4, %v650_v62  ;;  %3726 = vmatprep.mubr.msk.f32.mxu0 %vm90_vm0, %v75_v41  ;;  %3759 = vmatpush3.msra.mxu0 %v4448_v21 }
  0xf6   :  { %v3753_v0 = vpop.f32.mrf.mxu1  ;;  %3760 = vmatprep.subr.mxu0 %v4260_v17 }
  0xf7   :  { %708 = vrot.lane.b32.xlu1 %v706_v63, %s4259_s6  ;;  %v3437_v6 = vmul.f32 -1.442695, %v691_v5  ;;  %3761 = vmatpush3.msra.mxu0 %v4458_v22 }
  0xf8   :  { %3727 = vmatmul.mubr.msk.f32.gmra.mxu0 %vm90_vm0, %v76_v42  ;;  %3776 = vmatprep.subr.mxu0 %v4260_v17 }
  0xf9   :  { %4053 = vpow2.f32 %v3437_v6  ;;  %3729 = vmatprep.mubr.msk.f32.mxu0 %vm90_vm0, %v77_v43 }
  0xfc   :  { %3730 = vmatmul.mubr.msk.f32.gmra.mxu0 %vm90_vm0, %v78_v44 }
  0xfd   :  { %3762 = vmatprep.mubr.msk.f32.mxu0 %vm4261_vm1, %v4260_v17 }
  0xfe   :  { %v4052_v7 = vpop.eup %4051 }
  0xff   :  { %v660_v8 = vadd.f32 1.0, %v4052_v7 }
 0x101   :  { %4055 = vrcp.f32 %v660_v8 }
 0x106   :  { %v4054_v9 = vpop.eup %4053 }
 0x107   :  { %v695_v10 = vadd.f32 1.0, %v4054_v9 }
 0x109   :  { %4057 = vrcp.f32 %v695_v10 }
 0x10e   :  { %v4056_v11 = vpop.eup %4055 }
 0x10f   :  { %v683_v45 = vsub.f32 1.0, %v4056_v11  ;;  %v689_v48 = vmul.f32 0.0, %v4056_v11 }
 0x116   :  { %v4551_v14 = vpop.eup %4057 }
 0x117   :  { %v718_v54 = vsub.f32 1.0, %v4551_v14  ;;  %v724_v57 = vmul.f32 0.0, %v4551_v14 }
 0x161   :  { %v674_v12 = vpop.permute.xlu1 %673 }
 0x162   :  { %v676_v13 = vmul.f32 %v4056_v11, %v674_v12 }
 0x164   :  { %678 = vrot.lane.b32.xlu0 %v676_v13, %s4259_s6 }
 0x169   :  { %v709_v16 = vpop.permute.xlu1 %708 }
 0x16a   :  { %v711_v19 = vmul.f32 %v4551_v14, %v709_v16 }
 0x16c   :  { %713 = vrot.lane.b32.xlu1 %v711_v19, %s4259_s6 }
 0x1b0   :  { %v3722_v60 = vpop.f32.mrf.mxu0 }
 0x1b1   :  { %v460_v62 = vadd.f32 %v3722_v60, %v3426_v27 }
 0x1b2   :  { %v454_v63 = vpop.f32.mrf.mxu0 }
 0x1b3   :  { %494 = vst.msk [vmem:[#allocation4 + $0x8] sm:$0xff] %vm220_vm2, %v460_v62  ;;  %v455_v0 = vadd.f32 %v3426_v27, %v454_v63 }
 0x1b5   :  { %493 = vst.msk [vmem:[#allocation4] sm:$0xff] %vm220_vm2, %v455_v0 }
 0x1d6   :  { %v679_v20 = vpop.permute.xlu0 %678 }
 0x1d7   :  { %v681_v28 = vadd.f32 %v679_v20, %v654_v1  ;;  %v3725_v1 = vpop.f32.mrf.mxu0 }
 0x1d8   :  { %v470_v2 = vadd.f32 %v3725_v1, %v3426_v27 }
 0x1d9   :  { %4059 = vtanh.f32 %v681_v28  ;;  %v464_v3 = vpop.f32.mrf.mxu0 }
 0x1da   :  { %496 = vst.msk [vmem:[#allocation4 + $0x18] sm:$0xff] %vm220_vm2, %v470_v2 }
 0x1db   :  { %v3728_v5 = vpop.f32.mrf.mxu0 }
 0x1dc   :  { %v480_v6 = vadd.f32 %v3728_v5, %v3426_v27 }
 0x1dd   :  { %v474_v7 = vpop.f32.mrf.mxu0 }
 0x1de   :  { %v714_v29 = vpop.permute.xlu1 %713  ;;  %498 = vst.msk [vmem:[#allocation4 + $0x28] sm:$0xff] %vm220_vm2, %v480_v6  ;;  %v475_v8 = vadd.f32 %v3426_v27, %v474_v7 }
 0x1df   :  { %v716_v30 = vadd.f32 %v714_v29, %v655_v4  ;;  %v465_v4 = vadd.f32 %v3426_v27, %v464_v3  ;;  %v3731_v9 = vpop.f32.mrf.mxu0 }
 0x1e0   :  { %497 = vst.msk [vmem:[#allocation4 + $0x20] sm:$0xff] %vm220_vm2, %v475_v8  ;;  %v490_v10 = vadd.f32 %v3731_v9, %v3426_v27  ;;  %v1082_v8 = vld [vmem:[#allocation2 + $0x10] sm:$0xff] }
 0x1e1   :  { %4061 = vtanh.f32 %v716_v30  ;;  %495 = vst.msk [vmem:[#allocation4 + $0x10] sm:$0xff] %vm220_vm2, %v465_v4  ;;  %v484_v11 = vpop.f32.mrf.mxu0 }
 0x1e2   :  { %500 = vst.msk [vmem:[#allocation4 + $0x38] sm:$0xff] %vm220_vm2, %v490_v10  ;;  %v485_v12 = vadd.f32 %v3426_v27, %v484_v11  ;;  %v1083_v11 = vld [vmem:[#allocation3 + $0x28] sm:$0xff] }
 0x1e4   :  { %499 = vst.msk [vmem:[#allocation4 + $0x30] sm:$0xff] %vm220_vm2, %v485_v12 }
 0x1e6   :  { %v4060_v31 = vpop.eup %4059 }
 0x1e7   :  { %685 = vrot.lane.b32.xlu0 %v4060_v31, %s4262_s29  ;;  %v876_v31 = vld [vmem:[#allocation2 + $0x8] sm:$0xff] }
 0x1ee   :  { %v4062_v39 = vpop.eup %4061 }
 0x1ef   :  { %720 = vrot.lane.b32.xlu1 %v4062_v39, %s4262_s29 }
 0x259   :  { %v686_v46 = vpop.permute.xlu0 %685 }
 0x25a   :  { %v688_v49 = vmul.f32 %v686_v46, %v683_v45 }
 0x25c   :  { %v4613_v52 = vadd.f32 %v689_v48, %v688_v49 }
 0x25e   :  { %727 = vrot.lane.b32.xlu0 %v4613_v52, %s4262_s29 }
 0x261   :  { %v721_v55 = vpop.permute.xlu1 %720 }
 0x262   :  { %v723_v58 = vmul.f32 %v721_v55, %v718_v54 }
 0x264   :  { %v4622_v59 = vadd.f32 %v724_v57, %v723_v58 }
 0x266   :  { %802 = vrot.lane.b32.xlu1 %v4622_v59, %s4262_s29 }
 0x2d0   :  { %v728_v13 = vpop.permute.xlu0 %727 }
 0x2d1   :  { %3763 = vmatmul.mubr.msk.f32.vlgmr.msra.gmra.mxu0 %vm90_vm0, %v728_v13 }
 0x2d2   :  { %3777 = vmatpush3.msra.mxu0 %v4422_v15  ;;  %3784 = vmatprep.mubr.msk.f32.mxu0 %vm4261_vm1, %v4260_v17 }
 0x2d3   :  { %3778 = vmatprep.subr.mxu0 %v4260_v17 }
 0x2d4   :  { %3779 = vmatpush3.msra.mxu0 %v4434_v18 }
 0x2d5   :  { %3780 = vmatprep.subr.mxu0 %v4260_v17 }
 0x2d6   :  { %3781 = vmatpush3.msra.mxu0 %v4448_v21 }
 0x2d7   :  { %3782 = vmatprep.subr.mxu0 %v4260_v17 }
 0x2d8   :  { %v803_v14 = vpop.permute.xlu1 %802  ;;  %3783 = vmatpush3.msra.mxu0 %v4458_v22 }
 0x2d9   :  { %3774 = vmatmul.mubr.msk.f32.vlgmr.msra.gmra.mxu1 %vm90_vm0, %v803_v14  ;;  %3798 = vmatprep.subr.mxu0 %v4260_v17 }
 0x2da   :  { %3788 = vmatpush3.msra.mxu1 %v4475_v23  ;;  %3795 = vmatprep.mubr.msk.f32.mxu1 %vm4261_vm1, %v4260_v17 }
 0x2db   :  { %3789 = vmatprep.subr.mxu1 %v4260_v17 }
 0x2dc   :  { %3790 = vmatpush3.msra.mxu1 %v4481_v24 }
 0x2dd   :  { %3791 = vmatprep.subr.mxu1 %v4260_v17 }
 0x2de   :  { %3792 = vmatpush3.msra.mxu1 %v4490_v25 }
 0x2df   :  { %3793 = vmatprep.subr.mxu1 %v4260_v17 }
 0x2e0   :  { %3794 = vmatpush3.msra.mxu1 %v4497_v26 }
 0x2e1   :  { %3809 = vmatprep.subr.mxu1 %v4260_v17 }
 0x391   :  { %v797_v16 = vpop.f32.mrf.mxu0 }
 0x392   :  { %v885_v19 = vadd.f32 %v797_v16, %v4540_v56  ;;  %v878_v32 = vadd.f32 %v876_v31, %v797_v16 }
 0x393   :  { %v3764_v20 = vpop.f32.mrf.mxu0 }
 0x394   :  { %887 = vrot.lane.b32.xlu0 %v885_v19, %s4259_s6  ;;  %v3441_v33 = vmul.f32 -1.442695, %v878_v32 }
 0x396   :  { %4063 = vpow2.f32 %v3441_v33 }
 0x399   :  { %v872_v28 = vpop.f32.mrf.mxu1 }
 0x39a   :  { %v912_v29 = vadd.f32 %v872_v28, %v4546_v61  ;;  %v905_v35 = vadd.f32 %v877_v34, %v872_v28 }
 0x39b   :  { %v3775_v30 = vpop.f32.mrf.mxu1 }
 0x39c   :  { %914 = vrot.lane.b32.xlu1 %v912_v29, %s4259_s6  ;;  %v3442_v36 = vmul.f32 -1.442695, %v905_v35 }
 0x39e   :  { %4065 = vpow2.f32 %v3442_v36 }
 0x3a3   :  { %v4064_v37 = vpop.eup %4063 }
 0x3a4   :  { %v882_v38 = vadd.f32 1.0, %v4064_v37 }
 0x3a6   :  { %4067 = vrcp.f32 %v882_v38 }
 0x3ab   :  { %v4066_v39 = vpop.eup %4065 }
 0x3ac   :  { %v909_v40 = vadd.f32 1.0, %v4066_v39 }
 0x3ae   :  { %4069 = vrcp.f32 %v909_v40 }
 0x3b3   :  { %v4068_v41 = vpop.eup %4067 }
 0x3b4   :  { %v897_v54 = vsub.f32 1.0, %v4068_v41  ;;  %v903_v57 = vmul.f32 %v4068_v41, %v4613_v52 }
 0x3bb   :  { %v4070_v44 = vpop.eup %4069 }
 0x3bc   :  { %v924_v60 = vsub.f32 1.0, %v4070_v44  ;;  %v930_v63 = vmul.f32 %v4070_v44, %v4622_v59 }
 0x406   :  { %v888_v42 = vpop.permute.xlu0 %887 }
 0x407   :  { %v890_v43 = vmul.f32 %v4068_v41, %v888_v42 }
 0x409   :  { %892 = vrot.lane.b32.xlu0 %v890_v43, %s4259_s6 }
 0x40e   :  { %v915_v45 = vpop.permute.xlu1 %914 }
 0x40f   :  { %v917_v46 = vmul.f32 %v4070_v44, %v915_v45 }
 0x411   :  { %919 = vrot.lane.b32.xlu1 %v917_v46, %s4259_s6 }
 0x47b   :  { %v893_v47 = vpop.permute.xlu0 %892 }
 0x47c   :  { %v895_v48 = vadd.f32 %v893_v47, %v876_v31 }
 0x47e   :  { %4071 = vtanh.f32 %v895_v48 }
 0x483   :  { %v920_v49 = vpop.permute.xlu1 %919 }
 0x484   :  { %v922_v50 = vadd.f32 %v920_v49, %v877_v34 }
 0x486   :  { %4073 = vtanh.f32 %v922_v50 }
 0x48b   :  { %v4072_v51 = vpop.eup %4071 }
 0x48c   :  { %899 = vrot.lane.b32.xlu0 %v4072_v51, %s4262_s29 }
 0x493   :  { %v4074_v53 = vpop.eup %4073 }
 0x494   :  { %926 = vrot.lane.b32.xlu1 %v4074_v53, %s4262_s29 }
 0x4fe   :  { %v900_v55 = vpop.permute.xlu0 %899 }
 0x4ff   :  { %v902_v58 = vmul.f32 %v900_v55, %v897_v54 }
 0x501   :  { %v4668_v27 = vadd.f32 %v903_v57, %v902_v58 }
 0x503   :  { %933 = vrot.lane.b32.xlu0 %v4668_v27, %s4262_s29 }
 0x506   :  { %v927_v62 = vpop.permute.xlu1 %926 }
 0x507   :  { %v929_v0 = vmul.f32 %v927_v62, %v924_v60  ;;  %v1288_v60 = vld [vmem:[#allocation2 + $0x18] sm:$0xff] }
 0x509   :  { %v4673_v1 = vadd.f32 %v930_v63, %v929_v0  ;;  %v1289_v0 = vld [vmem:[#allocation3 + $0x20] sm:$0xff] }
 0x50b   :  { %1008 = vrot.lane.b32.xlu1 %v4673_v1, %s4262_s29 }
 0x575   :  { %v934_v2 = vpop.permute.xlu0 %933 }
 0x576   :  { %3785 = vmatmul.mubr.msk.f32.vlgmr.msra.gmra.mxu0 %vm90_vm0, %v934_v2 }
 0x577   :  { %3799 = vmatpush3.msra.mxu0 %v4422_v15  ;;  %3806 = vmatprep.mubr.msk.f32.mxu0 %vm4261_vm1, %v4260_v17 }
 0x578   :  { %3800 = vmatprep.subr.mxu0 %v4260_v17 }
 0x579   :  { %3801 = vmatpush3.msra.mxu0 %v4434_v18 }
 0x57a   :  { %3802 = vmatprep.subr.mxu0 %v4260_v17 }
 0x57b   :  { %3803 = vmatpush3.msra.mxu0 %v4448_v21 }
 0x57c   :  { %3804 = vmatprep.subr.mxu0 %v4260_v17 }
 0x57d   :  { %v1009_v52 = vpop.permute.xlu1 %1008  ;;  %3805 = vmatpush3.msra.mxu0 %v4458_v22 }
 0x57e   :  { %3796 = vmatmul.mubr.msk.f32.vlgmr.msra.gmra.mxu1 %vm90_vm0, %v1009_v52  ;;  %3820 = vmatprep.subr.mxu0 %v4260_v17 }
 0x57f   :  { %3810 = vmatpush3.msra.mxu1 %v4475_v23  ;;  %3817 = vmatprep.mubr.msk.f32.mxu1 %vm4261_vm1, %v4260_v17 }
 0x580   :  { %3811 = vmatprep.subr.mxu1 %v4260_v17 }
 0x581   :  { %3812 = vmatpush3.msra.mxu1 %v4481_v24 }
 0x582   :  { %3813 = vmatprep.subr.mxu1 %v4260_v17 }
 0x583   :  { %3814 = vmatpush3.msra.mxu1 %v4490_v25 }
 0x584   :  { %3815 = vmatprep.subr.mxu1 %v4260_v17 }
 0x585   :  { %3816 = vmatpush3.msra.mxu1 %v4497_v26 }
 0x586   :  { %3831 = vmatprep.subr.mxu1 %v4260_v17 }
 0x636   :  { %v1003_v59 = vpop.f32.mrf.mxu0 }
 0x637   :  { %v1091_v3 = vadd.f32 %v1003_v59, %v4540_v56  ;;  %v1084_v9 = vadd.f32 %v1082_v8, %v1003_v59 }
 0x638   :  { %v3786_v4 = vpop.f32.mrf.mxu0 }
 0x639   :  { %1093 = vrot.lane.b32.xlu0 %v1091_v3, %s4259_s6  ;;  %v3445_v10 = vmul.f32 -1.442695, %v1084_v9 }
 0x63b   :  { %4075 = vpow2.f32 %v3445_v10 }
 0x63e   :  { %v1078_v5 = vpop.f32.mrf.mxu1 }
 0x63f   :  { %v1118_v6 = vadd.f32 %v1078_v5, %v4546_v61  ;;  %v1111_v12 = vadd.f32 %v1083_v11, %v1078_v5 }
 0x640   :  { %v3797_v7 = vpop.f32.mrf.mxu1 }
 0x641   :  { %1120 = vrot.lane.b32.xlu1 %v1118_v6, %s4259_s6  ;;  %v3446_v13 = vmul.f32 -1.442695, %v1111_v12 }
 0x643   :  { %4077 = vpow2.f32 %v3446_v13 }
 0x648   :  { %v4076_v14 = vpop.eup %4075 }
 0x649   :  { %v1088_v16 = vadd.f32 1.0, %v4076_v14 }
 0x64b   :  { %4079 = vrcp.f32 %v1088_v16 }
 0x650   :  { %v4078_v19 = vpop.eup %4077 }
 0x651   :  { %v1115_v20 = vadd.f32 1.0, %v4078_v19 }
 0x653   :  { %4081 = vrcp.f32 %v1115_v20 }
 0x658   :  { %v4080_v28 = vpop.eup %4079 }
 0x659   :  { %v1103_v40 = vsub.f32 1.0, %v4080_v28  ;;  %v1109_v42 = vmul.f32 %v4080_v28, %v4668_v27 }
 0x660   :  { %v4082_v31 = vpop.eup %4081 }
 0x661   :  { %v1130_v45 = vsub.f32 1.0, %v4082_v31  ;;  %v1136_v47 = vmul.f32 %v4082_v31, %v4673_v1 }
 0x6ab   :  { %v1094_v29 = vpop.permute.xlu0 %1093 }
 0x6ac   :  { %v1096_v30 = vmul.f32 %v4080_v28, %v1094_v29 }
 0x6ae   :  { %1098 = vrot.lane.b32.xlu0 %v1096_v30, %s4259_s6 }
 0x6b3   :  { %v1121_v32 = vpop.permute.xlu1 %1120 }
 0x6b4   :  { %v1123_v33 = vmul.f32 %v4082_v31, %v1121_v32 }
 0x6b6   :  { %1125 = vrot.lane.b32.xlu1 %v1123_v33, %s4259_s6 }
 0x720   :  { %v1099_v34 = vpop.permute.xlu0 %1098 }
 0x721   :  { %v1101_v35 = vadd.f32 %v1099_v34, %v1082_v8 }
 0x723   :  { %4083 = vtanh.f32 %v1101_v35 }
 0x728   :  { %v1126_v36 = vpop.permute.xlu1 %1125 }
 0x729   :  { %v1128_v37 = vadd.f32 %v1126_v36, %v1083_v11 }
 0x72b   :  { %4085 = vtanh.f32 %v1128_v37 }
 0x730   :  { %v4084_v38 = vpop.eup %4083 }
 0x731   :  { %1105 = vrot.lane.b32.xlu0 %v4084_v38, %s4262_s29 }
 0x738   :  { %v4086_v39 = vpop.eup %4085 }
 0x739   :  { %1132 = vrot.lane.b32.xlu1 %v4086_v39, %s4262_s29 }
 0x7a3   :  { %v1106_v41 = vpop.permute.xlu0 %1105 }
 0x7a4   :  { %v1108_v43 = vmul.f32 %v1106_v41, %v1103_v40 }
 0x7a6   :  { %v4708_v44 = vadd.f32 %v1109_v42, %v1108_v43  ;;  %v1494_v42 = vld [vmem:[#allocation2 + $0x20] sm:$0xff] }
 0x7a8   :  { %1139 = vrot.lane.b32.xlu0 %v4708_v44, %s4262_s29 }
 0x7ab   :  { %v1133_v46 = vpop.permute.xlu1 %1132 }
 0x7ac   :  { %v1135_v48 = vmul.f32 %v1133_v46, %v1130_v45  ;;  %v1495_v45 = vld [vmem:[#allocation3 + $0x18] sm:$0xff] }
 0x7ae   :  { %v4713_v49 = vadd.f32 %v1136_v47, %v1135_v48 }
 0x7b0   :  { %1214 = vrot.lane.b32.xlu1 %v4713_v49, %s4262_s29 }
 0x81a   :  { %v1140_v50 = vpop.permute.xlu0 %1139 }
 0x81b   :  { %3807 = vmatmul.mubr.msk.f32.vlgmr.msra.gmra.mxu0 %vm90_vm0, %v1140_v50 }
 0x81c   :  { %3821 = vmatpush3.msra.mxu0 %v4422_v15  ;;  %3828 = vmatprep.mubr.msk.f32.mxu0 %vm4261_vm1, %v4260_v17 }
 0x81d   :  { %3822 = vmatprep.subr.mxu0 %v4260_v17 }
 0x81e   :  { %3823 = vmatpush3.msra.mxu0 %v4434_v18 }
 0x81f   :  { %3824 = vmatprep.subr.mxu0 %v4260_v17 }
 0x820   :  { %3825 = vmatpush3.msra.mxu0 %v4448_v21 }
 0x821   :  { %3826 = vmatprep.subr.mxu0 %v4260_v17 }
 0x822   :  { %v1215_v51 = vpop.permute.xlu1 %1214  ;;  %3827 = vmatpush3.msra.mxu0 %v4458_v22 }
 0x823   :  { %3818 = vmatmul.mubr.msk.f32.vlgmr.msra.gmra.mxu1 %vm90_vm0, %v1215_v51  ;;  %3842 = vmatprep.subr.mxu0 %v4260_v17 }
 0x824   :  { %3832 = vmatpush3.msra.mxu1 %v4475_v23  ;;  %3839 = vmatprep.mubr.msk.f32.mxu1 %vm4261_vm1, %v4260_v17 }
 0x825   :  { %3833 = vmatprep.subr.mxu1 %v4260_v17 }
 0x826   :  { %3834 = vmatpush3.msra.mxu1 %v4481_v24 }
 0x827   :  { %3835 = vmatprep.subr.mxu1 %v4260_v17 }
 0x828   :  { %3836 = vmatpush3.msra.mxu1 %v4490_v25 }
 0x829   :  { %3837 = vmatprep.subr.mxu1 %v4260_v17 }
 0x82a   :  { %3838 = vmatpush3.msra.mxu1 %v4497_v26 }
 0x82b   :  { %3853 = vmatprep.subr.mxu1 %v4260_v17 }
 0x8db   :  { %v1209_v53 = vpop.f32.mrf.mxu0 }
 0x8dc   :  { %v1297_v54 = vadd.f32 %v1209_v53, %v4540_v56  ;;  %v1290_v62 = vadd.f32 %v1288_v60, %v1209_v53 }
 0x8dd   :  { %v3808_v55 = vpop.f32.mrf.mxu0 }
 0x8de   :  { %1299 = vrot.lane.b32.xlu0 %v1297_v54, %s4259_s6  ;;  %v3449_v63 = vmul.f32 -1.442695, %v1290_v62 }
 0x8e0   :  { %4087 = vpow2.f32 %v3449_v63 }
 0x8e3   :  { %v1284_v57 = vpop.f32.mrf.mxu1 }
 0x8e4   :  { %v1324_v58 = vadd.f32 %v1284_v57, %v4546_v61  ;;  %v1317_v1 = vadd.f32 %v1289_v0, %v1284_v57 }
 0x8e5   :  { %v3819_v27 = vpop.f32.mrf.mxu1 }
 0x8e6   :  { %1326 = vrot.lane.b32.xlu1 %v1324_v58, %s4259_s6  ;;  %v3450_v2 = vmul.f32 -1.442695, %v1317_v1 }
 0x8e8   :  { %4089 = vpow2.f32 %v3450_v2 }
 0x8ed   :  { %v4088_v52 = vpop.eup %4087 }
 0x8ee   :  { %v1294_v59 = vadd.f32 1.0, %v4088_v52 }
 0x8f0   :  { %4091 = vrcp.f32 %v1294_v59 }
 0x8f5   :  { %v4090_v3 = vpop.eup %4089 }
 0x8f6   :  { %v1321_v4 = vadd.f32 1.0, %v4090_v3 }
 0x8f8   :  { %4093 = vrcp.f32 %v1321_v4 }
 0x8fd   :  { %v4092_v5 = vpop.eup %4091 }
 0x8fe   :  { %v1309_v20 = vsub.f32 1.0, %v4092_v5  ;;  %v1315_v29 = vmul.f32 %v4092_v5, %v4708_v44 }
 0x905   :  { %v4094_v8 = vpop.eup %4093 }
 0x906   :  { %v1336_v32 = vsub.f32 1.0, %v4094_v8  ;;  %v1342_v34 = vmul.f32 %v4094_v8, %v4713_v49 }
 0x950   :  { %v1300_v6 = vpop.permute.xlu0 %1299 }
 0x951   :  { %v1302_v7 = vmul.f32 %v4092_v5, %v1300_v6 }
 0x953   :  { %1304 = vrot.lane.b32.xlu0 %v1302_v7, %s4259_s6 }
 0x958   :  { %v1327_v9 = vpop.permute.xlu1 %1326 }
 0x959   :  { %v1329_v10 = vmul.f32 %v4094_v8, %v1327_v9 }
 0x95b   :  { %1331 = vrot.lane.b32.xlu1 %v1329_v10, %s4259_s6 }
 0x9c5   :  { %v1305_v11 = vpop.permute.xlu0 %1304 }
 0x9c6   :  { %v1307_v12 = vadd.f32 %v1305_v11, %v1288_v60 }
 0x9c8   :  { %4095 = vtanh.f32 %v1307_v12  ;;  %v4801_v12 = vld [vmem:[%s5239_s4 + $0x18] sm:$0xff] }
 0x9cd   :  { %v1332_v13 = vpop.permute.xlu1 %1331 }
 0x9ce   :  { %v1334_v14 = vadd.f32 %v1332_v13, %v1289_v0  ;;  %v4810_v13 = vld [vmem:[%s5239_s4 + $0x10] sm:$0xff] }
 0x9d0   :  { %4097 = vtanh.f32 %v1334_v14  ;;  %v4817_v14 = vld [vmem:[%s5239_s4 + $0x8] sm:$0xff] }
 0x9d5   :  { %v4096_v16 = vpop.eup %4095 }
 0x9d6   :  { %1311 = vrot.lane.b32.xlu0 %v4096_v16, %s4262_s29 }
 0x9dd   :  { %v4098_v19 = vpop.eup %4097 }
 0x9de   :  { %1338 = vrot.lane.b32.xlu1 %v4098_v19, %s4262_s29 }
 0xa48   :  { %v1312_v28 = vpop.permute.xlu0 %1311 }
 0xa49   :  { %v1314_v30 = vmul.f32 %v1312_v28, %v1309_v20 }
 0xa4b   :  { %v4748_v31 = vadd.f32 %v1315_v29, %v1314_v30  ;;  %v1700_v29 = vld [vmem:[#allocation2 + $0x28] sm:$0xff] }
 0xa4d   :  { %1345 = vrot.lane.b32.xlu0 %v4748_v31, %s4262_s29 }
 0xa50   :  { %v1339_v33 = vpop.permute.xlu1 %1338 }
 0xa51   :  { %v1341_v35 = vmul.f32 %v1339_v33, %v1336_v32 }
 0xa53   :  { %v4753_v36 = vadd.f32 %v1342_v34, %v1341_v35 }
 0xa55   :  { %1420 = vrot.lane.b32.xlu1 %v4753_v36, %s4262_s29 }
 0xabf   :  { %v1346_v37 = vpop.permute.xlu0 %1345 }
 0xac0   :  { %3829 = vmatmul.mubr.msk.f32.vlgmr.msra.gmra.mxu0 %vm90_vm0, %v1346_v37 }
 0xac1   :  { %3843 = vmatpush3.msra.mxu0 %v4422_v15  ;;  %3850 = vmatprep.mubr.msk.f32.mxu0 %vm4261_vm1, %v4260_v17 }
 0xac2   :  { %3844 = vmatprep.subr.mxu0 %v4260_v17 }
 0xac3   :  { %3845 = vmatpush3.msra.mxu0 %v4434_v18 }
 0xac4   :  { %3846 = vmatprep.subr.mxu0 %v4260_v17 }
 0xac5   :  { %3847 = vmatpush3.msra.mxu0 %v4448_v21 }
 0xac6   :  { %3848 = vmatprep.subr.mxu0 %v4260_v17 }
 0xac7   :  { %v1421_v38 = vpop.permute.xlu1 %1420  ;;  %3849 = vmatpush3.msra.mxu0 %v4458_v22 }
 0xac8   :  { %3840 = vmatmul.mubr.msk.f32.vlgmr.msra.gmra.mxu1 %vm90_vm0, %v1421_v38  ;;  %3864 = vmatprep.subr.mxu0 %v4260_v17 }
 0xac9   :  { %3854 = vmatpush3.msra.mxu1 %v4475_v23  ;;  %3861 = vmatprep.mubr.msk.f32.mxu1 %vm4261_vm1, %v4260_v17 }
 0xaca   :  { %3855 = vmatprep.subr.mxu1 %v4260_v17 }
 0xacb   :  { %3856 = vmatpush3.msra.mxu1 %v4481_v24 }
 0xacc   :  { %3857 = vmatprep.subr.mxu1 %v4260_v17 }
 0xacd   :  { %3858 = vmatpush3.msra.mxu1 %v4490_v25 }
 0xace   :  { %3859 = vmatprep.subr.mxu1 %v4260_v17 }
 0xacf   :  { %3860 = vmatpush3.msra.mxu1 %v4497_v26 }
 0xad0   :  { %3875 = vmatprep.subr.mxu1 %v4260_v17 }
 0xb80   :  { %v1415_v15 = vpop.f32.mrf.mxu0 }
 0xb81   :  { %v1503_v18 = vadd.f32 %v1415_v15, %v4540_v56  ;;  %v1496_v43 = vadd.f32 %v1494_v42, %v1415_v15 }
 0xb82   :  { %v3830_v21 = vpop.f32.mrf.mxu0 }
 0xb83   :  { %1505 = vrot.lane.b32.xlu0 %v1503_v18, %s4259_s6  ;;  %v3453_v44 = vmul.f32 -1.442695, %v1496_v43 }
 0xb85   :  { %4099 = vpow2.f32 %v3453_v44 }
 0xb88   :  { %v1490_v39 = vpop.f32.mrf.mxu1 }
 0xb89   :  { %v1530_v40 = vadd.f32 %v1490_v39, %v4546_v61  ;;  %v1523_v46 = vadd.f32 %v1495_v45, %v1490_v39 }
 0xb8a   :  { %v3841_v41 = vpop.f32.mrf.mxu1 }
 0xb8b   :  { %1532 = vrot.lane.b32.xlu1 %v1530_v40, %s4259_s6  ;;  %v3454_v47 = vmul.f32 -1.442695, %v1523_v46 }
 0xb8d   :  { %4101 = vpow2.f32 %v3454_v47 }
 0xb92   :  { %v4100_v48 = vpop.eup %4099 }
 0xb93   :  { %v1500_v49 = vadd.f32 1.0, %v4100_v48 }
 0xb95   :  { %4103 = vrcp.f32 %v1500_v49 }
 0xb9a   :  { %v4102_v50 = vpop.eup %4101 }
 0xb9b   :  { %v1527_v51 = vadd.f32 1.0, %v4102_v50 }
 0xb9d   :  { %4105 = vrcp.f32 %v1527_v51 }
 0xba2   :  { %v4104_v53 = vpop.eup %4103 }
 0xba3   :  { %v1515_v52 = vsub.f32 1.0, %v4104_v53  ;;  %v1521_v3 = vmul.f32 %v4104_v53, %v4748_v31  ;;  %v1701_v31 = vld [vmem:[#allocation3 + $0x10] sm:$0xff] }
 0xbaa   :  { %v4106_v57 = vpop.eup %4105 }
 0xbab   :  { %v1542_v6 = vsub.f32 1.0, %v4106_v57  ;;  %v1548_v8 = vmul.f32 %v4106_v57, %v4753_v36 }
 0xbf5   :  { %v1506_v54 = vpop.permute.xlu0 %1505 }
 0xbf6   :  { %v1508_v55 = vmul.f32 %v4104_v53, %v1506_v54 }
 0xbf8   :  { %1510 = vrot.lane.b32.xlu0 %v1508_v55, %s4259_s6 }
 0xbfd   :  { %v1533_v58 = vpop.permute.xlu1 %1532 }
 0xbfe   :  { %v1535_v27 = vmul.f32 %v4106_v57, %v1533_v58 }
 0xc00   :  { %1537 = vrot.lane.b32.xlu1 %v1535_v27, %s4259_s6 }
 0xc6a   :  { %v1511_v60 = vpop.permute.xlu0 %1510 }
 0xc6b   :  { %v1513_v62 = vadd.f32 %v1511_v60, %v1494_v42  ;;  %v4232_v60 = vld [vmem:[%s5239_s4] sm:$0xff] }
 0xc6d   :  { %4107 = vtanh.f32 %v1513_v62  ;;  %v4233_v62 = vld [vmem:[%s5243_s8 + $0x18] sm:$0xff] }
 0xc72   :  { %v1538_v63 = vpop.permute.xlu1 %1537 }
 0xc73   :  { %v1540_v0 = vadd.f32 %v1538_v63, %v1495_v45  ;;  %v4234_v63 = vld [vmem:[%s5243_s8 + $0x10] sm:$0xff] }
 0xc75   :  { %4109 = vtanh.f32 %v1540_v0  ;;  %v4235_v0 = vld [vmem:[%s5243_s8 + $0x8] sm:$0xff] }
 0xc7a   :  { %v4108_v1 = vpop.eup %4107 }
 0xc7b   :  { %1517 = vrot.lane.b32.xlu0 %v4108_v1, %s4262_s29  ;;  %v4236_v1 = vld [vmem:[%s5243_s8] sm:$0xff] }
 0xc82   :  { %v4110_v2 = vpop.eup %4109 }
 0xc83   :  { %1544 = vrot.lane.b32.xlu1 %v4110_v2, %s4262_s29 }
 0xced   :  { %v1518_v59 = vpop.permute.xlu0 %1517 }
 0xcee   :  { %v1520_v4 = vmul.f32 %v1518_v59, %v1515_v52 }
 0xcf0   :  { %v4788_v5 = vadd.f32 %v1521_v3, %v1520_v4 }
 0xcf2   :  { %1551 = vrot.lane.b32.xlu0 %v4788_v5, %s4262_s29 }
 0xcf5   :  { %v1545_v7 = vpop.permute.xlu1 %1544 }
 0xcf6   :  { %v1547_v9 = vmul.f32 %v1545_v7, %v1542_v6  ;;  %v1906_v6 = vld [vmem:[#allocation2 + $0x30] sm:$0xff] }
 0xcf8   :  { %v4793_v10 = vadd.f32 %v1548_v8, %v1547_v9  ;;  %v1907_v9 = vld [vmem:[#allocation3 + $0x8] sm:$0xff] }
 0xcfa   :  { %1626 = vrot.lane.b32.xlu1 %v4793_v10, %s4262_s29 }
 0xd64   :  { %v1552_v11 = vpop.permute.xlu0 %1551 }
 0xd65   :  { %3851 = vmatmul.mubr.msk.f32.vlgmr.msra.gmra.mxu0 %vm90_vm0, %v1552_v11 }
 0xd66   :  { %3865 = vmatpush3.msra.mxu0 %v4801_v12  ;;  %3872 = vmatprep.mubr.msk.f32.mxu0 %vm4261_vm1, %v4260_v17 }
 0xd67   :  { %3866 = vmatprep.subr.mxu0 %v4260_v17 }
 0xd68   :  { %3867 = vmatpush3.msra.mxu0 %v4810_v13 }
 0xd69   :  { %3868 = vmatprep.subr.mxu0 %v4260_v17 }
 0xd6a   :  { %3869 = vmatpush3.msra.mxu0 %v4817_v14 }
 0xd6b   :  { %3870 = vmatprep.subr.mxu0 %v4260_v17 }
 0xd6c   :  { %v1627_v16 = vpop.permute.xlu1 %1626  ;;  %3871 = vmatpush3.msra.mxu0 %v4458_v22 }
 0xd6d   :  { %3862 = vmatmul.mubr.msk.f32.vlgmr.msra.gmra.mxu1 %vm90_vm0, %v1627_v16  ;;  %3886 = vmatprep.subr.mxu0 %v4260_v17 }
 0xd6e   :  { %3876 = vmatpush3.msra.mxu1 %v4475_v23  ;;  %3883 = vmatprep.mubr.msk.f32.mxu1 %vm4261_vm1, %v4260_v17 }
 0xd6f   :  { %3877 = vmatprep.subr.mxu1 %v4260_v17 }
 0xd70   :  { %3878 = vmatpush3.msra.mxu1 %v4481_v24 }
 0xd71   :  { %3879 = vmatprep.subr.mxu1 %v4260_v17 }
 0xd72   :  { %3880 = vmatpush3.msra.mxu1 %v4490_v25 }
 0xd73   :  { %3881 = vmatprep.subr.mxu1 %v4260_v17 }
 0xd74   :  { %3882 = vmatpush3.msra.mxu1 %v4497_v26 }
 0xd75   :  { %3897 = vmatprep.subr.mxu1 %v4260_v17 }
 0xe25   :  { %v1621_v22 = vpop.f32.mrf.mxu0 }
 0xe26   :  { %v1709_v23 = vadd.f32 %v1621_v22, %v4540_v56  ;;  %v1702_v25 = vadd.f32 %v1700_v29, %v1621_v22 }
 0xe27   :  { %v3852_v19 = vpop.f32.mrf.mxu0 }
 0xe28   :  { %1711 = vrot.lane.b32.xlu0 %v1709_v23, %s4259_s6  ;;  %v3457_v30 = vmul.f32 -1.442695, %v1702_v25 }
 0xe2a   :  { %4111 = vpow2.f32 %v3457_v30 }
 0xe2d   :  { %v1696_v20 = vpop.f32.mrf.mxu1 }
 0xe2e   :  { %v1736_v28 = vadd.f32 %v1696_v20, %v4546_v61  ;;  %v1729_v26 = vadd.f32 %v1701_v31, %v1696_v20 }
 0xe2f   :  { %v3863_v24 = vpop.f32.mrf.mxu1 }
 0xe30   :  { %1738 = vrot.lane.b32.xlu1 %v1736_v28, %s4259_s6  ;;  %v3458_v32 = vmul.f32 -1.442695, %v1729_v26 }
 0xe32   :  { %4113 = vpow2.f32 %v3458_v32 }
 0xe37   :  { %v4112_v33 = vpop.eup %4111 }
 0xe38   :  { %v1706_v34 = vadd.f32 1.0, %v4112_v33 }
 0xe3a   :  { %4115 = vrcp.f32 %v1706_v34 }
 0xe3f   :  { %v4114_v35 = vpop.eup %4113 }
 0xe40   :  { %v1733_v36 = vadd.f32 1.0, %v4114_v35 }
 0xe42   :  { %4117 = vrcp.f32 %v1733_v36 }
 0xe47   :  { %v4116_v37 = vpop.eup %4115 }
 0xe48   :  { %v1721_v46 = vsub.f32 1.0, %v4116_v37  ;;  %v1727_v48 = vmul.f32 %v4116_v37, %v4788_v5 }
 0xe4f   :  { %v4118_v18 = vpop.eup %4117 }
 0xe50   :  { %v1748_v51 = vsub.f32 1.0, %v4118_v18  ;;  %v1754_v54 = vmul.f32 %v4118_v18, %v4793_v10 }
 0xe9a   :  { %v1712_v38 = vpop.permute.xlu0 %1711 }
 0xe9b   :  { %v1714_v15 = vmul.f32 %v4116_v37, %v1712_v38 }
 0xe9d   :  { %1716 = vrot.lane.b32.xlu0 %v1714_v15, %s4259_s6 }
 0xea2   :  { %v1739_v21 = vpop.permute.xlu1 %1738 }
 0xea3   :  { %v1741_v39 = vmul.f32 %v4118_v18, %v1739_v21 }
 0xea5   :  { %1743 = vrot.lane.b32.xlu1 %v1741_v39, %s4259_s6 }
 0xf0f   :  { %v1717_v40 = vpop.permute.xlu0 %1716 }
 0xf10   :  { %v1719_v41 = vadd.f32 %v1717_v40, %v1700_v29 }
 0xf12   :  { %4119 = vtanh.f32 %v1719_v41 }
 0xf17   :  { %v1744_v42 = vpop.permute.xlu1 %1743 }
 0xf18   :  { %v1746_v43 = vadd.f32 %v1744_v42, %v1701_v31 }
 0xf1a   :  { %4121 = vtanh.f32 %v1746_v43 }
 0xf1f   :  { %v4120_v44 = vpop.eup %4119 }
 0xf20   :  { %1723 = vrot.lane.b32.xlu0 %v4120_v44, %s4262_s29 }
 0xf27   :  { %v4122_v45 = vpop.eup %4121 }
 0xf28   :  { %1750 = vrot.lane.b32.xlu1 %v4122_v45, %s4262_s29 }
 0xf92   :  { %v1724_v47 = vpop.permute.xlu0 %1723 }
 0xf93   :  { %v1726_v49 = vmul.f32 %v1724_v47, %v1721_v46 }
 0xf95   :  { %v4843_v50 = vadd.f32 %v1727_v48, %v1726_v49  ;;  %v2112_v48 = vld [vmem:[#allocation2 + $0x38] sm:$0xff] }
 0xf97   :  { %1757 = vrot.lane.b32.xlu0 %v4843_v50, %s4262_s29 }
 0xf9a   :  { %v1751_v53 = vpop.permute.xlu1 %1750 }
 0xf9b   :  { %v1753_v55 = vmul.f32 %v1751_v53, %v1748_v51  ;;  %v2113_v51 = vld [vmem:[#allocation3] sm:$0xff] }
 0xf9d   :  { %v4848_v57 = vadd.f32 %v1754_v54, %v1753_v55 }
 0xf9f   :  { %1832 = vrot.lane.b32.xlu1 %v4848_v57, %s4262_s29 }
0x1009   :  { %v1758_v58 = vpop.permute.xlu0 %1757 }
0x100a   :  { %3873 = vmatmul.mubr.msk.f32.vlgmr.msra.gmra.mxu0 %vm90_vm0, %v1758_v58 }
0x100b   :  { %3887 = vmatpush3.msra.mxu0 %v4801_v12  ;;  %3894 = vmatprep.mubr.msk.f32.mxu0 %vm4261_vm1, %v4260_v17 }
0x100c   :  { %3888 = vmatprep.subr.mxu0 %v4260_v17 }
0x100d   :  { %3889 = vmatpush3.msra.mxu0 %v4810_v13 }
0x100e   :  { %3890 = vmatprep.subr.mxu0 %v4260_v17 }
0x100f   :  { %3891 = vmatpush3.msra.mxu0 %v4817_v14 }
0x1010   :  { %3892 = vmatprep.subr.mxu0 %v4260_v17 }
0x1011   :  { %v1833_v27 = vpop.permute.xlu1 %1832  ;;  %3893 = vmatpush3.msra.mxu0 %v4232_v60 }
0x1012   :  { %3884 = vmatmul.mubr.msk.f32.vlgmr.msra.gmra.mxu1 %vm90_vm0, %v1833_v27  ;;  %3908 = vmatprep.subr.mxu0 %v4260_v17 }
0x1013   :  { %3898 = vmatpush3.msra.mxu1 %v4233_v62  ;;  %3905 = vmatprep.mubr.msk.f32.mxu1 %vm4261_vm1, %v4260_v17 }
0x1014   :  { %3899 = vmatprep.subr.mxu1 %v4260_v17 }
0x1015   :  { %3900 = vmatpush3.msra.mxu1 %v4234_v63 }
0x1016   :  { %3901 = vmatprep.subr.mxu1 %v4260_v17 }
0x1017   :  { %3902 = vmatpush3.msra.mxu1 %v4235_v0 }
0x1018   :  { %3903 = vmatprep.subr.mxu1 %v4260_v17 }
0x1019   :  { %3904 = vmatpush3.msra.mxu1 %v4236_v1 }
0x101a   :  { %3927 = vmatprep.subr.mxu1 %v4260_v17 }
0x10ca   :  { %v1827_v2 = vpop.f32.mrf.mxu0 }
0x10cb   :  { %v1915_v52 = vadd.f32 %v1827_v2, %v4540_v56  ;;  %v1908_v7 = vadd.f32 %v1906_v6, %v1827_v2 }
0x10cc   :  { %v3874_v59 = vpop.f32.mrf.mxu0 }
0x10cd   :  { %1917 = vrot.lane.b32.xlu0 %v1915_v52, %s4259_s6  ;;  %v3461_v8 = vmul.f32 -1.442695, %v1908_v7  ;;  %v2177_v7 = vld [vmem:[%s5246_s11 + $0x20] sm:$0xff] }
0x10cf   :  { %4123 = vpow2.f32 %v3461_v8  ;;  %v2176_v8 = vld [vmem:[%s5246_s11 + $0x18] sm:$0xff] }
0x10d2   :  { %v1902_v3 = vpop.f32.mrf.mxu1 }
0x10d3   :  { %v1942_v4 = vadd.f32 %v1902_v3, %v4546_v61  ;;  %v1935_v10 = vadd.f32 %v1907_v9, %v1902_v3  ;;  %v2180_v3 = vld [vmem:[%s5246_s11 + $0x38] sm:$0xff] }
0x10d4   :  { %v3885_v5 = vpop.f32.mrf.mxu1 }
0x10d5   :  { %1944 = vrot.lane.b32.xlu1 %v1942_v4, %s4259_s6  ;;  %v3462_v11 = vmul.f32 -1.442695, %v1935_v10  ;;  %v2179_v4 = vld [vmem:[%s5246_s11 + $0x30] sm:$0xff] }
0x10d7   :  { %4125 = vpow2.f32 %v3462_v11  ;;  %v2174_v11 = vld [vmem:[%s5246_s11 + $0x8] sm:$0xff] }
0x10dc   :  { %v4124_v12 = vpop.eup %4123 }
0x10dd   :  { %v1912_v13 = vadd.f32 1.0, %v4124_v12  ;;  %v2173_v12 = vld [vmem:[%s5246_s11] sm:$0xff] }
0x10df   :  { %4127 = vrcp.f32 %v1912_v13 }
0x10e4   :  { %v4126_v14 = vpop.eup %4125 }
0x10e5   :  { %v1939_v16 = vadd.f32 1.0, %v4126_v14 }
0x10e7   :  { %4129 = vrcp.f32 %v1939_v16 }
0x10ec   :  { %v4128_v22 = vpop.eup %4127 }
0x10ed   :  { %v1927_v33 = vsub.f32 1.0, %v4128_v22  ;;  %v1933_v35 = vmul.f32 %v4128_v22, %v4843_v50 }
0x10f4   :  { %v4130_v20 = vpop.eup %4129 }
0x10f5   :  { %v1954_v38 = vsub.f32 1.0, %v4130_v20  ;;  %v1960_v18 = vmul.f32 %v4130_v20, %v4848_v57 }
0x113f   :  { %v1918_v23 = vpop.permute.xlu0 %1917 }
0x1140   :  { %v1920_v19 = vmul.f32 %v4128_v22, %v1918_v23 }
0x1142   :  { %1922 = vrot.lane.b32.xlu0 %v1920_v19, %s4259_s6 }
0x1147   :  { %v1945_v28 = vpop.permute.xlu1 %1944 }
0x1148   :  { %v1947_v24 = vmul.f32 %v4130_v20, %v1945_v28 }
0x114a   :  { %1949 = vrot.lane.b32.xlu1 %v1947_v24, %s4259_s6 }
0x11b4   :  { %v1923_v29 = vpop.permute.xlu0 %1922 }
0x11b5   :  { %v1925_v25 = vadd.f32 %v1923_v29, %v1906_v6  ;;  %v2178_v6 = vld [vmem:[%s5246_s11 + $0x28] sm:$0xff] }
0x11b7   :  { %4131 = vtanh.f32 %v1925_v25 }
0x11bc   :  { %v1950_v30 = vpop.permute.xlu1 %1949 }
0x11bd   :  { %v1952_v31 = vadd.f32 %v1950_v30, %v1907_v9  ;;  %v2175_v9 = vld [vmem:[%s5246_s11 + $0x10] sm:$0xff] }
0x11bf   :  { %4133 = vtanh.f32 %v1952_v31  ;;  %v4957_v31 = vld [vmem:[%s5249_s14 + $0x18] sm:$0xff] }
0x11c4   :  { %v4132_v26 = vpop.eup %4131 }
0x11c5   :  { %1929 = vrot.lane.b32.xlu0 %v4132_v26, %s4262_s29  ;;  %v4962_v26 = vld [vmem:[%s5249_s14 + $0x10] sm:$0xff] }
0x11cc   :  { %v4134_v32 = vpop.eup %4133 }
0x11cd   :  { %1956 = vrot.lane.b32.xlu1 %v4134_v32, %s4262_s29  ;;  %v4970_v32 = vld [vmem:[%s5249_s14 + $0x8] sm:$0xff] }
0x1237   :  { %v1930_v34 = vpop.permute.xlu0 %1929 }
0x1238   :  { %v1932_v36 = vmul.f32 %v1930_v34, %v1927_v33  ;;  %v4979_v33 = vld [vmem:[%s5249_s14] sm:$0xff] }
0x1239   :  { %v3471_v34 = vld [vmem:[%s5251_s16] ss:$0 sm:$0xff] }
0x123a   :  { %v4893_v37 = vadd.f32 %v1933_v35, %v1932_v36  ;;  %v3467_v35 = vld [vmem:[%s5247_s12] ss:$0 sm:$0xff]  ;;  %s4263_s12 = smov 32  }
0x123c   :  { %1963 = vrot.lane.b32.xlu0 %v4893_v37, %s4262_s29 }
0x123f   :  { %v1957_v15 = vpop.permute.xlu1 %1956 }
0x1240   :  { %v1959_v21 = vmul.f32 %v1957_v15, %v1954_v38 }
0x1242   :  { %v4898_v39 = vadd.f32 %v1960_v18, %v1959_v21 }
0x1244   :  { %2038 = vrot.lane.b32.xlu1 %v4898_v39, %s4262_s29 }
0x12ae   :  { %v1964_v40 = vpop.permute.xlu0 %1963 }
0x12af   :  { %3895 = vmatmul.mubr.msk.f32.vlgmr.msra.gmra.mxu0 %vm90_vm0, %v1964_v40 }
0x12b0   :  { %3924 = vmatprep.mubr.msk.f32.mxu0 %vm4261_vm1, %v4260_v17  ;;  %3909 = vmatpush3.msra.mxu0 %v2180_v3 }
0x12b1   :  { %3910 = vmatprep.subr.mxu0 %v4260_v17 }
0x12b2   :  { %3911 = vmatpush3.msra.mxu0 %v2179_v4 }
0x12b3   :  { %3912 = vmatprep.subr.mxu0 %v4260_v17 }
0x12b4   :  { %3913 = vmatpush3.msra.mxu0 %v2178_v6 }
0x12b5   :  { %3914 = vmatprep.subr.mxu0 %v4260_v17 }
0x12b6   :  { %v2039_v41 = vpop.permute.xlu1 %2038  ;;  %3915 = vmatpush3.msra.mxu0 %v2177_v7 }
0x12b7   :  { %3906 = vmatmul.mubr.msk.f32.vlgmr.msra.gmra.mxu1 %vm90_vm0, %v2039_v41  ;;  %3916 = vmatprep.subr.mxu0 %v4260_v17  ;;  %v2341_v41 = vld [vmem:[#allocation4] sm:$0xff] }
0x12b8   :  { %3935 = vmatprep.mubr.msk.f32.mxu1 %vm4261_vm1, %v4260_v17  ;;  %3917 = vmatpush3.msra.mxu0 %v2176_v8 }
0x12b9   :  { %3918 = vmatprep.subr.mxu0 %v4260_v17  ;;  %3928 = vmatpush3.msra.mxu1 %v4957_v31 }
0x12ba   :  { %3919 = vmatpush3.msra.mxu0 %v2175_v9  ;;  %3929 = vmatprep.subr.mxu1 %v4260_v17 }
0x12bb   :  { %3920 = vmatprep.subr.mxu0 %v4260_v17  ;;  %3930 = vmatpush3.msra.mxu1 %v4962_v26 }
0x12bc   :  { %3921 = vmatpush3.msra.mxu0 %v2174_v11  ;;  %3931 = vmatprep.subr.mxu1 %v4260_v17 }
0x12bd   :  { %3922 = vmatprep.subr.mxu0 %v4260_v17  ;;  %3932 = vmatpush3.msra.mxu1 %v4970_v32 }
0x12be   :  { %3923 = vmatpush3.msra.mxu0 %v2173_v12  ;;  %3933 = vmatprep.subr.mxu1 %v4260_v17 }
0x12bf   :  { %3949 = vmatprep.subr.mxu0 %v4260_v17  ;;  %3934 = vmatpush3.msra.mxu1 %v4979_v33 }
0x12c0   :  { %3938 = vmatprep.subr.mxu1 %v4260_v17 }
0x136f   :  { %v2033_v42 = vpop.f32.mrf.mxu0 }
0x1370   :  { %v2121_v43 = vadd.f32 %v2033_v42, %v4540_v56  ;;  %v2114_v49 = vadd.f32 %v2112_v48, %v2033_v42 }
0x1371   :  { %v3896_v44 = vpop.f32.mrf.mxu0 }
0x1372   :  { %2123 = vrot.lane.b32.xlu0 %v2121_v43, %s4259_s6  ;;  %v3465_v50 = vmul.f32 -1.442695, %v2114_v49 }
0x1374   :  { %4135 = vpow2.f32 %v3465_v50 }
0x1377   :  { %v2108_v45 = vpop.f32.mrf.mxu1 }
0x1378   :  { %v2148_v46 = vadd.f32 %v2108_v45, %v4546_v61  ;;  %v2141_v53 = vadd.f32 %v2113_v51, %v2108_v45 }
0x1379   :  { %v3907_v47 = vpop.f32.mrf.mxu1 }
0x137a   :  { %2150 = vrot.lane.b32.xlu1 %v2148_v46, %s4259_s6  ;;  %v3466_v54 = vmul.f32 -1.442695, %v2141_v53 }
0x137c   :  { %4137 = vpow2.f32 %v3466_v54 }
0x1381   :  { %v4136_v55 = vpop.eup %4135 }
0x1382   :  { %v2118_v57 = vadd.f32 1.0, %v4136_v55 }
0x1384   :  { %4139 = vrcp.f32 %v2118_v57 }
0x1389   :  { %v4138_v56 = vpop.eup %4137 }
0x138a   :  { %v2145_v58 = vadd.f32 1.0, %v4138_v56 }
0x138c   :  { %4141 = vrcp.f32 %v2145_v58 }
0x1391   :  { %v4140_v27 = vpop.eup %4139 }
0x1392   :  { %v2133_v13 = vsub.f32 1.0, %v4140_v27  ;;  %v2139_v16 = vmul.f32 %v4140_v27, %v4893_v37 }
0x1399   :  { %v4142_v62 = vpop.eup %4141 }
0x139a   :  { %v2160_v20 = vsub.f32 1.0, %v4142_v62  ;;  %v2166_v24 = vmul.f32 %v4142_v62, %v4898_v39 }
0x13e4   :  { %v2124_v60 = vpop.permute.xlu0 %2123 }
0x13e5   :  { %v2126_v61 = vmul.f32 %v4140_v27, %v2124_v60 }
0x13e7   :  { %2128 = vrot.lane.b32.xlu0 %v2126_v61, %s4259_s6 }
0x13ec   :  { %v2151_v63 = vpop.permute.xlu1 %2150 }
0x13ed   :  { %v2153_v0 = vmul.f32 %v4142_v62, %v2151_v63  ;;  %v2457_v63 = vld [vmem:[#allocation4 + $0x8] sm:$0xff] }
0x13ef   :  { %2155 = vrot.lane.b32.xlu1 %v2153_v0, %s4259_s6 }
0x1459   :  { %v2129_v1 = vpop.permute.xlu0 %2128 }
0x145a   :  { %v2131_v2 = vadd.f32 %v2129_v1, %v2112_v48 }
0x145c   :  { %4143 = vtanh.f32 %v2131_v2 }
0x1461   :  { %v2156_v52 = vpop.permute.xlu1 %2155 }
0x1462   :  { %v2158_v59 = vadd.f32 %v2156_v52, %v2113_v51 }
0x1464   :  { %4145 = vtanh.f32 %v2158_v59 }
0x1469   :  { %v4144_v5 = vpop.eup %4143 }
0x146a   :  { %2135 = vrot.lane.b32.xlu0 %v4144_v5, %s4262_s29 }
0x1471   :  { %v4146_v10 = vpop.eup %4145 }
0x1472   :  { %2162 = vrot.lane.b32.xlu1 %v4146_v10, %s4262_s29 }
0x1476   :  { %2354 = vrot.lane.b32.xlu1 %v3471_v34, %s4259_s6 }
0x14dc   :  { %v2136_v14 = vpop.permute.xlu0 %2135 }
0x14dd   :  { %v2138_v22 = vmul.f32 %v2136_v14, %v2133_v13 }
0x14df   :  { %v2140_v23 = vadd.f32 %v2139_v16, %v2138_v22 }
0x14e1   :  { %2169 = vrot.lane.b32.xlu0 %v2140_v23, %s4262_s29  ;;  %v2562_v23 = vld [vmem:[#allocation4 + $0x10] sm:$0xff] }
0x14e4   :  { %v2163_v19 = vpop.permute.xlu1 %2162 }
0x14e5   :  { %v2165_v28 = vmul.f32 %v2163_v19, %v2160_v20 }
0x14e7   :  { %v2167_v29 = vadd.f32 %v2166_v24, %v2165_v28 }
0x14e8   :  { %v5008_v18 = vpop.permute.xlu1 %2354 }
0x1553   :  { %v2170_v25 = vpop.permute.xlu0 %2169 }
0x1554   :  { %v2172_v30 = vsel %vm90_vm0, %v2170_v25, %v2167_v29 }
0x1555   :  { %3925 = vmatmul.mubr.msk.f32.vlgmr.msra.gmra.mxu0 %vm2188_vm3, %v2172_v30 }
0x1556   :  { %3957 = vmatprep.mubr.msk.f32.mxu0 %vm4261_vm1, %v4260_v17  ;;  %3950 = vmatpush3.msra.mxu0 %v4957_v31 }
0x1557   :  { %3951 = vmatprep.subr.mxu0 %v4260_v17 }
0x1558   :  { %3952 = vmatpush3.msra.mxu0 %v4962_v26 }
0x1559   :  { %3953 = vmatprep.subr.mxu0 %v4260_v17 }
0x155a   :  { %3954 = vmatpush3.msra.mxu0 %v4970_v32 }
0x155b   :  { %3955 = vmatprep.subr.mxu0 %v4260_v17 }
0x155c   :  { %3956 = vmatpush3.msra.mxu0 %v4979_v33 }
0x155d   :  { %3971 = vmatprep.subr.mxu0 %v4260_v17 }
0x1615   :  { %v2258_v36 = vpop.f32.mrf.mxu0 }
0x1616   :  { %v2259_v37 = vadd.f32 %v3467_v35, %v2258_v36 }
0x1617   :  { %v3926_v38 = vpop.f32.mrf.mxu0 }
0x1618   :  { %4147 = vtanh.f32 %v2259_v37 }
0x1625   :  { %v4148_v15 = vpop.eup %4147 }
0x1626   :  { %3936 = vmatmul.mubr.msk.f32.vlgmr.msra.gmra.mxu1 %vm90_vm0, %v4148_v15 }
0x1627   :  { %3939 = vmatpush3.msra.mxu1 %v4957_v31  ;;  %3946 = vmatprep.mubr.msk.f32.mxu1 %vm4261_vm1, %v4260_v17 }
0x1628   :  { %3940 = vmatprep.subr.mxu1 %v4260_v17 }
0x1629   :  { %3941 = vmatpush3.msra.mxu1 %v4962_v26 }
0x162a   :  { %3942 = vmatprep.subr.mxu1 %v4260_v17 }
0x162b   :  { %3943 = vmatpush3.msra.mxu1 %v4970_v32 }
0x162c   :  { %3944 = vmatprep.subr.mxu1 %v4260_v17 }
0x162d   :  { %3945 = vmatpush3.msra.mxu1 %v4979_v33 }
0x162e   :  { %3960 = vmatprep.subr.mxu1 %v4260_v17 }
0x16e6   :  { %v2337_v21 = vpop.f32.mrf.mxu1 }
0x16e7   :  { %v2357_v39 = vadd.f32 %v5008_v18, %v2337_v21  ;;  %v2342_v42 = vadd.f32 %v2341_v41, %v2337_v21 }
0x16e8   :  { %v3937_v40 = vpop.f32.mrf.mxu1 }
0x16e9   :  { %2359 = vrot.lane.b32.xlu0 %v2357_v39, %s4259_s6  ;;  %v3470_v43 = vmul.f32 -1.442695, %v2342_v42 }
0x16eb   :  { %4149 = vpow2.f32 %v3470_v43 }
0x16f8   :  { %v4150_v44 = vpop.eup %4149 }
0x16f9   :  { %v2346_v45 = vadd.f32 1.0, %v4150_v44  ;;  %v2667_v44 = vld [vmem:[#allocation4 + $0x18] sm:$0xff] }
0x16fb   :  { %4151 = vrcp.f32 %v2346_v45 }
0x1708   :  { %v4152_v46 = vpop.eup %4151 }
0x1709   :  { %v2369_v54 = vsub.f32 1.0, %v4152_v46 }
0x175b   :  { %v2360_v47 = vpop.permute.xlu0 %2359 }
0x175c   :  { %v2362_v48 = vmul.f32 %v4152_v46, %v2360_v47 }
0x175e   :  { %2364 = vrot.lane.b32.xlu1 %v2362_v48, %s4259_s6 }
0x1762   :  { %2375 = vrot.lane.b32.xlu1 %v4148_v15, %s4263_s12  ;;  %s3400_s12 = sshll.u32 %s4264_s0, 4  ;;  %s3401_s12 = int_to_ptr.vmem [resolvable:$true] %s3400_s12 }
0x1763   :  { %s4237_s16 = scalar_lea.vmem %s3401_s12, 16  ;;  %s4241_s23 = scalar_lea.vmem %s3401_s12, 32 }
0x1764   :  { %p4238_p0 = scmp.ne.s32.totalorder %s3401_s12, %s4237_s16  ;;  %p4242_p1 = scmp.lt.s32.totalorder %s3401_s12, %s3401_s12 }
0x1765   :  { %p4243_p2 = scmp.lt.s32.totalorder %s4241_s23, %s4237_s16 }
0x1767   :  { %p4244_p3 = por %p4243_p2, %p4242_p1 }
0x1769   :  { %p4245_p4 = pnand %p4244_p3, %p4238_p0 }
0x17d0   :  { %v2365_v49 = vpop.permute.xlu1 %2364 }
0x17d1   :  { %v2367_v50 = vadd.f32 %v2365_v49, %v2341_v41 }
0x17d3   :  { %4153 = vtanh.f32 %v2367_v50 }
0x17d4   :  { %v2376_v53 = vpop.permute.xlu1 %2375 }
0x17d5   :  { %v2378_v57 = vmul.f32 %v4152_v46, %v2376_v53 }
0x17e0   :  { %v4154_v51 = vpop.eup %4153 }
0x17e1   :  { %2371 = vrot.lane.b32.xlu0 %v4154_v51, %s4262_s29 }
0x1853   :  { %v2372_v55 = vpop.permute.xlu0 %2371 }
0x1854   :  { %v2374_v56 = vmul.f32 %v2372_v55, %v2369_v54 }
0x1856   :  { %v2379_v58 = vadd.f32 %v2378_v57, %v2374_v56 }
0x1858   :  { %2381 = vrot.lane.b32.xlu0 %v2379_v58, %s4262_s29 }
0x18ca   :  { %v2382_v27 = vpop.permute.xlu0 %2381 }
0x18cb   :  { %2384 = vst.msk [vmem:[#allocation5] sm:$0xff] %vm90_vm0, %v2382_v27  ;;  %3947 = vmatmul.mubr.msk.f32.vlgmr.msra.gmra.mxu1 %vm90_vm0, %v2382_v27 }
0x18cc   :  { %3961 = vmatpush3.msra.mxu1 %v4957_v31  ;;  %3968 = vmatprep.mubr.msk.f32.mxu1 %vm4261_vm1, %v4260_v17 }
0x18cd   :  { %3962 = vmatprep.subr.mxu1 %v4260_v17 }
0x18ce   :  { %3963 = vmatpush3.msra.mxu1 %v4962_v26 }
0x18cf   :  { %3964 = vmatprep.subr.mxu1 %v4260_v17 }
0x18d0   :  { %3965 = vmatpush3.msra.mxu1 %v4970_v32 }
0x18d1   :  { %3966 = vmatprep.subr.mxu1 %v4260_v17 }
0x18d2   :  { %3967 = vmatpush3.msra.mxu1 %v4979_v33 }
0x18d3   :  { %3982 = vmatprep.subr.mxu1 %v4260_v17 }
0x198b   :  { %v2453_v60 = vpop.f32.mrf.mxu1 }
0x198c   :  { %v2465_v61 = vadd.f32 %v2453_v60, %v5008_v18  ;;  %v2458_v0 = vadd.f32 %v2457_v63, %v2453_v60 }
0x198d   :  { %v3948_v62 = vpop.f32.mrf.mxu1 }
0x198e   :  { %2467 = vrot.lane.b32.xlu1 %v2465_v61, %s4259_s6  ;;  %v3473_v1 = vmul.f32 -1.442695, %v2458_v0 }
0x1990   :  { %4155 = vpow2.f32 %v3473_v1  ;;  %v2772_v1 = vld [vmem:[#allocation4 + $0x20] sm:$0xff] }
0x199d   :  { %v4156_v2 = vpop.eup %4155 }
0x199e   :  { %v2462_v52 = vadd.f32 1.0, %v4156_v2 }
0x19a0   :  { %4157 = vrcp.f32 %v2462_v52 }
0x19ad   :  { %v4158_v59 = vpop.eup %4157 }
0x19ae   :  { %v2477_v8 = vsub.f32 1.0, %v4158_v59  ;;  %v2483_v10 = vmul.f32 %v4158_v59, %v2379_v58 }
0x1a00   :  { %v2468_v3 = vpop.permute.xlu1 %2467 }
0x1a01   :  { %v2470_v4 = vmul.f32 %v4158_v59, %v2468_v3 }
0x1a03   :  { %2472 = vrot.lane.b32.xlu0 %v2470_v4, %s4259_s6 }
0x1a75   :  { %v2473_v5 = vpop.permute.xlu0 %2472 }
0x1a76   :  { %v2475_v6 = vadd.f32 %v2473_v5, %v2457_v63 }
0x1a78   :  { %4159 = vtanh.f32 %v2475_v6 }
0x1a85   :  { %v4160_v7 = vpop.eup %4159 }
0x1a86   :  { %2479 = vrot.lane.b32.xlu1 %v4160_v7, %s4262_s29 }
0x1af8   :  { %v2480_v9 = vpop.permute.xlu1 %2479 }
0x1af9   :  { %v2482_v11 = vmul.f32 %v2480_v9, %v2477_v8 }
0x1afb   :  { %v2484_v12 = vadd.f32 %v2483_v10, %v2482_v11 }
0x1afd   :  { %2486 = vrot.lane.b32.xlu0 %v2484_v12, %s4262_s29 }
0x1b6f   :  { %v2487_v13 = vpop.permute.xlu0 %2486 }
0x1b70   :  { %2489 = vst.msk [vmem:[#allocation5 + $0x8] sm:$0xff] %vm90_vm0, %v2487_v13  ;;  %3958 = vmatmul.mubr.msk.f32.vlgmr.msra.gmra.mxu0 %vm90_vm0, %v2487_v13 }
0x1b71   :  { %3972 = vmatpush3.msra.mxu0 %v4957_v31  ;;  %3979 = vmatprep.mubr.msk.f32.mxu0 %vm4261_vm1, %v4260_v17 }
0x1b72   :  { %3973 = vmatprep.subr.mxu0 %v4260_v17 }
0x1b73   :  { %3974 = vmatpush3.msra.mxu0 %v4962_v26 }
0x1b74   :  { %3975 = vmatprep.subr.mxu0 %v4260_v17 }
0x1b75   :  { %3976 = vmatpush3.msra.mxu0 %v4970_v32 }
0x1b76   :  { %3977 = vmatprep.subr.mxu0 %v4260_v17 }
0x1b77   :  { %3978 = vmatpush3.msra.mxu0 %v4979_v33 }
0x1b78   :  { %3993 = vmatprep.subr.mxu0 %v4260_v17 }
0x1c30   :  { %v2558_v14 = vpop.f32.mrf.mxu0 }
0x1c31   :  { %v2570_v16 = vadd.f32 %v2558_v14, %v5008_v18  ;;  %v2563_v19 = vadd.f32 %v2562_v23, %v2558_v14 }
0x1c32   :  { %v3959_v22 = vpop.f32.mrf.mxu0 }
0x1c33   :  { %2572 = vrot.lane.b32.xlu1 %v2570_v16, %s4259_s6  ;;  %v3475_v20 = vmul.f32 -1.442695, %v2563_v19 }
0x1c35   :  { %4161 = vpow2.f32 %v3475_v20 }
0x1c42   :  { %v4162_v28 = vpop.eup %4161 }
0x1c43   :  { %v2567_v24 = vadd.f32 1.0, %v4162_v28 }
0x1c45   :  { %4163 = vrcp.f32 %v2567_v24 }
0x1c52   :  { %v4164_v29 = vpop.eup %4163 }
0x1c53   :  { %v2582_v37 = vsub.f32 1.0, %v4164_v29  ;;  %v2588_v15 = vmul.f32 %v4164_v29, %v2484_v12 }
0x1ca5   :  { %v2573_v25 = vpop.permute.xlu1 %2572 }
0x1ca6   :  { %v2575_v30 = vmul.f32 %v4164_v29, %v2573_v25 }
0x1ca8   :  { %2577 = vrot.lane.b32.xlu0 %v2575_v30, %s4259_s6  ;;  %v3131_v30 = vld [vmem:[%s5252_s17 + $0x18] sm:$0xff] }
0x1d1a   :  { %v2578_v34 = vpop.permute.xlu0 %2577 }
0x1d1b   :  { %v2580_v35 = vadd.f32 %v2578_v34, %v2562_v23 }
0x1d1d   :  { %4165 = vtanh.f32 %v2580_v35 }
0x1d2a   :  { %v4166_v36 = vpop.eup %4165 }
0x1d2b   :  { %2584 = vrot.lane.b32.xlu1 %v4166_v36, %s4262_s29 }
0x1d9d   :  { %v2585_v38 = vpop.permute.xlu1 %2584 }
0x1d9e   :  { %v2587_v21 = vmul.f32 %v2585_v38, %v2582_v37 }
0x1da0   :  { %v2589_v39 = vadd.f32 %v2588_v15, %v2587_v21 }
0x1da2   :  { %2591 = vrot.lane.b32.xlu0 %v2589_v39, %s4262_s29 }
0x1e14   :  { %v2592_v40 = vpop.permute.xlu0 %2591 }
0x1e15   :  { %2594 = vst.msk [vmem:[#allocation5 + $0x10] sm:$0xff] %vm90_vm0, %v2592_v40  ;;  %3969 = vmatmul.mubr.msk.f32.vlgmr.msra.gmra.mxu1 %vm90_vm0, %v2592_v40  ;;  %v3120_v40 = vld [vmem:[#allocation5] sm:$0xff] }
0x1e16   :  { %3983 = vmatpush3.msra.mxu1 %v4957_v31  ;;  %3990 = vmatprep.mubr.msk.f32.mxu1 %vm4261_vm1, %v4260_v17 }
0x1e17   :  { %3984 = vmatprep.subr.mxu1 %v4260_v17 }
0x1e18   :  { %3985 = vmatpush3.msra.mxu1 %v4962_v26 }
0x1e19   :  { %3986 = vmatprep.subr.mxu1 %v4260_v17 }
0x1e1a   :  { %3987 = vmatpush3.msra.mxu1 %v4970_v32 }
0x1e1b   :  { %3988 = vmatprep.subr.mxu1 %v4260_v17 }
0x1e1c   :  { %3989 = vmatpush3.msra.mxu1 %v4979_v33 }
0x1e1d   :  { %4004 = vmatprep.subr.mxu1 %v4260_v17 }
0x1ed5   :  { %v2663_v41 = vpop.f32.mrf.mxu1 }
0x1ed6   :  { %v2675_v42 = vadd.f32 %v2663_v41, %v5008_v18  ;;  %v2668_v45 = vadd.f32 %v2667_v44, %v2663_v41  ;;  %v3129_v41 = vld [vmem:[%s5252_s17 + $0x8] sm:$0xff] }
0x1ed7   :  { %v3970_v43 = vpop.f32.mrf.mxu1 }
0x1ed8   :  { %2677 = vrot.lane.b32.xlu1 %v2675_v42, %s4259_s6  ;;  %v3477_v46 = vmul.f32 -1.442695, %v2668_v45  ;;  %v3128_v42 = vld [vmem:[%s5252_s17] sm:$0xff]  ;;  %v3121_v43 = vld [vmem:[#allocation5 + $0x8] sm:$0xff] }
0x1eda   :  { %4167 = vpow2.f32 %v3477_v46 }
0x1ee7   :  { %v4168_v47 = vpop.eup %4167 }
0x1ee8   :  { %v2672_v48 = vadd.f32 1.0, %v4168_v47 }
0x1eea   :  { %4169 = vrcp.f32 %v2672_v48 }
0x1ef7   :  { %v4170_v49 = vpop.eup %4169 }
0x1ef8   :  { %v2687_v57 = vsub.f32 1.0, %v4170_v49  ;;  %v2693_v58 = vmul.f32 %v4170_v49, %v2589_v39  ;;  %v3130_v39 = vld [vmem:[%s5252_s17 + $0x10] sm:$0xff] }
0x1f4a   :  { %v2678_v50 = vpop.permute.xlu1 %2677 }
0x1f4b   :  { %v2680_v51 = vmul.f32 %v4170_v49, %v2678_v50 }
0x1f4d   :  { %2682 = vrot.lane.b32.xlu0 %v2680_v51, %s4259_s6  ;;  %v2982_v51 = vld [vmem:[#allocation4 + $0x30] sm:$0xff] }
0x1fbf   :  { %v2683_v53 = vpop.permute.xlu0 %2682 }
0x1fc0   :  { %v2685_v54 = vadd.f32 %v2683_v53, %v2667_v44  ;;  %v3122_v44 = vld [vmem:[#allocation5 + $0x10] sm:$0xff] }
0x1fc2   :  { %4171 = vtanh.f32 %v2685_v54 }
0x1fcf   :  { %v4172_v55 = vpop.eup %4171 }
0x1fd0   :  { %2689 = vrot.lane.b32.xlu1 %v4172_v55, %s4262_s29 }
0x2042   :  { %v2690_v56 = vpop.permute.xlu1 %2689 }
0x2043   :  { %v2692_v27 = vmul.f32 %v2690_v56, %v2687_v57 }
0x2045   :  { %v2694_v60 = vadd.f32 %v2693_v58, %v2692_v27 }
0x2047   :  { %2696 = vrot.lane.b32.xlu0 %v2694_v60, %s4262_s29 }
0x20b9   :  { %v2697_v61 = vpop.permute.xlu0 %2696 }
0x20ba   :  { %2699 = vst.msk [vmem:[#allocation5 + $0x18] sm:$0xff] %vm90_vm0, %v2697_v61  ;;  %3980 = vmatmul.mubr.msk.f32.vlgmr.msra.gmra.mxu0 %vm90_vm0, %v2697_v61 }
0x20bb   :  { %3994 = vmatpush3.msra.mxu0 %v4957_v31  ;;  %4001 = vmatprep.mubr.msk.f32.mxu0 %vm4261_vm1, %v4260_v17 }
0x20bc   :  { %3995 = vmatprep.subr.mxu0 %v4260_v17 }
0x20bd   :  { %3996 = vmatpush3.msra.mxu0 %v4962_v26 }
0x20be   :  { %3997 = vmatprep.subr.mxu0 %v4260_v17 }
0x20bf   :  { %3998 = vmatpush3.msra.mxu0 %v4970_v32 }
0x20c0   :  { %3999 = vmatprep.subr.mxu0 %v4260_v17 }
0x20c1   :  { %4000 = vmatpush3.msra.mxu0 %v4979_v33  ;;  %v3123_v45 = vld [vmem:[#allocation5 + $0x18] sm:$0xff] }
0x20c2   :  { %4015 = vmatprep.subr.mxu0 %v3131_v30 }
0x217a   :  { %v2768_v62 = vpop.f32.mrf.mxu0 }
0x217b   :  { %v2780_v63 = vadd.f32 %v2768_v62, %v5008_v18  ;;  %v2773_v2 = vadd.f32 %v2772_v1, %v2768_v62 }
0x217c   :  { %v3981_v0 = vpop.f32.mrf.mxu0 }
0x217d   :  { %2782 = vrot.lane.b32.xlu1 %v2780_v63, %s4259_s6  ;;  %v3479_v52 = vmul.f32 -1.442695, %v2773_v2 }
0x217f   :  { %4173 = vpow2.f32 %v3479_v52 }
0x218c   :  { %v4174_v59 = vpop.eup %4173 }
0x218d   :  { %v2777_v3 = vadd.f32 1.0, %v4174_v59 }
0x218f   :  { %4175 = vrcp.f32 %v2777_v3 }
0x219c   :  { %v4176_v4 = vpop.eup %4175 }
0x219d   :  { %v2792_v10 = vsub.f32 1.0, %v4176_v4  ;;  %v2798_v12 = vmul.f32 %v4176_v4, %v2694_v60 }
0x21ef   :  { %v2783_v5 = vpop.permute.xlu1 %2782 }
0x21f0   :  { %v2785_v6 = vmul.f32 %v4176_v4, %v2783_v5 }
0x21f2   :  { %2787 = vrot.lane.b32.xlu0 %v2785_v6, %s4259_s6 }
0x2264   :  { %v2788_v7 = vpop.permute.xlu0 %2787 }
0x2265   :  { %v2790_v8 = vadd.f32 %v2788_v7, %v2772_v1  ;;  %v3087_v7 = vld [vmem:[#allocation4 + $0x38] sm:$0xff] }
0x2267   :  { %4177 = vtanh.f32 %v2790_v8 }
0x2274   :  { %v4178_v9 = vpop.eup %4177 }
0x2275   :  { %2794 = vrot.lane.b32.xlu1 %v4178_v9, %s4262_s29 }
0x22e7   :  { %v2795_v11 = vpop.permute.xlu1 %2794 }
0x22e8   :  { %v2797_v13 = vmul.f32 %v2795_v11, %v2792_v10 }
0x22ea   :  { %v2799_v14 = vadd.f32 %v2798_v12, %v2797_v13 }
0x22ec   :  { %2801 = vrot.lane.b32.xlu0 %v2799_v14, %s4262_s29 }
0x235e   :  { %v2802_v16 = vpop.permute.xlu0 %2801 }
0x235f   :  { %2804 = vst.msk [vmem:[#allocation5 + $0x20] sm:$0xff] %vm90_vm0, %v2802_v16  ;;  %3991 = vmatmul.mubr.msk.f32.vlgmr.msra.gmra.mxu1 %vm90_vm0, %v2802_v16 }
0x2360   :  { %4005 = vmatpush3.msra.mxu1 %v4957_v31  ;;  %4012 = vmatprep.mubr.msk.f32.mxu1 %vm4261_vm1, %v4260_v17  ;;  %v2877_v31 = vld [vmem:[#allocation4 + $0x28] sm:$0xff] }
0x2361   :  { %4006 = vmatprep.subr.mxu1 %v4260_v17 }
0x2362   :  { %4007 = vmatpush3.msra.mxu1 %v4962_v26 }
0x2363   :  { %4008 = vmatprep.subr.mxu1 %v4260_v17 }
0x2364   :  { %4009 = vmatpush3.msra.mxu1 %v4970_v32 }
0x2365   :  { %4010 = vmatprep.subr.mxu1 %v4260_v17 }
0x2366   :  { %4011 = vmatpush3.msra.mxu1 %v4979_v33  ;;  %v3124_v46 = vld [vmem:[#allocation5 + $0x20] sm:$0xff] }
0x241f   :  { %v2873_v22 = vpop.f32.mrf.mxu1 }
0x2420   :  { %v2885_v23 = vadd.f32 %v2873_v22, %v5008_v18  ;;  %v2878_v20 = vadd.f32 %v2877_v31, %v2873_v22 }
0x2421   :  { %v3992_v19 = vpop.f32.mrf.mxu1 }
0x2422   :  { %2887 = vrot.lane.b32.xlu1 %v2885_v23, %s4259_s6  ;;  %v3481_v28 = vmul.f32 -1.442695, %v2878_v20  ;;  %v3486_v20 = vld [vmem:[%s5253_s18] ss:$0 sm:$0xff] }
0x2424   :  { %4179 = vpow2.f32 %v3481_v28 }
0x2431   :  { %v4180_v24 = vpop.eup %4179 }
0x2432   :  { %v2882_v26 = vadd.f32 1.0, %v4180_v24 }
0x2434   :  { %4181 = vrcp.f32 %v2882_v26 }
0x2441   :  { %v4182_v29 = vpop.eup %4181 }
0x2442   :  { %v2897_v35 = vsub.f32 1.0, %v4182_v29  ;;  %v2903_v37 = vmul.f32 %v4182_v29, %v2799_v14 }
0x2494   :  { %v2888_v25 = vpop.permute.xlu1 %2887 }
0x2495   :  { %v2890_v32 = vmul.f32 %v4182_v29, %v2888_v25 }
0x2497   :  { %2892 = vrot.lane.b32.xlu0 %v2890_v32, %s4259_s6 }
0x2509   :  { %v2893_v17 = vpop.permute.xlu0 %2892 }
0x250a   :  { %v2895_v33 = vadd.f32 %v2893_v17, %v2877_v31 }
0x250c   :  { %4183 = vtanh.f32 %v2895_v33 }
0x2519   :  { %v4184_v34 = vpop.eup %4183 }
0x251a   :  { %2899 = vrot.lane.b32.xlu1 %v4184_v34, %s4262_s29 }
0x258c   :  { %v2900_v36 = vpop.permute.xlu1 %2899 }
0x258d   :  { %v2902_v38 = vmul.f32 %v2900_v36, %v2897_v35 }
0x258f   :  { %v2904_v15 = vadd.f32 %v2903_v37, %v2902_v38 }
0x2591   :  { %2906 = vrot.lane.b32.xlu0 %v2904_v15, %s4262_s29 }
0x2603   :  { %v2907_v21 = vpop.permute.xlu0 %2906 }
0x2604   :  { %2909 = vst.msk [vmem:[#allocation5 + $0x28] sm:$0xff] %vm90_vm0, %v2907_v21  ;;  %4002 = vmatmul.mubr.msk.f32.vlgmr.msra.gmra.mxu0 %vm90_vm0, %v2907_v21 }
0x2605   :  { %4016 = vmatpush3.msra.mxu0 %v3131_v30  ;;  %4023 = vmatprep.mubr.msk.f32.mxu0 %vm90_vm0, %v3120_v40 }
0x2606   :  { %4017 = vmatprep.subr.mxu0 %v3130_v39 }
0x2607   :  { %4018 = vmatpush3.msra.mxu0 %v3130_v39 }
0x2608   :  { %4019 = vmatprep.subr.mxu0 %v3129_v41 }
0x2609   :  { %4020 = vmatpush3.msra.mxu0 %v3129_v41 }
0x260a   :  { %4021 = vmatprep.subr.mxu0 %v3128_v42 }
0x260b   :  { %4022 = vmatpush3.msra.mxu0 %v3128_v42  ;;  %v3125_v47 = vld [vmem:[#allocation5 + $0x28] sm:$0xff] }
0x260c   :  { %4024 = vmatmul.mubr.msk.f32.vlgmr.msra.gmra.mxu0 %vm90_vm0, %v3121_v43 }
0x260d   :  { %4026 = vmatprep.mubr.msk.f32.mxu0 %vm90_vm0, %v3122_v44 }
0x2610   :  { %4027 = vmatmul.mubr.msk.f32.gmra.mxu0 %vm90_vm0, %v3123_v45 }
0x2611   :  { %4029 = vmatprep.mubr.msk.f32.mxu0 %vm90_vm0, %v3124_v46 }
0x2614   :  { %4030 = vmatmul.mubr.msk.f32.gmra.mxu0 %vm90_vm0, %v3125_v47 }
0x26c4   :  { %v2978_v48 = vpop.f32.mrf.mxu0 }
0x26c5   :  { %v2990_v49 = vadd.f32 %v2978_v48, %v5008_v18  ;;  %v2983_v53 = vadd.f32 %v2982_v51, %v2978_v48 }
0x26c6   :  { %v4003_v50 = vpop.f32.mrf.mxu0 }
0x26c7   :  { %2992 = vrot.lane.b32.xlu1 %v2990_v49, %s4259_s6  ;;  %v3483_v54 = vmul.f32 -1.442695, %v2983_v53 }
0x26c9   :  { %4185 = vpow2.f32 %v3483_v54 }
0x26d6   :  { %v4186_v55 = vpop.eup %4185 }
0x26d7   :  { %v2987_v57 = vadd.f32 1.0, %v4186_v55 }
0x26d9   :  { %4187 = vrcp.f32 %v2987_v57 }
0x26e6   :  { %v4188_v56 = vpop.eup %4187 }
0x26e7   :  { %v3002_v63 = vsub.f32 1.0, %v4188_v56  ;;  %v3008_v1 = vmul.f32 %v4188_v56, %v2904_v15 }
0x2739   :  { %v2993_v58 = vpop.permute.xlu1 %2992 }
0x273a   :  { %v2995_v27 = vmul.f32 %v4188_v56, %v2993_v58 }
0x273c   :  { %2997 = vrot.lane.b32.xlu0 %v2995_v27, %s4259_s6 }
0x27ae   :  { %v2998_v60 = vpop.permute.xlu0 %2997 }
0x27af   :  { %v3000_v61 = vadd.f32 %v2998_v60, %v2982_v51 }
0x27b1   :  { %4189 = vtanh.f32 %v3000_v61 }
0x27be   :  { %v4190_v62 = vpop.eup %4189 }
0x27bf   :  { %3004 = vrot.lane.b32.xlu1 %v4190_v62, %s4262_s29 }
0x2831   :  { %v3005_v0 = vpop.permute.xlu1 %3004 }
0x2832   :  { %v3007_v2 = vmul.f32 %v3005_v0, %v3002_v63 }
0x2834   :  { %v3009_v52 = vadd.f32 %v3008_v1, %v3007_v2 }
0x2836   :  { %3011 = vrot.lane.b32.xlu0 %v3009_v52, %s4262_s29 }
0x28a8   :  { %v3012_v59 = vpop.permute.xlu0 %3011 }
0x28a9   :  { %3014 = vst.msk [vmem:[#allocation5 + $0x30] sm:$0xff] %vm90_vm0, %v3012_v59  ;;  %4013 = vmatmul.mubr.msk.f32.vlgmr.msra.gmra.mxu1 %vm90_vm0, %v3012_v59 }
0x28b0   :  { %v3126_v3 = vld [vmem:[#allocation5 + $0x30] sm:$0xff] }
0x28b1   :  { %4032 = vmatprep.mubr.msk.f32.mxu0 %vm90_vm0, %v3126_v3 }
0x2969   :  { %v3083_v4 = vpop.f32.mrf.mxu1 }
0x296a   :  { %v3095_v5 = vadd.f32 %v3083_v4, %v5008_v18  ;;  %v3088_v8 = vadd.f32 %v3087_v7, %v3083_v4  ;;  %v4025_v18 = vpop.f32.mrf.mxu0 }
0x296b   :  { %v4014_v6 = vpop.f32.mrf.mxu1  ;;  %v5143_v35 = vadd.f32 %v4025_v18, %v3486_v20 }
0x296c   :  { %3097 = vrot.lane.b32.xlu1 %v3095_v5, %s4259_s6  ;;  %v3485_v9 = vmul.f32 -1.442695, %v3088_v8  ;;  %v3229_v19 = vpop.f32.mrf.mxu0 }
0x296d   :  { %v5133_v28 = vadd.f32 %v3486_v20, %v3229_v19 }
0x296e   :  { %4191 = vpow2.f32 %v3485_v9  ;;  %v4028_v31 = vpop.f32.mrf.mxu0 }
0x296f   :  { %v5136_v26 = vadd.f32 %v4028_v31, %v3486_v20 }
0x2970   :  { %v3239_v24 = vpop.f32.mrf.mxu0 }
0x2971   :  { %v5146_v36 = vadd.f32 %v3486_v20, %v3239_v24 }
0x2972   :  { %v4031_v29 = vpop.f32.mrf.mxu0 }
0x2973   :  { %v5139_v25 = vadd.f32 %v4031_v29, %v3486_v20 }
0x2974   :  { %v3249_v37 = vpop.f32.mrf.mxu0 }
0x2975   :  { %v5149_v38 = vadd.f32 %v3486_v20, %v3249_v37 }
0x297b   :  { %v4192_v10 = vpop.eup %4191 }
0x297c   :  { %v3092_v11 = vadd.f32 1.0, %v4192_v10 }
0x297e   :  { %4193 = vrcp.f32 %v3092_v11 }
0x298b   :  { %v4194_v12 = vpop.eup %4193 }
0x298c   :  { %v3107_v32 = vsub.f32 1.0, %v4194_v12  ;;  %v3113_v33 = vmul.f32 %v4194_v12, %v3009_v52 }
0x29de   :  { %v3098_v13 = vpop.permute.xlu1 %3097 }
0x29df   :  { %v3100_v14 = vmul.f32 %v4194_v12, %v3098_v13 }
0x29e1   :  { %3102 = vrot.lane.b32.xlu0 %v3100_v14, %s4259_s6 }
0x2a53   :  { %v3103_v16 = vpop.permute.xlu0 %3102 }
0x2a54   :  { %v3105_v22 = vadd.f32 %v3103_v16, %v3087_v7 }
0x2a56   :  { %4195 = vtanh.f32 %v3105_v22 }
0x2a63   :  { %v4196_v23 = vpop.eup %4195 }
0x2a64   :  { %3109 = vrot.lane.b32.xlu1 %v4196_v23, %s4262_s29 }
0x2a88   :  { %3268 = vmax.xlane.f32.xlu1 %v5133_v28 }
0x2a8c   :  { %3274 = vmax.xlane.f32.xlu1 %v5136_v26 }
0x2a90   :  { %3278 = vmax.xlane.f32.xlu1 %v5139_v25 }
0x2ad6   :  { %v3110_v17 = vpop.permute.xlu1 %3109 }
0x2ad7   :  { %v3112_v30 = vmul.f32 %v3110_v17, %v3107_v32 }
0x2ad9   :  { %v3114_v34 = vadd.f32 %v3113_v33, %v3112_v30 }
0x2adb   :  { %3116 = vrot.lane.b32.xlu0 %v3114_v34, %s4262_s29  ;;  %s5266_s29 = sld [smem:[#allocation11_spill]] }
0x2afa   :  { %3270 = vmax.xlane.f32.xlu0 %v5143_v35 }
0x2afe   :  { %3272 = vmax.xlane.f32.xlu0 %v5146_v36 }
0x2b02   :  { %3276 = vmax.xlane.f32.xlu0 %v5149_v38 }
0x2b11   :  { %v5154_v39 = vpop.xlane.xlu1 %3268 }
0x2b12   :  { %v3284_v44 = vsub.f32 %v5133_v28, %v5154_v39 }
0x2b14   :  { %v3292_v48 = vmul.f32 1.442695, %v3284_v44 }
0x2b15   :  { %v5158_v41 = vpop.xlane.xlu1 %3274 }
0x2b16   :  { %v3287_v45 = vsub.f32 %v5136_v26, %v5158_v41 }
0x2b18   :  { %v3298_v51 = vmul.f32 1.442695, %v3287_v45 }
0x2b19   :  { %v5168_v47 = vpop.xlane.xlu1 %3278 }
0x2b1a   :  { %v3289_v53 = vsub.f32 %v5139_v25, %v5168_v47 }
0x2b1c   :  { %v3302_v57 = vmul.f32 1.442695, %v3289_v53 }
0x2b4d   :  { %v3117_v15 = vpop.permute.xlu0 %3116 }
0x2b4e   :  { %3119 = vst.msk [vmem:[#allocation5 + $0x38] sm:$0xff] %vm90_vm0, %v3117_v15  ;;  %v3348_v15 = vld [vmem:[%s5266_s29] sm:$0xff] }
0x2b55   :  { %v3127_v21 = vld [vmem:[#allocation5 + $0x38] sm:$0xff] }
0x2b56   :  { %4033 = vmatmul.mubr.msk.f32.gmra.mxu0 %vm90_vm0, %v3127_v21 }
0x2b83   :  { %v5156_v40 = vpop.xlane.xlu0 %3270 }
0x2b84   :  { %v3285_v42 = vsub.f32 %v5143_v35, %v5156_v40 }
0x2b86   :  { %v3294_v46 = vmul.f32 1.442695, %v3285_v42 }
0x2b87   :  { %v5162_v43 = vpop.xlane.xlu0 %3272 }
0x2b88   :  { %v3286_v49 = vsub.f32 %v5146_v36, %v5162_v43  ;;  %4197 = vpow2.f32 %v3294_v46 }
0x2b89   :  { %4199 = vpow2.f32 %v3292_v48 }
0x2b8a   :  { %v3296_v54 = vmul.f32 1.442695, %v3286_v49  ;;  %4201 = vpow2.f32 %v3298_v51 }
0x2b8b   :  { %v5172_v50 = vpop.xlane.xlu0 %3276 }
0x2b8c   :  { %v3288_v55 = vsub.f32 %v5149_v38, %v5172_v50  ;;  %4203 = vpow2.f32 %v3296_v54  ;;  %v3351_v54 = vld [vmem:[%s5266_s29 + $0x18] sm:$0xff] }
0x2b8d   :  { %4205 = vpow2.f32 %v3302_v57 }
0x2b8e   :  { %v3300_v56 = vmul.f32 1.442695, %v3288_v55 }
0x2b90   :  { %4207 = vpow2.f32 %v3300_v56 }
0x2b95   :  { %v4198_v62 = vpop.eup %4197 }
0x2b96   :  { %v4200_v63 = vpop.eup %4199 }
0x2b97   :  { %v4202_v0 = vpop.eup %4201 }
0x2b99   :  { %v4204_v1 = vpop.eup %4203 }
0x2b9a   :  { %v4206_v2 = vpop.eup %4205 }
0x2b9d   :  { %v4208_v52 = vpop.eup %4207 }
0x2c16   :  { %v4034_v58 = vpop.f32.mrf.mxu0 }
0x2c17   :  { %v5178_v27 = vadd.f32 %v4034_v58, %v3486_v20 }
0x2c18   :  { %v3259_v60 = vpop.f32.mrf.mxu0 }
0x2c19   :  { %v5180_v61 = vadd.f32 %v3486_v20, %v3259_v60  ;;  %3282 = vmax.xlane.f32.xlu1 %v5178_v27 }
0x2c1b   :  { %3280 = vmax.xlane.f32.xlu0 %v5180_v61 }
0x2c1d   :  { %3310 = vadd.xlane.f32.xlu1 %v4198_v62 }
0x2c1f   :  { %3308 = vadd.xlane.f32.xlu0 %v4200_v63 }
0x2c21   :  { %3314 = vadd.xlane.f32.xlu1 %v4202_v0 }
0x2c23   :  { %3312 = vadd.xlane.f32.xlu0 %v4204_v1 }
0x2c25   :  { %3318 = vadd.xlane.f32.xlu1 %v4206_v2 }
0x2c27   :  { %3316 = vadd.xlane.f32.xlu0 %v4208_v52 }
0x2ca2   :  { %v5184_v59 = vpop.xlane.xlu1 %3282 }
0x2ca3   :  { %v3291_v3 = vsub.f32 %v5178_v27, %v5184_v59 }
0x2ca4   :  { %v5188_v4 = vpop.xlane.xlu0 %3280 }
0x2ca5   :  { %v3306_v5 = vmul.f32 1.442695, %v3291_v3  ;;  %v3290_v6 = vsub.f32 %v5180_v61, %v5188_v4 }
0x2ca6   :  { %v3311_v11 = vpop.xlane.xlu1 %3310 }
0x2ca7   :  { %4209 = vpow2.f32 %v3306_v5  ;;  %v3304_v7 = vmul.f32 1.442695, %v3290_v6 }
0x2ca8   :  { %v3309_v10 = vpop.xlane.xlu0 %3308 }
0x2ca9   :  { %4211 = vpow2.f32 %v3304_v7 }
0x2caa   :  { %4213 = vlog2.f32 %v3309_v10  ;;  %v3315_v13 = vpop.xlane.xlu1 %3314 }
0x2cab   :  { %4215 = vlog2.f32 %v3311_v11 }
0x2cac   :  { %v3313_v12 = vpop.xlane.xlu0 %3312 }
0x2cad   :  { %4217 = vlog2.f32 %v3313_v12 }
0x2cae   :  { %4219 = vlog2.f32 %v3315_v13  ;;  %v3319_v22 = vpop.xlane.xlu1 %3318 }
0x2cb0   :  { %v3317_v14 = vpop.xlane.xlu0 %3316 }
0x2cb1   :  { %4221 = vlog2.f32 %v3317_v14 }
0x2cb2   :  { %4223 = vlog2.f32 %v3319_v22 }
0x2cb4   :  { %v4210_v8 = vpop.eup %4209 }
0x2cb5   :  { %3322 = vadd.xlane.f32.xlu1 %v4210_v8 }
0x2cb6   :  { %v4212_v9 = vpop.eup %4211 }
0x2cb7   :  { %3320 = vadd.xlane.f32.xlu0 %v4212_v9  ;;  %v4214_v16 = vpop.eup %4213 }
0x2cb8   :  { %v4216_v23 = vpop.eup %4215  ;;  %v3325_v19 = vmul.f32 0.6931472, %v4214_v16 }
0x2cb9   :  { %v3327_v31 = vmul.f32 0.6931472, %v4216_v23 }
0x2cba   :  { %v4218_v18 = vpop.eup %4217  ;;  %v3340_v24 = vadd.f32 %v3325_v19, %v5154_v39 }
0x2cbb   :  { %v3329_v20 = vmul.f32 0.6931472, %v4218_v18  ;;  %v4220_v29 = vpop.eup %4219  ;;  %v3341_v32 = vadd.f32 %v3327_v31, %v5156_v40  ;;  %v3349_v40 = vld [vmem:[%s5266_s29 + $0x8] sm:$0xff] }
0x2cbc   :  { %v3356_v34 = vsub.f32 %v5133_v28, %v3340_v24  ;;  %v3331_v37 = vmul.f32 0.6931472, %v4220_v29  ;;  %v3350_v28 = vld [vmem:[%s5266_s29 + $0x10] sm:$0xff] }
0x2cbd   :  { %v3342_v17 = vadd.f32 %v3329_v20, %v5162_v43  ;;  %v3357_v42 = vsub.f32 %v5143_v35, %v3341_v32 }
0x2cbe   :  { %v4222_v33 = vpop.eup %4221  ;;  %v3364_v43 = vmul.f32 %v3356_v34, %v3348_v15  ;;  %v3343_v45 = vadd.f32 %v3331_v37, %v5158_v41  ;;  %v3352_v41 = vld [vmem:[%s5266_s29 + $0x20] sm:$0xff] }
0x2cbf   :  { %v3358_v39 = vsub.f32 %v5146_v36, %v3342_v17  ;;  %v3333_v44 = vmul.f32 0.6931472, %v4222_v33  ;;  %v4224_v46 = vpop.eup %4223  ;;  %v3365_v48 = vmul.f32 %v3357_v42, %v3349_v40 }
0x2cc0   :  { %v3359_v36 = vsub.f32 %v5136_v26, %v3343_v45  ;;  %v3335_v53 = vmul.f32 0.6931472, %v4224_v46 }
0x2cc1   :  { %v3366_v49 = vmul.f32 %v3358_v39, %v3350_v28  ;;  %v3344_v35 = vadd.f32 %v3333_v44, %v5172_v50  ;;  %v3372_v51 = vadd.f32 %v3365_v48, %v3364_v43 }
0x2cc2   :  { %v3367_v56 = vmul.f32 %v3359_v36, %v3351_v54  ;;  %v3345_v58 = vadd.f32 %v3335_v53, %v5168_v47  ;;  %v3354_v47 = vld [vmem:[%s5266_s29 + $0x30] sm:$0xff] }
0x2cc3   :  { %v3373_v55 = vadd.f32 %v3372_v51, %v3366_v49  ;;  %v3360_v57 = vsub.f32 %v5149_v38, %v3344_v35  ;;  %v3353_v38 = vld [vmem:[%s5266_s29 + $0x28] sm:$0xff] }
0x2cc4   :  { %v3361_v0 = vsub.f32 %v5139_v25, %v3345_v58  ;;  %v3355_v25 = vld [vmem:[%s5266_s29 + $0x38] sm:$0xff] }
0x2cc5   :  { %v3368_v50 = vmul.f32 %v3360_v57, %v3352_v41  ;;  %v3374_v63 = vadd.f32 %v3373_v55, %v3367_v56 }
0x2cc6   :  { %v3369_v7 = vmul.f32 %v3361_v0, %v3353_v38 }
0x2cc7   :  { %v3375_v3 = vadd.f32 %v3374_v63, %v3368_v50 }
0x2cc9   :  { %v3376_v8 = vadd.f32 %v3375_v3, %v3369_v7 }
0x2d3e   :  { %v3323_v30 = vpop.xlane.xlu1 %3322 }
0x2d3f   :  { %4225 = vlog2.f32 %v3323_v30 }
0x2d40   :  { %v3321_v21 = vpop.xlane.xlu0 %3320 }
0x2d41   :  { %4227 = vlog2.f32 %v3321_v21 }
0x2d4c   :  { %v4226_v60 = vpop.eup %4225 }
0x2d4d   :  { %v3339_v62 = vmul.f32 0.6931472, %v4226_v60 }
0x2d4e   :  { %v4228_v26 = vpop.eup %4227 }
0x2d4f   :  { %v3347_v1 = vadd.f32 %v3339_v62, %v5184_v59  ;;  %v3337_v2 = vmul.f32 0.6931472, %v4228_v26 }
0x2d51   :  { %v3346_v52 = vadd.f32 %v3337_v2, %v5188_v4  ;;  %v3363_v5 = vsub.f32 %v5178_v27, %v3347_v1 }
0x2d53   :  { %v3362_v6 = vsub.f32 %v5180_v61, %v3346_v52  ;;  %v3371_v9 = vmul.f32 %v3363_v5, %v3355_v25 }
0x2d55   :  { %v3370_v59 = vmul.f32 %v3362_v6, %v3354_v47 }
0x2d57   :  { %v3377_v10 = vadd.f32 %v3376_v8, %v3370_v59 }
0x2d59   :  { %v3378_v11 = vadd.f32 %v3377_v10, %v3371_v9 }
0x2d5b   :  { %3379 = vadd.xlane.f32.xlu0 %v3378_v11 }
0x2de4   :  { %v3380_v4 = vpop.xlane.xlu0 %3379 }
0x2de5   :  { %v3381_v12 = vrot.slane %v3380_v4, 4 }
0x2de7   :  { %v3382_v13 = vadd.f32 %v3381_v12, %v3380_v4 }
0x2de9   :  { %v3383_v14 = vrot.slane %v3382_v13, 2 }
0x2deb   :  { %v3384_v16 = vadd.f32 %v3383_v14, %v3382_v13 }
0x2ded   :  { %v3385_v22 = vrot.slane %v3384_v16, 1 }
0x2def   :  { %v3386_v27 = vadd.f32 %v3385_v22, %v3384_v16 }
0x2df1   :  { %4043 = vpush %v3386_v27 }
0x2e22   :  { %s4044_s10 = spop %4043 }
0x2e23   :  { %v3388_v61 = vstv %s4044_s10 }
0x2e24   :  { %v3389_v23 = vsub.f32 0.0, %v3388_v61 }
0x2e26   :  { %v3391_v18 = vmul.f32 0.125, %v3389_v23 }
0x2e28   :  { %3393 = vst.msk [vmem:[#allocation6] sm:$0x1] %vm3392_vm4, %v3391_v18 }
0x2e29   :  { %4248 = shalt.err (!%p4245_p4)
}
0x2e2a   :  { %3403 = dma.vmem_to_hbm [thread:$0]  %s3401_s12, 16, %s5254_s19, [#allocation7]  }
0x2e2b   :  { %4257 = dma.done.wait [#allocation7], 16  }
0x2e2c   :  { %4258 = vsyncadd [#allocation7], 4294967280 }
0x2e2d   :  { %3407 = vsyncpa [#allocation7], 1 }

</bundles_post_ra>
